<compile_context>
chip_gen: v7x
topology: tpu7x:2x2x1
jax: 0.10.0
libtpu: 0.0.40
codegen_flags: <defaults>
</compile_context>

<pallas_src>
import functools
import math

import jax
import jax.numpy as jnp
from jax.experimental import pallas as pl
from jax.experimental.pallas import tpu as pltpu


def _round_up(x, m):
    return ((x + m - 1) // m) * m


# ---------------------------------------------------------------------------
# Pallas kernel: K-streamed fused gated GEMM
#   acc += X_tile @ W_tile                  (bf16 x bf16 -> f32 on the MXU)
#   on the last K step:  out = acc[:, :Cout] * sigmoid(acc[:, Cout:])
# ---------------------------------------------------------------------------
def _gated_gemm_kernel(x_ref, w_ref, o_ref, acc_ref, *, cout):
    @pl.when(pl.program_id(1) == 0)
    def _init():
        acc_ref[...] = jnp.zeros_like(acc_ref)

    acc_ref[...] += jnp.dot(x_ref[...], w_ref[...],
                            preferred_element_type=jnp.float32)

    @pl.when(pl.program_id(1) == pl.num_programs(1) - 1)
    def _finalize():
        acc = acc_ref[...]
        feat = acc[:, :cout]          # static, lane-aligned slices (Cout=128 demo)
        gate = acc[:, cout:]
        # Gating kept in f32 (EUP sigmoid), single cast at the store.
        o_ref[...] = (feat * jax.nn.sigmoid(gate)).astype(o_ref.dtype)


def _choose_tk(k_pad, tk_max=2048):
    """Largest multiple-of-128 divisor of k_pad that is <= tk_max."""
    units = k_pad // 128
    best = 1
    for d in range(1, units + 1):
        if units % d == 0 and d * 128 <= tk_max:
            best = d
    return best * 128


def gated_matmul(x_col, w_mat, cout):
    """x_col: [M, K] patch matrix, w_mat: [K, 2*cout] fused (feat|gate) weight.

    Returns [M, cout] float32: (x_col @ Wf) * sigmoid(x_col @ Wg).
    """
    M, K = x_col.shape

    # Pad K to a multiple of 128: lane-aligned X loads, full MXU contraction.
    K_pad = _round_up(K, 128)
    if K_pad != K:
        x_col = jnp.pad(x_col, ((0, 0), (0, K_pad - K)))
        w_mat = jnp.pad(w_mat, ((0, K_pad - K), (0, 0)))

    # Row tile: >=2 tiles when M is large enough (feeds both v7x TensorCores),
    # otherwise a single 8-aligned tile; pad M so the grid divides evenly.
    m_pad8 = _round_up(M, 8)
    TM = m_pad8 if m_pad8 <= 256 else 256
    M_pad = _round_up(M, TM)
    if M_pad != M:
        x_col = jnp.pad(x_col, ((0, M_pad - M), (0, 0)))

    TK = _choose_tk(K_pad)
    grid = (M_pad // TM, K_pad // TK)

    # bf16 operands (2x MXU throughput, half the HBM/VMEM traffic), f32 accumulate.
    x_col = x_col.astype(jnp.bfloat16)
    w_mat = w_mat.astype(jnp.bfloat16)

    out = pl.pallas_call(
        functools.partial(_gated_gemm_kernel, cout=cout),
        out_shape=jax.ShapeDtypeStruct((M_pad, cout), jnp.float32),
        grid_spec=pltpu.PrefetchScalarGridSpec(
            num_scalar_prefetch=0,
            grid=grid,
            in_specs=[
                pl.BlockSpec((TM, TK), lambda i, k: (i, k)),
                pl.BlockSpec((TK, 2 * cout), lambda i, k: (k, 0)),
            ],
            out_specs=pl.BlockSpec((TM, cout), lambda i, k: (i, 0)),
            scratch_shapes=[pltpu.VMEM((TM, 2 * cout), jnp.float32)],
        ),
        compiler_params=pltpu.CompilerParams(
            dimension_semantics=("parallel", "arbitrary")),
    )(x_col, w_mat)
    return out[:M]


# ---------------------------------------------------------------------------
# JAX glue: 3D patch extraction (im2col) and weight reshaping
# ---------------------------------------------------------------------------
def _im2col_3d(x_ncthw):
    """x: [N, C, T, H, W]; kernel (T,3,3), pad (0,1,1), stride 1.

    Returns col [N*H*W, 9*T*C] with K index order (kh, kw, t, c).
    """
    N, C, T, H, W = x_ncthw.shape
    x = jnp.transpose(x_ncthw, (0, 2, 3, 4, 1))                 # [N, T, H, W, C]
    xp = jnp.pad(x, ((0, 0), (0, 0), (1, 1), (1, 1), (0, 0)))   # spatial pad 1
    patches = []
    for kh in range(3):
        for kw in range(3):
            patches.append(xp[:, :, kh:kh + H, kw:kw + W, :])   # [N, T, H, W, C]
    col = jnp.stack(patches, axis=0)                            # [9, N, T, H, W, C]
    col = jnp.transpose(col, (1, 3, 4, 0, 2, 5))                # [N, H, W, 9, T, C]
    return col.reshape(N * H * W, 9 * T * C)


def _weight_to_mat(w):
    """Conv3d weight [2*Cout, Cin, T, 3, 3] -> GEMM weight [9*T*Cin, 2*Cout]
    with K order (kh, kw, t, c) matching _im2col_3d."""
    o, cin, t, kh, kw = w.shape
    return jnp.transpose(w, (3, 4, 2, 1, 0)).reshape(kh * kw * t * cin, o)


# ---------------------------------------------------------------------------
# Parameters (deterministic, kaiming_normal_(mode='fan_out'), bias=False)
# ---------------------------------------------------------------------------
def init_params(key, in_ch, T):
    # One conv producing 2*in_ch channels (feature + gate).
    fan_out = (2 * in_ch) * T * 3 * 3
    std = math.sqrt(2.0 / fan_out)
    return std * jax.random.normal(key, (2 * in_ch, in_ch, T, 3, 3), jnp.float32)


# ---------------------------------------------------------------------------
# Forward pass (matches VI_Aggregator.forward)
# ---------------------------------------------------------------------------
def vi_aggregator(x_ncthw, w):
    N, C, T, H, W = x_ncthw.shape
    cout = w.shape[0] // 2
    col = _im2col_3d(x_ncthw)                       # [N*H*W, 9*T*C]
    y = gated_matmul(col, _weight_to_mat(w), cout)  # [N*H*W, cout] f32
    y = y.reshape(N, H, W, cout)
    y = jnp.transpose(y, (0, 3, 1, 2))              # [N, cout, H, W]
    return y[:, :, None, :, :]                      # [N, cout, 1, H, W]  (T_out = 1)


if __name__ == "__main__":
    key = jax.random.PRNGKey(0)
    pkey, xkey = jax.random.split(key)

    # Input: batch=2, in_ch=128 (VINet bottleneck width), T=4 frames, 16x16 spatial.
    N, C, T, H, W = 2, 128, 4, 16, 16
    w = init_params(pkey, C, T)
    x = jax.random.normal(xkey, (N, C, T, H, W), jnp.float32)

    fwd = jax.jit(vi_aggregator)
    out = fwd(x, w)
    jax.block_until_ready(out)

    assert out.shape == (N, C, 1, H, W), out.shape
    assert bool(jnp.all(jnp.isfinite(out)))
    print("KERNEL_OK")
</pallas_src>

<mosaic_0001>
module attributes {stable_mosaic.version = 11 : i64} {
  func.func @_gated_gemm_kernel(%arg0: i32, %arg1: i32, %arg2: memref<256x1536xbf16, #tpu.memory_space<vmem>>, %arg3: memref<1536x256xbf16, #tpu.memory_space<vmem>>, %arg4: memref<256x128xf32, #tpu.memory_space<vmem>>, %arg5: memref<256x256xf32, #tpu.memory_space<vmem>>) attributes {dimension_semantics = [#tpu.dimension_semantics<parallel>, #tpu.dimension_semantics<arbitrary>], iteration_bounds = array<i64: 2, 3>, scalar_prefetch = 0 : i64, scratch_operands = 1 : i64, tpu.core_type = #tpu.core_type<tc>, window_params = [{transform_indices = @transform_0, window_bounds = array<i64: 256, 1536>}, {transform_indices = @transform_1, window_bounds = array<i64: 1536, 256>}, {transform_indices = @transform_2, window_bounds = array<i64: 256, 128>}]} {
    %c0_i32 = arith.constant 0 : i32
    %0 = arith.cmpi eq, %arg1, %c0_i32 : i32
    %1 = arith.extui %0 : i1 to i32
    %c0_i32_0 = arith.constant 0 : i32
    %2 = arith.cmpi ne, %1, %c0_i32_0 : i32
    scf.if %2 {
      %cst_9 = arith.constant 0.000000e+00 : f32
      %12 = vector.broadcast %cst_9 : f32 to vector<256x256xf32>
      %c0_10 = arith.constant 0 : index
      %c0_11 = arith.constant 0 : index
      %13 = vector.load %arg5[%c0_10, %c0_11] : memref<256x256xf32, #tpu.memory_space<vmem>>, vector<256x256xf32>
      tpu.vector_store %arg5[%c0_10, %c0_11], %12 {strides = array<i32>} : memref<256x256xf32, #tpu.memory_space<vmem>>, vector<256x256xf32>,
    } else {
    }
    %c0 = arith.constant 0 : index
    %c0_1 = arith.constant 0 : index
    %3 = vector.load %arg5[%c0, %c0_1] : memref<256x256xf32, #tpu.memory_space<vmem>>, vector<256x256xf32>
    %c0_2 = arith.constant 0 : index
    %c0_3 = arith.constant 0 : index
    %4 = vector.load %arg2[%c0_2, %c0_3] : memref<256x1536xbf16, #tpu.memory_space<vmem>>, vector<256x1536xbf16>
    %c0_4 = arith.constant 0 : index
    %c0_5 = arith.constant 0 : index
    %5 = vector.load %arg3[%c0_4, %c0_5] : memref<1536x256xbf16, #tpu.memory_space<vmem>>, vector<1536x256xbf16>
    %cst = arith.constant dense<0.000000e+00> : vector<256x256xf32>
    %6 = tpu.matmul %4, %5, %cst {dimension_numbers = #tpu.dot_dimension_numbers<[1], [0], [0], [1], [0, 0, 1, 1], [], []>} : vector<256x1536xbf16>, vector<1536x256xbf16>, vector<256x256xf32> -> vector<256x256xf32>
    %7 = arith.addf %3, %6 : vector<256x256xf32>
    %c0_6 = arith.constant 0 : index
    %c0_7 = arith.constant 0 : index
    %8 = vector.load %arg5[%c0_6, %c0_7] : memref<256x256xf32, #tpu.memory_space<vmem>>, vector<256x256xf32>
    tpu.vector_store %arg5[%c0_6, %c0_7], %7 {strides = array<i32>} : memref<256x256xf32, #tpu.memory_space<vmem>>, vector<256x256xf32>,
    %c2_i32 = arith.constant 2 : i32
    %9 = arith.cmpi eq, %arg1, %c2_i32 : i32
    %10 = arith.extui %9 : i1 to i32
    %c0_i32_8 = arith.constant 0 : i32
    %11 = arith.cmpi ne, %10, %c0_i32_8 : i32
    scf.if %11 {
      %c0_9 = arith.constant 0 : index
      %c0_10 = arith.constant 0 : index
      %12 = vector.load %arg5[%c0_9, %c0_10] : memref<256x256xf32, #tpu.memory_space<vmem>>, vector<256x256xf32>
      %13 = vector.extract_strided_slice %12 {offsets = [0, 0], sizes = [256, 128], strides = [1, 1]} : vector<256x256xf32> to vector<256x128xf32>
      %14 = vector.extract_strided_slice %12 {offsets = [0, 128], sizes = [256, 128], strides = [1, 1]} : vector<256x256xf32> to vector<256x128xf32>
      %15 = arith.negf %14 : vector<256x128xf32>
      %16 = math.exp %15 : vector<256x128xf32>
      %cst_11 = arith.constant 1.000000e+00 : f32
      %17 = vector.broadcast %cst_11 : f32 to vector<256x128xf32>
      %18 = arith.addf %17, %16 : vector<256x128xf32>
      %19 = arith.divf %17, %18 : vector<256x128xf32>
      %20 = arith.mulf %13, %19 : vector<256x128xf32>
      %c0_12 = arith.constant 0 : index
      %c0_13 = arith.constant 0 : index
      %21 = vector.load %arg4[%c0_12, %c0_13] : memref<256x128xf32, #tpu.memory_space<vmem>>, vector<256x128xf32>
      tpu.vector_store %arg4[%c0_12, %c0_13], %20 {strides = array<i32>} : memref<256x128xf32, #tpu.memory_space<vmem>>, vector<256x128xf32>,
    } else {
    }
    return
  }
  func.func @transform_0(%arg0: i32, %arg1: i32) -> (i32, i32) {
    %c0_i32 = arith.constant 0 : i32
    return %arg0, %arg1 : i32, i32
  }
  func.func @transform_1(%arg0: i32, %arg1: i32) -> (i32, i32) {
    %c0_i32 = arith.constant 0 : i32
    %c0_i32_0 = arith.constant 0 : i32
    return %arg1, %c0_i32 : i32, i32
  }
  func.func @transform_2(%arg0: i32, %arg1: i32) -> (i32, i32) {
    %c0_i32 = arith.constant 0 : i32
    %c0_i32_0 = arith.constant 0 : i32
    return %arg0, %c0_i32 : i32, i32
  }
}

</mosaic_0001>

<bundles_post_ra>
// kernel: vi_aggregator.1
= control target key start
LH: loop header
LB: loop body
LE: loop exit
PB: predicated region body
PF: predicated region fallthrough
CT: control target
= control target key end

     0   :  { %7 = vsyncpa [#allocation5], 0  ;;  %s7481_s0 = inlined_call_operand.vmem [shape: bf16[512,4608], index: 0, kind: input, shape index: {}]   ;;  %s7482_s1 = inlined_call_operand.vmem [shape: bf16[4608,256], index: 1, kind: input, shape index: {}]   ;;  %s7483_s2 = inlined_call_operand.hbm [shape: f32[512,128], index: 2, kind: output, shape index: {}]  }
   0x1   :  { %9 = vsyncpa [#allocation5 + $0x1], 0  ;;  %s6427_s9 = smov 0   ;;  %s6429_s10 = smov 0  }
   0x2   :  { %s6431_s11 = smov 0   ;;  %s6433_s12 = smov 0  }
   0x3   :  { %s6435_s13 = smov 0   ;;  %s6437_s14 = smov 0  }
   0x4   :  { %s6439_s15 = smov 0   ;;  %s6441_s16 = smov 0  }
   0x5   :  { %s6443_s17 = smov 0   ;;  %s6445_s18 = smov 0  }
   0x6 LB: > { %s4743_s19 = sadd.s32 4294967295, %s6406_s18   ;;  %s4744_s20 = sadd.s32 4294967294, %s6406_s18   ;;  %s6406_s18 = sphi %s6445_s18, %s15_s18   ;;  %s6402_s17 = sphi %s6443_s17, %s7495_s17   ;;  %s6398_s16 = sphi %s6441_s16, %s7494_s16   ;;  %s6394_s15 = sphi %s6439_s15, %s7493_s15   ;;  %s6390_s14 = sphi %s6437_s14, %s7492_s14   ;;  %s6386_s13 = sphi %s6435_s13, %s7491_s13   ;;  %s6382_s12 = sphi %s6433_s12, %s7490_s12   ;;  %s6378_s11 = sphi %s6431_s11, %s7489_s11   ;;  %s6374_s10 = sphi %s6429_s10, %s7488_s10   ;;  %s6370_s9 = sphi %s6427_s9, %s7487_s9  }
   0x7   : > { %s24_s21 = sadd.s32 1, %s6398_s16  ;;  %s27_s22 = sadd.s32 1, %s6402_s17 }
   0x8   : > { %p25_p0 = scmp.ge.s32.totalorder %s24_s21, 3  ;;  %s36_s23 = sadd.s32 1, %s6386_s13 }
   0x9   : > { %p43_p1 = scmp.ne.s32.totalorder %s6386_s13, %s6382_s12  ;;  %p44_p2 = scmp.eq.s32.totalorder %s6406_s18, 0 }
   0xa   : > { %s7497_s21 = smov (%p25_p0, %s24_s21), 0  ;;  %s7499_s22 = smov (!%p25_p0, %s27_s22), %s6402_s17 }
   0xb   : > { %s32_s24 = ssub.s32 %s6398_s16, %s7497_s21  ;;  %p6490_p3 = por %p44_p2, %p43_p1 }
   0xc   : > { %p29_p4 = scmp.ge.s32.totalorder %s7499_s22, 2  ;;  %s88_s26 = sadd.s32 1, %s6378_s11 }
   0xd   : > { %p98_p5 = scmp.ne.s32.totalorder %s6378_s11, %s6374_s10  ;;  %p99_p6 = scmp.eq.s32.totalorder %s4743_s19, 5 }
   0xe   : > { %s7501_s22 = smov (%p29_p4, %s7499_s22), 0  ;;  %p104_p8 = scmp.ne.s32.totalorder %s6374_s10, %s6370_s9 }
   0xf   : > { %p6499_p7 = por %p99_p6, %p98_p5  ;;  %s31_s28 = ssub.s32 %s6402_s17, %s7501_s22 }
  0x10   : > { %p105_p9 = scmp.eq.s32.totalorder %s4744_s20, 5  ;;  %s33_s29 = sor.u32 %s32_s24, %s31_s28 }
  0x11   : > { %p86_p10 = scmp.eq.s32.totalorder %s31_s28, 0  ;;  %p34_p11 = scmp.eq.s32.totalorder %s33_s29, 0 }
  0x12   : > { %p6507_p12 = por %p105_p9, %p104_p8  ;;  %p4746_p13 = scmp.ge.s32.totalorder %s6406_s18, 6 }
  0x13   : > { %s6512_s3 = scalar_select %p86_p10, %s6378_s11, %s88_s26  }
  0x14   : > { %s6515_s4 = scalar_select %p34_p11, %s6386_s13, %s36_s23  }
  0x15   : > { %121 = sbr.rel (%p4746_p13) target bundleno = 133 (0x85), region = 16 }
  0x1c   : > { %124 = sbr.rel (!%p6490_p3) target bundleno = 133 (0x85), region = 20  ;;  %s126_s5 = sand.u32 (%p6490_p3), 1, %s6386_s13  }
  0x1d   : > { %s130_s6 = smul.u32 (%p6490_p3), 12, %s6398_s16 }
  0x1e   : > { %s5499_s7 = smul.u32 (%p6490_p3), 1536, %s126_s5 }
  0x1f   : > { %s5500_s8 = smul.u32 (%p6490_p3), 1152, %s6402_s17 }
  0x20   : > { %s6531_s25 = scalar_lea.vmem (%p6490_p3), [#allocation3], %s5499_s7 }
  0x21   : > { %s132_s19 = sadd.s32 (%p6490_p3), %s5500_s8, %s130_s6 }
  0x22   : > { %s4749_s20 = sshll.u32 (%p6490_p3), %s132_s19, 2 }
  0x23   : > { %s6526_s23 = scalar_lea.vmem %s7481_s0, %s4749_s20 }
  0x24   : > { %v147_v0 = vld [vmem:[%s6526_s23] sm:$0xff]  ;;  %v149_v1 = vld [vmem:[%s6526_s23 + $0x8] sm:$0xff]  ;;  %v151_v2 = vld [vmem:[%s6526_s23 + $0x10] sm:$0xff] }
  0x25   : > { %148 = vst [vmem:[%s6531_s25] sm:$0xff] %v147_v0  ;;  %150 = vst [vmem:[%s6531_s25 + $0x8] sm:$0xff] %v149_v1  ;;  %v153_v3 = vld [vmem:[%s6526_s23 + $0x18] sm:$0xff]  ;;  %v155_v4 = vld [vmem:[%s6526_s23 + $0x20] sm:$0xff] }
  0x26   : > { %152 = vst [vmem:[%s6531_s25 + $0x10] sm:$0xff] %v151_v2  ;;  %v157_v5 = vld [vmem:[%s6526_s23 + $0x28] sm:$0xff]  ;;  %154 = vst [vmem:[%s6531_s25 + $0x18] sm:$0xff] %v153_v3  ;;  %v159_v6 = vld [vmem:[%s6526_s23 + $0x90] sm:$0xff] }
  0x27   : > { %156 = vst [vmem:[%s6531_s25 + $0x20] sm:$0xff] %v155_v4  ;;  %158 = vst [vmem:[%s6531_s25 + $0x28] sm:$0xff] %v157_v5  ;;  %v161_v7 = vld [vmem:[%s6526_s23 + $0x98] sm:$0xff]  ;;  %v163_v8 = vld [vmem:[%s6526_s23 + $0xa0] sm:$0xff] }
  0x28   : > { %160 = vst [vmem:[%s6531_s25 + $0x30] sm:$0xff] %v159_v6  ;;  %162 = vst [vmem:[%s6531_s25 + $0x38] sm:$0xff] %v161_v7  ;;  %v165_v9 = vld [vmem:[%s6526_s23 + $0xa8] sm:$0xff]  ;;  %v167_v10 = vld [vmem:[%s6526_s23 + $0xb0] sm:$0xff] }
  0x29   : > { %164 = vst [vmem:[%s6531_s25 + $0x40] sm:$0xff] %v163_v8  ;;  %v169_v11 = vld [vmem:[%s6526_s23 + $0xb8] sm:$0xff]  ;;  %166 = vst [vmem:[%s6531_s25 + $0x48] sm:$0xff] %v165_v9  ;;  %v171_v12 = vld [vmem:[%s6526_s23 + $0x120] sm:$0xff] }
  0x2a   : > { %168 = vst [vmem:[%s6531_s25 + $0x50] sm:$0xff] %v167_v10  ;;  %170 = vst [vmem:[%s6531_s25 + $0x58] sm:$0xff] %v169_v11  ;;  %v173_v13 = vld [vmem:[%s6526_s23 + $0x128] sm:$0xff]  ;;  %v175_v14 = vld [vmem:[%s6526_s23 + $0x130] sm:$0xff] }
  0x2b   : > { %172 = vst [vmem:[%s6531_s25 + $0x60] sm:$0xff] %v171_v12  ;;  %174 = vst [vmem:[%s6531_s25 + $0x68] sm:$0xff] %v173_v13  ;;  %v177_v15 = vld [vmem:[%s6526_s23 + $0x138] sm:$0xff]  ;;  %v179_v16 = vld [vmem:[%s6526_s23 + $0x140] sm:$0xff] }
  0x2c   : > { %176 = vst [vmem:[%s6531_s25 + $0x70] sm:$0xff] %v175_v14  ;;  %v181_v17 = vld [vmem:[%s6526_s23 + $0x148] sm:$0xff]  ;;  %178 = vst [vmem:[%s6531_s25 + $0x78] sm:$0xff] %v177_v15  ;;  %v183_v18 = vld [vmem:[%s6526_s23 + $0x1b0] sm:$0xff] }
  0x2d   : > { %180 = vst [vmem:[%s6531_s25 + $0x80] sm:$0xff] %v179_v16  ;;  %182 = vst [vmem:[%s6531_s25 + $0x88] sm:$0xff] %v181_v17  ;;  %v185_v19 = vld [vmem:[%s6526_s23 + $0x1b8] sm:$0xff]  ;;  %v187_v20 = vld [vmem:[%s6526_s23 + $0x1c0] sm:$0xff] }
  0x2e   : > { %184 = vst [vmem:[%s6531_s25 + $0x90] sm:$0xff] %v183_v18  ;;  %186 = vst [vmem:[%s6531_s25 + $0x98] sm:$0xff] %v185_v19  ;;  %v189_v21 = vld [vmem:[%s6526_s23 + $0x1c8] sm:$0xff]  ;;  %v191_v22 = vld [vmem:[%s6526_s23 + $0x1d0] sm:$0xff] }
  0x2f   : > { %188 = vst [vmem:[%s6531_s25 + $0xa0] sm:$0xff] %v187_v20  ;;  %v193_v23 = vld [vmem:[%s6526_s23 + $0x1d8] sm:$0xff]  ;;  %190 = vst [vmem:[%s6531_s25 + $0xa8] sm:$0xff] %v189_v21  ;;  %v195_v24 = vld [vmem:[%s6526_s23 + $0x240] sm:$0xff] }
  0x30   : > { %192 = vst [vmem:[%s6531_s25 + $0xb0] sm:$0xff] %v191_v22  ;;  %194 = vst [vmem:[%s6531_s25 + $0xb8] sm:$0xff] %v193_v23  ;;  %v197_v25 = vld [vmem:[%s6526_s23 + $0x248] sm:$0xff]  ;;  %v199_v26 = vld [vmem:[%s6526_s23 + $0x250] sm:$0xff] }
  0x31   : > { %196 = vst [vmem:[%s6531_s25 + $0xc0] sm:$0xff] %v195_v24  ;;  %198 = vst [vmem:[%s6531_s25 + $0xc8] sm:$0xff] %v197_v25  ;;  %v201_v27 = vld [vmem:[%s6526_s23 + $0x258] sm:$0xff]  ;;  %v203_v28 = vld [vmem:[%s6526_s23 + $0x260] sm:$0xff] }
  0x32   : > { %200 = vst [vmem:[%s6531_s25 + $0xd0] sm:$0xff] %v199_v26  ;;  %v205_v29 = vld [vmem:[%s6526_s23 + $0x268] sm:$0xff]  ;;  %202 = vst [vmem:[%s6531_s25 + $0xd8] sm:$0xff] %v201_v27  ;;  %v207_v30 = vld [vmem:[%s6526_s23 + $0x2d0] sm:$0xff] }
  0x33   : > { %204 = vst [vmem:[%s6531_s25 + $0xe0] sm:$0xff] %v203_v28  ;;  %206 = vst [vmem:[%s6531_s25 + $0xe8] sm:$0xff] %v205_v29  ;;  %v209_v31 = vld [vmem:[%s6526_s23 + $0x2d8] sm:$0xff]  ;;  %v211_v32 = vld [vmem:[%s6526_s23 + $0x2e0] sm:$0xff] }
  0x34   : > { %208 = vst [vmem:[%s6531_s25 + $0xf0] sm:$0xff] %v207_v30  ;;  %210 = vst [vmem:[%s6531_s25 + $0xf8] sm:$0xff] %v209_v31  ;;  %v213_v33 = vld [vmem:[%s6526_s23 + $0x2e8] sm:$0xff]  ;;  %v215_v34 = vld [vmem:[%s6526_s23 + $0x2f0] sm:$0xff] }
  0x35   : > { %212 = vst [vmem:[%s6531_s25 + $0x100] sm:$0xff] %v211_v32  ;;  %v217_v35 = vld [vmem:[%s6526_s23 + $0x2f8] sm:$0xff]  ;;  %214 = vst [vmem:[%s6531_s25 + $0x108] sm:$0xff] %v213_v33  ;;  %v219_v36 = vld [vmem:[%s6526_s23 + $0x360] sm:$0xff] }
  0x36   : > { %216 = vst [vmem:[%s6531_s25 + $0x110] sm:$0xff] %v215_v34  ;;  %218 = vst [vmem:[%s6531_s25 + $0x118] sm:$0xff] %v217_v35  ;;  %v221_v37 = vld [vmem:[%s6526_s23 + $0x368] sm:$0xff]  ;;  %v223_v38 = vld [vmem:[%s6526_s23 + $0x370] sm:$0xff] }
  0x37   : > { %220 = vst [vmem:[%s6531_s25 + $0x120] sm:$0xff] %v219_v36  ;;  %222 = vst [vmem:[%s6531_s25 + $0x128] sm:$0xff] %v221_v37  ;;  %v225_v39 = vld [vmem:[%s6526_s23 + $0x378] sm:$0xff]  ;;  %v227_v40 = vld [vmem:[%s6526_s23 + $0x380] sm:$0xff] }
  0x38   : > { %224 = vst [vmem:[%s6531_s25 + $0x130] sm:$0xff] %v223_v38  ;;  %v229_v41 = vld [vmem:[%s6526_s23 + $0x388] sm:$0xff]  ;;  %226 = vst [vmem:[%s6531_s25 + $0x138] sm:$0xff] %v225_v39  ;;  %v231_v42 = vld [vmem:[%s6526_s23 + $0x3f0] sm:$0xff] }
  0x39   : > { %228 = vst [vmem:[%s6531_s25 + $0x140] sm:$0xff] %v227_v40  ;;  %230 = vst [vmem:[%s6531_s25 + $0x148] sm:$0xff] %v229_v41  ;;  %v233_v43 = vld [vmem:[%s6526_s23 + $0x3f8] sm:$0xff]  ;;  %v235_v44 = vld [vmem:[%s6526_s23 + $0x400] sm:$0xff] }
  0x3a   : > { %232 = vst [vmem:[%s6531_s25 + $0x150] sm:$0xff] %v231_v42  ;;  %234 = vst [vmem:[%s6531_s25 + $0x158] sm:$0xff] %v233_v43  ;;  %v237_v45 = vld [vmem:[%s6526_s23 + $0x408] sm:$0xff]  ;;  %v239_v46 = vld [vmem:[%s6526_s23 + $0x410] sm:$0xff] }
  0x3b   : > { %236 = vst [vmem:[%s6531_s25 + $0x160] sm:$0xff] %v235_v44  ;;  %v241_v47 = vld [vmem:[%s6526_s23 + $0x418] sm:$0xff]  ;;  %238 = vst [vmem:[%s6531_s25 + $0x168] sm:$0xff] %v237_v45  ;;  %v243_v48 = vld [vmem:[%s6526_s23 + $0x480] sm:$0xff] }
  0x3c   : > { %240 = vst [vmem:[%s6531_s25 + $0x170] sm:$0xff] %v239_v46  ;;  %242 = vst [vmem:[%s6531_s25 + $0x178] sm:$0xff] %v241_v47  ;;  %v245_v49 = vld [vmem:[%s6526_s23 + $0x488] sm:$0xff]  ;;  %v247_v50 = vld [vmem:[%s6526_s23 + $0x490] sm:$0xff] }
  0x3d   : > { %244 = vst [vmem:[%s6531_s25 + $0x180] sm:$0xff] %v243_v48  ;;  %246 = vst [vmem:[%s6531_s25 + $0x188] sm:$0xff] %v245_v49  ;;  %v249_v51 = vld [vmem:[%s6526_s23 + $0x498] sm:$0xff]  ;;  %v251_v52 = vld [vmem:[%s6526_s23 + $0x4a0] sm:$0xff] }
  0x3e   : > { %248 = vst [vmem:[%s6531_s25 + $0x190] sm:$0xff] %v247_v50  ;;  %v253_v53 = vld [vmem:[%s6526_s23 + $0x4a8] sm:$0xff]  ;;  %250 = vst [vmem:[%s6531_s25 + $0x198] sm:$0xff] %v249_v51  ;;  %v255_v54 = vld [vmem:[%s6526_s23 + $0x510] sm:$0xff] }
  0x3f   : > { %252 = vst [vmem:[%s6531_s25 + $0x1a0] sm:$0xff] %v251_v52  ;;  %254 = vst [vmem:[%s6531_s25 + $0x1a8] sm:$0xff] %v253_v53  ;;  %v257_v55 = vld [vmem:[%s6526_s23 + $0x518] sm:$0xff]  ;;  %v259_v56 = vld [vmem:[%s6526_s23 + $0x520] sm:$0xff] }
  0x40   : > { %256 = vst [vmem:[%s6531_s25 + $0x1b0] sm:$0xff] %v255_v54  ;;  %258 = vst [vmem:[%s6531_s25 + $0x1b8] sm:$0xff] %v257_v55  ;;  %v261_v57 = vld [vmem:[%s6526_s23 + $0x528] sm:$0xff]  ;;  %v263_v58 = vld [vmem:[%s6526_s23 + $0x530] sm:$0xff] }
  0x41   : > { %260 = vst [vmem:[%s6531_s25 + $0x1c0] sm:$0xff] %v259_v56  ;;  %v265_v59 = vld [vmem:[%s6526_s23 + $0x538] sm:$0xff]  ;;  %262 = vst [vmem:[%s6531_s25 + $0x1c8] sm:$0xff] %v261_v57  ;;  %v267_v60 = vld [vmem:[%s6526_s23 + $0x5a0] sm:$0xff] }
  0x42   : > { %264 = vst [vmem:[%s6531_s25 + $0x1d0] sm:$0xff] %v263_v58  ;;  %266 = vst [vmem:[%s6531_s25 + $0x1d8] sm:$0xff] %v265_v59  ;;  %v269_v61 = vld [vmem:[%s6526_s23 + $0x5a8] sm:$0xff]  ;;  %v271_v62 = vld [vmem:[%s6526_s23 + $0x5b0] sm:$0xff] }
  0x43   : > { %268 = vst [vmem:[%s6531_s25 + $0x1e0] sm:$0xff] %v267_v60  ;;  %270 = vst [vmem:[%s6531_s25 + $0x1e8] sm:$0xff] %v269_v61  ;;  %v273_v63 = vld [vmem:[%s6526_s23 + $0x5b8] sm:$0xff]  ;;  %v275_v0 = vld [vmem:[%s6526_s23 + $0x5c0] sm:$0xff] }
  0x44   : > { %272 = vst [vmem:[%s6531_s25 + $0x1f0] sm:$0xff] %v271_v62  ;;  %v277_v1 = vld [vmem:[%s6526_s23 + $0x5c8] sm:$0xff]  ;;  %274 = vst [vmem:[%s6531_s25 + $0x1f8] sm:$0xff] %v273_v63  ;;  %v279_v2 = vld [vmem:[%s6526_s23 + $0x630] sm:$0xff] }
  0x45   : > { %276 = vst [vmem:[%s6531_s25 + $0x200] sm:$0xff] %v275_v0  ;;  %278 = vst [vmem:[%s6531_s25 + $0x208] sm:$0xff] %v277_v1  ;;  %v281_v3 = vld [vmem:[%s6526_s23 + $0x638] sm:$0xff]  ;;  %v283_v4 = vld [vmem:[%s6526_s23 + $0x640] sm:$0xff] }
  0x46   : > { %280 = vst [vmem:[%s6531_s25 + $0x210] sm:$0xff] %v279_v2  ;;  %282 = vst [vmem:[%s6531_s25 + $0x218] sm:$0xff] %v281_v3  ;;  %v285_v5 = vld [vmem:[%s6526_s23 + $0x648] sm:$0xff]  ;;  %v287_v6 = vld [vmem:[%s6526_s23 + $0x650] sm:$0xff] }
  0x47   : > { %284 = vst [vmem:[%s6531_s25 + $0x220] sm:$0xff] %v283_v4  ;;  %v289_v7 = vld [vmem:[%s6526_s23 + $0x658] sm:$0xff]  ;;  %286 = vst [vmem:[%s6531_s25 + $0x228] sm:$0xff] %v285_v5  ;;  %v291_v8 = vld [vmem:[%s6526_s23 + $0x6c0] sm:$0xff] }
  0x48   : > { %288 = vst [vmem:[%s6531_s25 + $0x230] sm:$0xff] %v287_v6  ;;  %290 = vst [vmem:[%s6531_s25 + $0x238] sm:$0xff] %v289_v7  ;;  %v293_v9 = vld [vmem:[%s6526_s23 + $0x6c8] sm:$0xff]  ;;  %v295_v10 = vld [vmem:[%s6526_s23 + $0x6d0] sm:$0xff] }
  0x49   : > { %292 = vst [vmem:[%s6531_s25 + $0x240] sm:$0xff] %v291_v8  ;;  %294 = vst [vmem:[%s6531_s25 + $0x248] sm:$0xff] %v293_v9  ;;  %v297_v11 = vld [vmem:[%s6526_s23 + $0x6d8] sm:$0xff]  ;;  %v299_v12 = vld [vmem:[%s6526_s23 + $0x6e0] sm:$0xff] }
  0x4a   : > { %296 = vst [vmem:[%s6531_s25 + $0x250] sm:$0xff] %v295_v10  ;;  %v301_v13 = vld [vmem:[%s6526_s23 + $0x6e8] sm:$0xff]  ;;  %298 = vst [vmem:[%s6531_s25 + $0x258] sm:$0xff] %v297_v11  ;;  %v303_v14 = vld [vmem:[%s6526_s23 + $0x750] sm:$0xff] }
  0x4b   : > { %300 = vst [vmem:[%s6531_s25 + $0x260] sm:$0xff] %v299_v12  ;;  %302 = vst [vmem:[%s6531_s25 + $0x268] sm:$0xff] %v301_v13  ;;  %v305_v15 = vld [vmem:[%s6526_s23 + $0x758] sm:$0xff]  ;;  %v307_v16 = vld [vmem:[%s6526_s23 + $0x760] sm:$0xff] }
  0x4c   : > { %304 = vst [vmem:[%s6531_s25 + $0x270] sm:$0xff] %v303_v14  ;;  %306 = vst [vmem:[%s6531_s25 + $0x278] sm:$0xff] %v305_v15  ;;  %v309_v17 = vld [vmem:[%s6526_s23 + $0x768] sm:$0xff]  ;;  %v311_v18 = vld [vmem:[%s6526_s23 + $0x770] sm:$0xff] }
  0x4d   : > { %308 = vst [vmem:[%s6531_s25 + $0x280] sm:$0xff] %v307_v16  ;;  %v313_v19 = vld [vmem:[%s6526_s23 + $0x778] sm:$0xff]  ;;  %310 = vst [vmem:[%s6531_s25 + $0x288] sm:$0xff] %v309_v17  ;;  %v315_v20 = vld [vmem:[%s6526_s23 + $0x7e0] sm:$0xff] }
  0x4e   : > { %312 = vst [vmem:[%s6531_s25 + $0x290] sm:$0xff] %v311_v18  ;;  %314 = vst [vmem:[%s6531_s25 + $0x298] sm:$0xff] %v313_v19  ;;  %v317_v21 = vld [vmem:[%s6526_s23 + $0x7e8] sm:$0xff]  ;;  %v319_v22 = vld [vmem:[%s6526_s23 + $0x7f0] sm:$0xff] }
  0x4f   : > { %316 = vst [vmem:[%s6531_s25 + $0x2a0] sm:$0xff] %v315_v20  ;;  %318 = vst [vmem:[%s6531_s25 + $0x2a8] sm:$0xff] %v317_v21  ;;  %v321_v23 = vld [vmem:[%s6526_s23 + $0x7f8] sm:$0xff]  ;;  %v323_v24 = vld [vmem:[%s6526_s23 + $0x800] sm:$0xff] }
  0x50   : > { %320 = vst [vmem:[%s6531_s25 + $0x2b0] sm:$0xff] %v319_v22  ;;  %v325_v25 = vld [vmem:[%s6526_s23 + $0x808] sm:$0xff]  ;;  %322 = vst [vmem:[%s6531_s25 + $0x2b8] sm:$0xff] %v321_v23  ;;  %v327_v26 = vld [vmem:[%s6526_s23 + $0x870] sm:$0xff] }
  0x51   : > { %324 = vst [vmem:[%s6531_s25 + $0x2c0] sm:$0xff] %v323_v24  ;;  %326 = vst [vmem:[%s6531_s25 + $0x2c8] sm:$0xff] %v325_v25  ;;  %v329_v27 = vld [vmem:[%s6526_s23 + $0x878] sm:$0xff]  ;;  %v331_v28 = vld [vmem:[%s6526_s23 + $0x880] sm:$0xff] }
  0x52   : > { %328 = vst [vmem:[%s6531_s25 + $0x2d0] sm:$0xff] %v327_v26  ;;  %330 = vst [vmem:[%s6531_s25 + $0x2d8] sm:$0xff] %v329_v27  ;;  %v333_v29 = vld [vmem:[%s6526_s23 + $0x888] sm:$0xff]  ;;  %v335_v30 = vld [vmem:[%s6526_s23 + $0x890] sm:$0xff] }
  0x53   : > { %332 = vst [vmem:[%s6531_s25 + $0x2e0] sm:$0xff] %v331_v28  ;;  %v337_v31 = vld [vmem:[%s6526_s23 + $0x898] sm:$0xff]  ;;  %334 = vst [vmem:[%s6531_s25 + $0x2e8] sm:$0xff] %v333_v29  ;;  %v339_v32 = vld [vmem:[%s6526_s23 + $0x900] sm:$0xff] }
  0x54   : > { %336 = vst [vmem:[%s6531_s25 + $0x2f0] sm:$0xff] %v335_v30  ;;  %338 = vst [vmem:[%s6531_s25 + $0x2f8] sm:$0xff] %v337_v31  ;;  %v341_v33 = vld [vmem:[%s6526_s23 + $0x908] sm:$0xff]  ;;  %v343_v34 = vld [vmem:[%s6526_s23 + $0x910] sm:$0xff] }
  0x55   : > { %340 = vst [vmem:[%s6531_s25 + $0x300] sm:$0xff] %v339_v32  ;;  %342 = vst [vmem:[%s6531_s25 + $0x308] sm:$0xff] %v341_v33  ;;  %v345_v35 = vld [vmem:[%s6526_s23 + $0x918] sm:$0xff]  ;;  %v347_v36 = vld [vmem:[%s6526_s23 + $0x920] sm:$0xff] }
  0x56   : > { %344 = vst [vmem:[%s6531_s25 + $0x310] sm:$0xff] %v343_v34  ;;  %v349_v37 = vld [vmem:[%s6526_s23 + $0x928] sm:$0xff]  ;;  %346 = vst [vmem:[%s6531_s25 + $0x318] sm:$0xff] %v345_v35  ;;  %v351_v38 = vld [vmem:[%s6526_s23 + $0x990] sm:$0xff] }
  0x57   : > { %348 = vst [vmem:[%s6531_s25 + $0x320] sm:$0xff] %v347_v36  ;;  %350 = vst [vmem:[%s6531_s25 + $0x328] sm:$0xff] %v349_v37  ;;  %v353_v39 = vld [vmem:[%s6526_s23 + $0x998] sm:$0xff]  ;;  %v355_v40 = vld [vmem:[%s6526_s23 + $0x9a0] sm:$0xff] }
  0x58   : > { %352 = vst [vmem:[%s6531_s25 + $0x330] sm:$0xff] %v351_v38  ;;  %354 = vst [vmem:[%s6531_s25 + $0x338] sm:$0xff] %v353_v39  ;;  %v357_v41 = vld [vmem:[%s6526_s23 + $0x9a8] sm:$0xff]  ;;  %v359_v42 = vld [vmem:[%s6526_s23 + $0x9b0] sm:$0xff] }
  0x59   : > { %356 = vst [vmem:[%s6531_s25 + $0x340] sm:$0xff] %v355_v40  ;;  %v361_v43 = vld [vmem:[%s6526_s23 + $0x9b8] sm:$0xff]  ;;  %358 = vst [vmem:[%s6531_s25 + $0x348] sm:$0xff] %v357_v41  ;;  %v363_v44 = vld [vmem:[%s6526_s23 + $0xa20] sm:$0xff] }
  0x5a   : > { %360 = vst [vmem:[%s6531_s25 + $0x350] sm:$0xff] %v359_v42  ;;  %362 = vst [vmem:[%s6531_s25 + $0x358] sm:$0xff] %v361_v43  ;;  %v365_v45 = vld [vmem:[%s6526_s23 + $0xa28] sm:$0xff]  ;;  %v367_v46 = vld [vmem:[%s6526_s23 + $0xa30] sm:$0xff] }
  0x5b   : > { %364 = vst [vmem:[%s6531_s25 + $0x360] sm:$0xff] %v363_v44  ;;  %366 = vst [vmem:[%s6531_s25 + $0x368] sm:$0xff] %v365_v45  ;;  %v369_v47 = vld [vmem:[%s6526_s23 + $0xa38] sm:$0xff]  ;;  %v371_v48 = vld [vmem:[%s6526_s23 + $0xa40] sm:$0xff] }
  0x5c   : > { %368 = vst [vmem:[%s6531_s25 + $0x370] sm:$0xff] %v367_v46  ;;  %v373_v49 = vld [vmem:[%s6526_s23 + $0xa48] sm:$0xff]  ;;  %370 = vst [vmem:[%s6531_s25 + $0x378] sm:$0xff] %v369_v47  ;;  %v375_v50 = vld [vmem:[%s6526_s23 + $0xab0] sm:$0xff] }
  0x5d   : > { %372 = vst [vmem:[%s6531_s25 + $0x380] sm:$0xff] %v371_v48  ;;  %374 = vst [vmem:[%s6531_s25 + $0x388] sm:$0xff] %v373_v49  ;;  %v377_v51 = vld [vmem:[%s6526_s23 + $0xab8] sm:$0xff]  ;;  %v379_v52 = vld [vmem:[%s6526_s23 + $0xac0] sm:$0xff] }
  0x5e   : > { %376 = vst [vmem:[%s6531_s25 + $0x390] sm:$0xff] %v375_v50  ;;  %378 = vst [vmem:[%s6531_s25 + $0x398] sm:$0xff] %v377_v51  ;;  %v381_v53 = vld [vmem:[%s6526_s23 + $0xac8] sm:$0xff]  ;;  %v383_v54 = vld [vmem:[%s6526_s23 + $0xad0] sm:$0xff] }
  0x5f   : > { %380 = vst [vmem:[%s6531_s25 + $0x3a0] sm:$0xff] %v379_v52  ;;  %v385_v55 = vld [vmem:[%s6526_s23 + $0xad8] sm:$0xff]  ;;  %382 = vst [vmem:[%s6531_s25 + $0x3a8] sm:$0xff] %v381_v53  ;;  %v387_v56 = vld [vmem:[%s6526_s23 + $0xb40] sm:$0xff] }
  0x60   : > { %384 = vst [vmem:[%s6531_s25 + $0x3b0] sm:$0xff] %v383_v54  ;;  %386 = vst [vmem:[%s6531_s25 + $0x3b8] sm:$0xff] %v385_v55  ;;  %v389_v57 = vld [vmem:[%s6526_s23 + $0xb48] sm:$0xff]  ;;  %v391_v58 = vld [vmem:[%s6526_s23 + $0xb50] sm:$0xff] }
  0x61   : > { %388 = vst [vmem:[%s6531_s25 + $0x3c0] sm:$0xff] %v387_v56  ;;  %390 = vst [vmem:[%s6531_s25 + $0x3c8] sm:$0xff] %v389_v57  ;;  %v393_v59 = vld [vmem:[%s6526_s23 + $0xb58] sm:$0xff]  ;;  %v395_v60 = vld [vmem:[%s6526_s23 + $0xb60] sm:$0xff] }
  0x62   : > { %392 = vst [vmem:[%s6531_s25 + $0x3d0] sm:$0xff] %v391_v58  ;;  %v397_v61 = vld [vmem:[%s6526_s23 + $0xb68] sm:$0xff]  ;;  %394 = vst [vmem:[%s6531_s25 + $0x3d8] sm:$0xff] %v393_v59  ;;  %v399_v62 = vld [vmem:[%s6526_s23 + $0xbd0] sm:$0xff] }
  0x63   : > { %396 = vst [vmem:[%s6531_s25 + $0x3e0] sm:$0xff] %v395_v60  ;;  %398 = vst [vmem:[%s6531_s25 + $0x3e8] sm:$0xff] %v397_v61  ;;  %v401_v63 = vld [vmem:[%s6526_s23 + $0xbd8] sm:$0xff]  ;;  %v403_v0 = vld [vmem:[%s6526_s23 + $0xbe0] sm:$0xff] }
  0x64   : > { %400 = vst [vmem:[%s6531_s25 + $0x3f0] sm:$0xff] %v399_v62  ;;  %402 = vst [vmem:[%s6531_s25 + $0x3f8] sm:$0xff] %v401_v63  ;;  %v405_v1 = vld [vmem:[%s6526_s23 + $0xbe8] sm:$0xff]  ;;  %v407_v2 = vld [vmem:[%s6526_s23 + $0xbf0] sm:$0xff] }
  0x65   : > { %404 = vst [vmem:[%s6531_s25 + $0x400] sm:$0xff] %v403_v0  ;;  %v409_v3 = vld [vmem:[%s6526_s23 + $0xbf8] sm:$0xff]  ;;  %406 = vst [vmem:[%s6531_s25 + $0x408] sm:$0xff] %v405_v1  ;;  %v411_v4 = vld [vmem:[%s6526_s23 + $0xc60] sm:$0xff] }
  0x66   : > { %408 = vst [vmem:[%s6531_s25 + $0x410] sm:$0xff] %v407_v2  ;;  %410 = vst [vmem:[%s6531_s25 + $0x418] sm:$0xff] %v409_v3  ;;  %v413_v5 = vld [vmem:[%s6526_s23 + $0xc68] sm:$0xff]  ;;  %v415_v6 = vld [vmem:[%s6526_s23 + $0xc70] sm:$0xff] }
  0x67   : > { %412 = vst [vmem:[%s6531_s25 + $0x420] sm:$0xff] %v411_v4  ;;  %414 = vst [vmem:[%s6531_s25 + $0x428] sm:$0xff] %v413_v5  ;;  %v417_v7 = vld [vmem:[%s6526_s23 + $0xc78] sm:$0xff]  ;;  %v419_v8 = vld [vmem:[%s6526_s23 + $0xc80] sm:$0xff] }
  0x68   : > { %416 = vst [vmem:[%s6531_s25 + $0x430] sm:$0xff] %v415_v6  ;;  %v421_v9 = vld [vmem:[%s6526_s23 + $0xc88] sm:$0xff]  ;;  %418 = vst [vmem:[%s6531_s25 + $0x438] sm:$0xff] %v417_v7  ;;  %v423_v10 = vld [vmem:[%s6526_s23 + $0xcf0] sm:$0xff] }
  0x69   : > { %420 = vst [vmem:[%s6531_s25 + $0x440] sm:$0xff] %v419_v8  ;;  %422 = vst [vmem:[%s6531_s25 + $0x448] sm:$0xff] %v421_v9  ;;  %v425_v11 = vld [vmem:[%s6526_s23 + $0xcf8] sm:$0xff]  ;;  %v427_v12 = vld [vmem:[%s6526_s23 + $0xd00] sm:$0xff] }
  0x6a   : > { %424 = vst [vmem:[%s6531_s25 + $0x450] sm:$0xff] %v423_v10  ;;  %426 = vst [vmem:[%s6531_s25 + $0x458] sm:$0xff] %v425_v11  ;;  %v429_v13 = vld [vmem:[%s6526_s23 + $0xd08] sm:$0xff]  ;;  %v431_v14 = vld [vmem:[%s6526_s23 + $0xd10] sm:$0xff] }
  0x6b   : > { %428 = vst [vmem:[%s6531_s25 + $0x460] sm:$0xff] %v427_v12  ;;  %v433_v15 = vld [vmem:[%s6526_s23 + $0xd18] sm:$0xff]  ;;  %430 = vst [vmem:[%s6531_s25 + $0x468] sm:$0xff] %v429_v13  ;;  %v435_v16 = vld [vmem:[%s6526_s23 + $0xd80] sm:$0xff] }
  0x6c   : > { %432 = vst [vmem:[%s6531_s25 + $0x470] sm:$0xff] %v431_v14  ;;  %434 = vst [vmem:[%s6531_s25 + $0x478] sm:$0xff] %v433_v15  ;;  %v437_v17 = vld [vmem:[%s6526_s23 + $0xd88] sm:$0xff]  ;;  %v439_v18 = vld [vmem:[%s6526_s23 + $0xd90] sm:$0xff] }
  0x6d   : > { %436 = vst [vmem:[%s6531_s25 + $0x480] sm:$0xff] %v435_v16  ;;  %438 = vst [vmem:[%s6531_s25 + $0x488] sm:$0xff] %v437_v17  ;;  %v441_v19 = vld [vmem:[%s6526_s23 + $0xd98] sm:$0xff]  ;;  %v443_v20 = vld [vmem:[%s6526_s23 + $0xda0] sm:$0xff] }
  0x6e   : > { %440 = vst [vmem:[%s6531_s25 + $0x490] sm:$0xff] %v439_v18  ;;  %v445_v21 = vld [vmem:[%s6526_s23 + $0xda8] sm:$0xff]  ;;  %442 = vst [vmem:[%s6531_s25 + $0x498] sm:$0xff] %v441_v19  ;;  %v447_v22 = vld [vmem:[%s6526_s23 + $0xe10] sm:$0xff] }
  0x6f   : > { %444 = vst [vmem:[%s6531_s25 + $0x4a0] sm:$0xff] %v443_v20  ;;  %446 = vst [vmem:[%s6531_s25 + $0x4a8] sm:$0xff] %v445_v21  ;;  %v449_v23 = vld [vmem:[%s6526_s23 + $0xe18] sm:$0xff]  ;;  %v451_v24 = vld [vmem:[%s6526_s23 + $0xe20] sm:$0xff] }
  0x70   : > { %448 = vst [vmem:[%s6531_s25 + $0x4b0] sm:$0xff] %v447_v22  ;;  %450 = vst [vmem:[%s6531_s25 + $0x4b8] sm:$0xff] %v449_v23  ;;  %v453_v25 = vld [vmem:[%s6526_s23 + $0xe28] sm:$0xff]  ;;  %v455_v26 = vld [vmem:[%s6526_s23 + $0xe30] sm:$0xff] }
  0x71   : > { %452 = vst [vmem:[%s6531_s25 + $0x4c0] sm:$0xff] %v451_v24  ;;  %v457_v27 = vld [vmem:[%s6526_s23 + $0xe38] sm:$0xff]  ;;  %454 = vst [vmem:[%s6531_s25 + $0x4c8] sm:$0xff] %v453_v25  ;;  %v459_v28 = vld [vmem:[%s6526_s23 + $0xea0] sm:$0xff] }
  0x72   : > { %456 = vst [vmem:[%s6531_s25 + $0x4d0] sm:$0xff] %v455_v26  ;;  %458 = vst [vmem:[%s6531_s25 + $0x4d8] sm:$0xff] %v457_v27  ;;  %v461_v29 = vld [vmem:[%s6526_s23 + $0xea8] sm:$0xff]  ;;  %v463_v30 = vld [vmem:[%s6526_s23 + $0xeb0] sm:$0xff] }
  0x73   : > { %460 = vst [vmem:[%s6531_s25 + $0x4e0] sm:$0xff] %v459_v28  ;;  %462 = vst [vmem:[%s6531_s25 + $0x4e8] sm:$0xff] %v461_v29  ;;  %v465_v31 = vld [vmem:[%s6526_s23 + $0xeb8] sm:$0xff]  ;;  %v467_v32 = vld [vmem:[%s6526_s23 + $0xec0] sm:$0xff] }
  0x74   : > { %464 = vst [vmem:[%s6531_s25 + $0x4f0] sm:$0xff] %v463_v30  ;;  %v469_v33 = vld [vmem:[%s6526_s23 + $0xec8] sm:$0xff]  ;;  %466 = vst [vmem:[%s6531_s25 + $0x4f8] sm:$0xff] %v465_v31  ;;  %v471_v34 = vld [vmem:[%s6526_s23 + $0xf30] sm:$0xff] }
  0x75   : > { %468 = vst [vmem:[%s6531_s25 + $0x500] sm:$0xff] %v467_v32  ;;  %470 = vst [vmem:[%s6531_s25 + $0x508] sm:$0xff] %v469_v33  ;;  %v473_v35 = vld [vmem:[%s6526_s23 + $0xf38] sm:$0xff]  ;;  %v475_v36 = vld [vmem:[%s6526_s23 + $0xf40] sm:$0xff] }
  0x76   : > { %472 = vst [vmem:[%s6531_s25 + $0x510] sm:$0xff] %v471_v34  ;;  %474 = vst [vmem:[%s6531_s25 + $0x518] sm:$0xff] %v473_v35  ;;  %v477_v37 = vld [vmem:[%s6526_s23 + $0xf48] sm:$0xff]  ;;  %v479_v38 = vld [vmem:[%s6526_s23 + $0xf50] sm:$0xff] }
  0x77   : > { %476 = vst [vmem:[%s6531_s25 + $0x520] sm:$0xff] %v475_v36  ;;  %v481_v39 = vld [vmem:[%s6526_s23 + $0xf58] sm:$0xff]  ;;  %478 = vst [vmem:[%s6531_s25 + $0x528] sm:$0xff] %v477_v37  ;;  %v483_v40 = vld [vmem:[%s6526_s23 + $0xfc0] sm:$0xff] }
  0x78   : > { %480 = vst [vmem:[%s6531_s25 + $0x530] sm:$0xff] %v479_v38  ;;  %482 = vst [vmem:[%s6531_s25 + $0x538] sm:$0xff] %v481_v39  ;;  %v485_v41 = vld [vmem:[%s6526_s23 + $0xfc8] sm:$0xff]  ;;  %v487_v42 = vld [vmem:[%s6526_s23 + $0xfd0] sm:$0xff] }
  0x79   : > { %484 = vst [vmem:[%s6531_s25 + $0x540] sm:$0xff] %v483_v40  ;;  %486 = vst [vmem:[%s6531_s25 + $0x548] sm:$0xff] %v485_v41  ;;  %v489_v43 = vld [vmem:[%s6526_s23 + $0xfd8] sm:$0xff]  ;;  %v491_v44 = vld [vmem:[%s6526_s23 + $0xfe0] sm:$0xff] }
  0x7a   : > { %488 = vst [vmem:[%s6531_s25 + $0x550] sm:$0xff] %v487_v42  ;;  %v493_v45 = vld [vmem:[%s6526_s23 + $0xfe8] sm:$0xff]  ;;  %490 = vst [vmem:[%s6531_s25 + $0x558] sm:$0xff] %v489_v43  ;;  %v495_v46 = vld [vmem:[%s6526_s23 + $0x1050] sm:$0xff] }
  0x7b   : > { %492 = vst [vmem:[%s6531_s25 + $0x560] sm:$0xff] %v491_v44  ;;  %494 = vst [vmem:[%s6531_s25 + $0x568] sm:$0xff] %v493_v45  ;;  %v497_v47 = vld [vmem:[%s6526_s23 + $0x1058] sm:$0xff]  ;;  %v499_v48 = vld [vmem:[%s6526_s23 + $0x1060] sm:$0xff] }
  0x7c   : > { %496 = vst [vmem:[%s6531_s25 + $0x570] sm:$0xff] %v495_v46  ;;  %498 = vst [vmem:[%s6531_s25 + $0x578] sm:$0xff] %v497_v47  ;;  %v501_v49 = vld [vmem:[%s6526_s23 + $0x1068] sm:$0xff]  ;;  %v503_v50 = vld [vmem:[%s6526_s23 + $0x1070] sm:$0xff] }
  0x7d   : > { %500 = vst [vmem:[%s6531_s25 + $0x580] sm:$0xff] %v499_v48  ;;  %v505_v51 = vld [vmem:[%s6526_s23 + $0x1078] sm:$0xff]  ;;  %502 = vst [vmem:[%s6531_s25 + $0x588] sm:$0xff] %v501_v49  ;;  %v507_v52 = vld [vmem:[%s6526_s23 + $0x10e0] sm:$0xff] }
  0x7e   : > { %504 = vst [vmem:[%s6531_s25 + $0x590] sm:$0xff] %v503_v50  ;;  %506 = vst [vmem:[%s6531_s25 + $0x598] sm:$0xff] %v505_v51  ;;  %v509_v53 = vld [vmem:[%s6526_s23 + $0x10e8] sm:$0xff]  ;;  %v511_v54 = vld [vmem:[%s6526_s23 + $0x10f0] sm:$0xff] }
  0x7f   : > { %508 = vst [vmem:[%s6531_s25 + $0x5a0] sm:$0xff] %v507_v52  ;;  %510 = vst [vmem:[%s6531_s25 + $0x5a8] sm:$0xff] %v509_v53  ;;  %v513_v55 = vld [vmem:[%s6526_s23 + $0x10f8] sm:$0xff]  ;;  %v515_v56 = vld [vmem:[%s6526_s23 + $0x1100] sm:$0xff] }
  0x80   : > { %512 = vst [vmem:[%s6531_s25 + $0x5b0] sm:$0xff] %v511_v54  ;;  %v517_v57 = vld [vmem:[%s6526_s23 + $0x1108] sm:$0xff]  ;;  %514 = vst [vmem:[%s6531_s25 + $0x5b8] sm:$0xff] %v513_v55  ;;  %v519_v58 = vld [vmem:[%s6526_s23 + $0x1170] sm:$0xff] }
  0x81   : > { %516 = vst [vmem:[%s6531_s25 + $0x5c0] sm:$0xff] %v515_v56  ;;  %518 = vst [vmem:[%s6531_s25 + $0x5c8] sm:$0xff] %v517_v57  ;;  %v521_v59 = vld [vmem:[%s6526_s23 + $0x1178] sm:$0xff]  ;;  %v523_v60 = vld [vmem:[%s6526_s23 + $0x1180] sm:$0xff] }
  0x82   : > { %520 = vst [vmem:[%s6531_s25 + $0x5d0] sm:$0xff] %v519_v58  ;;  %522 = vst [vmem:[%s6531_s25 + $0x5d8] sm:$0xff] %v521_v59  ;;  %v525_v61 = vld [vmem:[%s6526_s23 + $0x1188] sm:$0xff]  ;;  %v527_v62 = vld [vmem:[%s6526_s23 + $0x1190] sm:$0xff] }
  0x83   : > { %524 = vst [vmem:[%s6531_s25 + $0x5e0] sm:$0xff] %v523_v60  ;;  %v529_v63 = vld [vmem:[%s6526_s23 + $0x1198] sm:$0xff]  ;;  %526 = vst [vmem:[%s6531_s25 + $0x5e8] sm:$0xff] %v525_v61 }
  0x84   : > { %528 = vst [vmem:[%s6531_s25 + $0x5f0] sm:$0xff] %v527_v62  ;;  %530 = vst [vmem:[%s6531_s25 + $0x5f8] sm:$0xff] %v529_v63 }
  0x85 PF: > { %p4750_p0 = scmp.ge.s32.totalorder %s6406_s18, 1  ;;  %p545_p1 = scmp.lt.s32.totalorder %s6406_s18, 7 }
  0x87   : > { %p546_p2 = pnand %p4750_p0, %p545_p1 }
  0x88   : > { %s552_s28 = sand.u32 (!%p546_p2), 1, %s6382_s12   ;;  %s576_s29 = sand.u32 (!%p546_p2), 1, %s6374_s10  }
  0x89   : > { %549 = sbr.rel (%p546_p2) target bundleno = 930 (0x3a2), region = 47  ;;  %s4751_s6 = sshll.u32 (!%p546_p2), %s576_s29, 8 }
  0x8a   : > { %s5501_s5 = smul.u32 (!%p546_p2), 1536, %s552_s28  ;;  %s6928_s23 = scalar_lea.vmem (!%p546_p2), [#allocation4], %s4751_s6 }
  0x8b   : > { %s581_s7 = smul.u32 (!%p546_p2), 192, %s6390_s14  ;;  %p4754_p4 = scmp.ne.s32.totalorder (!%p546_p2), %s6390_s14, 0 }
  0x8c   : > { %s6926_s26 = scalar_lea.vmem (!%p546_p2), [#allocation3], %s5501_s5 }
  0x8d   : > { %p582_p3 = scmp.lt.s32.totalorder (!%p546_p2), %s581_s7, 575 }
  0x90   : > { %s7503_s7 = smov (!%p582_p3, %s581_s7), 575  ;;  %592 = sbr.rel (%p4754_p4) target bundleno = 178 (0xb2), region = 55 }
  0x91   : > { %s5177_s8 = sshll.u32 %s7503_s7, 3  ;;  %v6408_v0 = vmov (!%p4754_p4), 0.0  }
  0x92   : > { %s6924_s24 = scalar_lea.vmem %s7482_s1, %s5177_s8  ;;  %593 = vst [vmem:[#allocation2] sm:$0xff] (!%p4754_p4), %v6408_v0  ;;  %594 = vst [vmem:[#allocation2 + $0x8] sm:$0xff] (!%p4754_p4), %v6408_v0 }
  0x93   : > { %595 = vst [vmem:[#allocation2 + $0x10] sm:$0xff] (!%p4754_p4), %v6408_v0  ;;  %596 = vst [vmem:[#allocation2 + $0x18] sm:$0xff] (!%p4754_p4), %v6408_v0 }
  0x94   : > { %597 = vst [vmem:[#allocation2 + $0x20] sm:$0xff] (!%p4754_p4), %v6408_v0  ;;  %598 = vst [vmem:[#allocation2 + $0x28] sm:$0xff] (!%p4754_p4), %v6408_v0 }
  0x95   : > { %599 = vst [vmem:[#allocation2 + $0x30] sm:$0xff] (!%p4754_p4), %v6408_v0  ;;  %600 = vst [vmem:[#allocation2 + $0x38] sm:$0xff] (!%p4754_p4), %v6408_v0 }
  0x96   : > { %601 = vst [vmem:[#allocation2 + $0x40] sm:$0xff] (!%p4754_p4), %v6408_v0  ;;  %602 = vst [vmem:[#allocation2 + $0x48] sm:$0xff] (!%p4754_p4), %v6408_v0 }
  0x97   : > { %603 = vst [vmem:[#allocation2 + $0x50] sm:$0xff] %v6408_v0  ;;  %604 = vst [vmem:[#allocation2 + $0x58] sm:$0xff] %v6408_v0 }
  0x98   : > { %605 = vst [vmem:[#allocation2 + $0x60] sm:$0xff] %v6408_v0  ;;  %606 = vst [vmem:[#allocation2 + $0x68] sm:$0xff] %v6408_v0 }
  0x99   : > { %607 = vst [vmem:[#allocation2 + $0x70] sm:$0xff] %v6408_v0  ;;  %608 = vst [vmem:[#allocation2 + $0x78] sm:$0xff] %v6408_v0 }
  0x9a   : > { %609 = vst [vmem:[#allocation2 + $0x80] sm:$0xff] %v6408_v0  ;;  %610 = vst [vmem:[#allocation2 + $0x88] sm:$0xff] %v6408_v0 }
  0x9b   : > { %611 = vst [vmem:[#allocation2 + $0x90] sm:$0xff] %v6408_v0  ;;  %612 = vst [vmem:[#allocation2 + $0x98] sm:$0xff] %v6408_v0 }
  0x9c   : > { %613 = vst [vmem:[#allocation2 + $0xa0] sm:$0xff] %v6408_v0  ;;  %614 = vst [vmem:[#allocation2 + $0xa8] sm:$0xff] %v6408_v0 }
  0x9d   : > { %615 = vst [vmem:[#allocation2 + $0xb0] sm:$0xff] %v6408_v0  ;;  %616 = vst [vmem:[#allocation2 + $0xb8] sm:$0xff] %v6408_v0 }
  0x9e   : > { %617 = vst [vmem:[#allocation2 + $0xc0] sm:$0xff] %v6408_v0  ;;  %618 = vst [vmem:[#allocation2 + $0xc8] sm:$0xff] %v6408_v0 }
  0x9f   : > { %619 = vst [vmem:[#allocation2 + $0xd0] sm:$0xff] %v6408_v0  ;;  %620 = vst [vmem:[#allocation2 + $0xd8] sm:$0xff] %v6408_v0 }
  0xa0   : > { %621 = vst [vmem:[#allocation2 + $0xe0] sm:$0xff] %v6408_v0  ;;  %622 = vst [vmem:[#allocation2 + $0xe8] sm:$0xff] %v6408_v0 }
  0xa1   : > { %623 = vst [vmem:[#allocation2 + $0xf0] sm:$0xff] %v6408_v0  ;;  %624 = vst [vmem:[#allocation2 + $0xf8] sm:$0xff] %v6408_v0 }
  0xa2   : > { %625 = vst [vmem:[#allocation2 + $0x100] sm:$0xff] %v6408_v0  ;;  %626 = vst [vmem:[#allocation2 + $0x108] sm:$0xff] %v6408_v0 }
  0xa3   : > { %627 = vst [vmem:[#allocation2 + $0x110] sm:$0xff] %v6408_v0  ;;  %628 = vst [vmem:[#allocation2 + $0x118] sm:$0xff] %v6408_v0 }
  0xa4   : > { %629 = vst [vmem:[#allocation2 + $0x120] sm:$0xff] %v6408_v0  ;;  %630 = vst [vmem:[#allocation2 + $0x128] sm:$0xff] %v6408_v0 }
  0xa5   : > { %631 = vst [vmem:[#allocation2 + $0x130] sm:$0xff] %v6408_v0  ;;  %632 = vst [vmem:[#allocation2 + $0x138] sm:$0xff] %v6408_v0 }
  0xa6   : > { %633 = vst [vmem:[#allocation2 + $0x140] sm:$0xff] %v6408_v0  ;;  %634 = vst [vmem:[#allocation2 + $0x148] sm:$0xff] %v6408_v0 }
  0xa7   : > { %635 = vst [vmem:[#allocation2 + $0x150] sm:$0xff] %v6408_v0  ;;  %636 = vst [vmem:[#allocation2 + $0x158] sm:$0xff] %v6408_v0 }
  0xa8   : > { %637 = vst [vmem:[#allocation2 + $0x160] sm:$0xff] %v6408_v0  ;;  %638 = vst [vmem:[#allocation2 + $0x168] sm:$0xff] %v6408_v0 }
  0xa9   : > { %639 = vst [vmem:[#allocation2 + $0x170] sm:$0xff] %v6408_v0  ;;  %640 = vst [vmem:[#allocation2 + $0x178] sm:$0xff] %v6408_v0 }
  0xaa   : > { %641 = vst [vmem:[#allocation2 + $0x180] sm:$0xff] %v6408_v0  ;;  %642 = vst [vmem:[#allocation2 + $0x188] sm:$0xff] %v6408_v0 }
  0xab   : > { %643 = vst [vmem:[#allocation2 + $0x190] sm:$0xff] %v6408_v0  ;;  %644 = vst [vmem:[#allocation2 + $0x198] sm:$0xff] %v6408_v0 }
  0xac   : > { %645 = vst [vmem:[#allocation2 + $0x1a0] sm:$0xff] %v6408_v0  ;;  %646 = vst [vmem:[#allocation2 + $0x1a8] sm:$0xff] %v6408_v0 }
  0xad   : > { %647 = vst [vmem:[#allocation2 + $0x1b0] sm:$0xff] %v6408_v0  ;;  %648 = vst [vmem:[#allocation2 + $0x1b8] sm:$0xff] %v6408_v0 }
  0xae   : > { %649 = vst [vmem:[#allocation2 + $0x1c0] sm:$0xff] %v6408_v0  ;;  %650 = vst [vmem:[#allocation2 + $0x1c8] sm:$0xff] %v6408_v0 }
  0xaf   : > { %651 = vst [vmem:[#allocation2 + $0x1d0] sm:$0xff] %v6408_v0  ;;  %652 = vst [vmem:[#allocation2 + $0x1d8] sm:$0xff] %v6408_v0 }
  0xb0   : > { %653 = vst [vmem:[#allocation2 + $0x1e0] sm:$0xff] %v6408_v0  ;;  %654 = vst [vmem:[#allocation2 + $0x1e8] sm:$0xff] %v6408_v0 }
  0xb1   : > { %655 = vst [vmem:[#allocation2 + $0x1f0] sm:$0xff] %v6408_v0  ;;  %656 = vst [vmem:[#allocation2 + $0x1f8] sm:$0xff] %v6408_v0 }
  0xb2 PF: > { %v5592_v1 = vld [vmem:[%s6924_s24 + $0x4] ss:$8 sps:$4 sm:$0xff]   ;;  %v5596_v3 = vld [vmem:[%s6924_s24] ss:$8 sps:$4 sm:$0xff]   ;;  %v5598_v5 = vld [vmem:[%s6924_s24 + $0x14] ss:$8 sps:$4 sm:$0xff]  }
  0xb3   : > { %v5594_v2 = vld [vmem:[%s6924_s24 + $0x304] ss:$8 sps:$4 sm:$0xff]   ;;  %3025 = vmatprep.subr.bf16.mxu1 %v5592_v1  ;;  %v5597_v4 = vld [vmem:[%s6924_s24 + $0x300] ss:$8 sps:$4 sm:$0xff]   ;;  %v5600_v6 = vld [vmem:[%s6924_s24 + $0x314] ss:$8 sps:$4 sm:$0xff]  }
  0xb4   : > { %3604 = vmatprep.subr.bf16.mxu0 %v5594_v2  ;;  %3026 = vmatpush1.bf16.msra.mxu1 %v5596_v3  ;;  %v5602_v7 = vld [vmem:[%s6924_s24 + $0x10] ss:$8 sps:$4 sm:$0xff]   ;;  %v5604_v9 = vld [vmem:[%s6924_s24 + $0x24] ss:$8 sps:$4 sm:$0xff]   ;;  %v5608_v11 = vld [vmem:[%s6924_s24 + $0x20] ss:$8 sps:$4 sm:$0xff]  }
  0xb5   : > { %3605 = vmatpush1.bf16.msra.mxu0 %v5597_v4  ;;  %3027 = vmatprep.subr.bf16.mxu1 %v5598_v5  ;;  %v5603_v8 = vld [vmem:[%s6924_s24 + $0x310] ss:$8 sps:$4 sm:$0xff]   ;;  %v5606_v10 = vld [vmem:[%s6924_s24 + $0x324] ss:$8 sps:$4 sm:$0xff]   ;;  %v5609_v12 = vld [vmem:[%s6924_s24 + $0x320] ss:$8 sps:$4 sm:$0xff]  }
  0xb6   : > { %3606 = vmatprep.subr.bf16.mxu0 %v5600_v6  ;;  %v5610_v13 = vld [vmem:[%s6924_s24 + $0x34] ss:$8 sps:$4 sm:$0xff]   ;;  %v5614_v15 = vld [vmem:[%s6924_s24 + $0x30] ss:$8 sps:$4 sm:$0xff]   ;;  %v5616_v17 = vld [vmem:[%s6924_s24 + $0x44] ss:$8 sps:$4 sm:$0xff]  }
  0xb7   : > { %v5612_v14 = vld [vmem:[%s6924_s24 + $0x334] ss:$8 sps:$4 sm:$0xff]   ;;  %v5615_v16 = vld [vmem:[%s6924_s24 + $0x330] ss:$8 sps:$4 sm:$0xff]   ;;  %v5618_v18 = vld [vmem:[%s6924_s24 + $0x344] ss:$8 sps:$4 sm:$0xff]  }
  0xb8   : > { %3028 = vmatpush1.bf16.msra.mxu1 %v5602_v7  ;;  %v5620_v19 = vld [vmem:[%s6924_s24 + $0x40] ss:$8 sps:$4 sm:$0xff]   ;;  %v5622_v21 = vld [vmem:[%s6924_s24 + $0x54] ss:$8 sps:$4 sm:$0xff]   ;;  %v5626_v23 = vld [vmem:[%s6924_s24 + $0x50] ss:$8 sps:$4 sm:$0xff]  }
  0xb9   : > { %3607 = vmatpush1.bf16.msra.mxu0 %v5603_v8  ;;  %3029 = vmatprep.subr.bf16.mxu1 %v5604_v9  ;;  %v5621_v20 = vld [vmem:[%s6924_s24 + $0x340] ss:$8 sps:$4 sm:$0xff]   ;;  %v5624_v22 = vld [vmem:[%s6924_s24 + $0x354] ss:$8 sps:$4 sm:$0xff]   ;;  %v5627_v24 = vld [vmem:[%s6924_s24 + $0x350] ss:$8 sps:$4 sm:$0xff]  }
  0xba   : > { %3608 = vmatprep.subr.bf16.mxu0 %v5606_v10  ;;  %v5628_v25 = vld [vmem:[%s6924_s24 + $0x64] ss:$8 sps:$4 sm:$0xff]   ;;  %v5632_v27 = vld [vmem:[%s6924_s24 + $0x60] ss:$8 sps:$4 sm:$0xff]   ;;  %v5634_v29 = vld [vmem:[%s6924_s24 + $0x74] ss:$8 sps:$4 sm:$0xff]  }
  0xbb   : > { %v5630_v26 = vld [vmem:[%s6924_s24 + $0x364] ss:$8 sps:$4 sm:$0xff]   ;;  %v5633_v28 = vld [vmem:[%s6924_s24 + $0x360] ss:$8 sps:$4 sm:$0xff]   ;;  %v5636_v30 = vld [vmem:[%s6924_s24 + $0x374] ss:$8 sps:$4 sm:$0xff]  }
  0xbc   : > { %3030 = vmatpush1.bf16.msra.mxu1 %v5608_v11  ;;  %v5638_v31 = vld [vmem:[%s6924_s24 + $0x70] ss:$8 sps:$4 sm:$0xff]   ;;  %v5640_v33 = vld [vmem:[%s6924_s24 + $0x84] ss:$8 sps:$4 sm:$0xff]   ;;  %v5644_v35 = vld [vmem:[%s6924_s24 + $0x80] ss:$8 sps:$4 sm:$0xff]  }
  0xbd   : > { %3609 = vmatpush1.bf16.msra.mxu0 %v5609_v12  ;;  %3031 = vmatprep.subr.bf16.mxu1 %v5610_v13  ;;  %v5639_v32 = vld [vmem:[%s6924_s24 + $0x370] ss:$8 sps:$4 sm:$0xff]   ;;  %v5642_v34 = vld [vmem:[%s6924_s24 + $0x384] ss:$8 sps:$4 sm:$0xff]   ;;  %v5645_v36 = vld [vmem:[%s6924_s24 + $0x380] ss:$8 sps:$4 sm:$0xff]  }
  0xbe   : > { %3610 = vmatprep.subr.bf16.mxu0 %v5612_v14  ;;  %v5646_v37 = vld [vmem:[%s6924_s24 + $0x94] ss:$8 sps:$4 sm:$0xff]   ;;  %v5650_v39 = vld [vmem:[%s6924_s24 + $0x90] ss:$8 sps:$4 sm:$0xff]   ;;  %v5652_v41 = vld [vmem:[%s6924_s24 + $0xa4] ss:$8 sps:$4 sm:$0xff]  }
  0xbf   : > { %v5648_v38 = vld [vmem:[%s6924_s24 + $0x394] ss:$8 sps:$4 sm:$0xff]   ;;  %v5651_v40 = vld [vmem:[%s6924_s24 + $0x390] ss:$8 sps:$4 sm:$0xff]   ;;  %v5654_v42 = vld [vmem:[%s6924_s24 + $0x3a4] ss:$8 sps:$4 sm:$0xff]  }
  0xc0   : > { %3032 = vmatpush1.bf16.msra.mxu1 %v5614_v15  ;;  %v5656_v43 = vld [vmem:[%s6924_s24 + $0xa0] ss:$8 sps:$4 sm:$0xff]   ;;  %v5658_v45 = vld [vmem:[%s6924_s24 + $0xb4] ss:$8 sps:$4 sm:$0xff]   ;;  %v5662_v47 = vld [vmem:[%s6924_s24 + $0xb0] ss:$8 sps:$4 sm:$0xff]  }
  0xc1   : > { %3611 = vmatpush1.bf16.msra.mxu0 %v5615_v16  ;;  %3033 = vmatprep.subr.bf16.mxu1 %v5616_v17  ;;  %v5657_v44 = vld [vmem:[%s6924_s24 + $0x3a0] ss:$8 sps:$4 sm:$0xff]   ;;  %v5660_v46 = vld [vmem:[%s6924_s24 + $0x3b4] ss:$8 sps:$4 sm:$0xff]   ;;  %v5663_v48 = vld [vmem:[%s6924_s24 + $0x3b0] ss:$8 sps:$4 sm:$0xff]  }
  0xc2   : > { %3612 = vmatprep.subr.bf16.mxu0 %v5618_v18  ;;  %v5664_v49 = vld [vmem:[%s6924_s24 + $0xc4] ss:$8 sps:$4 sm:$0xff]   ;;  %v5668_v53 = vld [vmem:[%s6924_s24 + $0xc0] ss:$8 sps:$4 sm:$0xff]   ;;  %v5670_v55 = vld [vmem:[%s6924_s24 + $0xd4] ss:$8 sps:$4 sm:$0xff]  }
  0xc3   : > { %v5690_v50 = vld [vmem:[%s6926_s26 + $0x4] ss:$48 sps:$4 sm:$0xff]   ;;  %v5693_v52 = vld [vmem:[%s6926_s26 + $0x1c] ss:$48 sps:$4 sm:$0xff]   ;;  %v5669_v54 = vld [vmem:[%s6924_s24 + $0x3c0] ss:$8 sps:$4 sm:$0xff]  }
  0xc4   : > { %3034 = vmatpush1.bf16.msra.mxu1 %v5620_v19  ;;  %v5666_v51 = vld [vmem:[%s6924_s24 + $0x3c4] ss:$8 sps:$4 sm:$0xff]   ;;  %3057 = vmatprep.mubr.bf16.mxu1 %v5690_v50  ;;  %v5672_v56 = vld [vmem:[%s6924_s24 + $0x3d4] ss:$8 sps:$4 sm:$0xff]   ;;  %v5674_v57 = vld [vmem:[%s6924_s24 + $0xd0] ss:$8 sps:$4 sm:$0xff]  }
  0xc5   : > { %3613 = vmatpush1.bf16.msra.mxu0 %v5621_v20  ;;  %3035 = vmatprep.subr.bf16.mxu1 %v5622_v21  ;;  %v5675_v58 = vld [vmem:[%s6924_s24 + $0x3d0] ss:$8 sps:$4 sm:$0xff]   ;;  %v5676_v59 = vld [vmem:[%s6924_s24 + $0xe4] ss:$8 sps:$4 sm:$0xff]   ;;  %v5680_v61 = vld [vmem:[%s6924_s24 + $0xe0] ss:$8 sps:$4 sm:$0xff]  }
  0xc6   : > { %3614 = vmatprep.subr.bf16.mxu0 %v5624_v22  ;;  %3636 = vmatprep.mubr.bf16.mxu0 %v5693_v52  ;;  %v5678_v60 = vld [vmem:[%s6924_s24 + $0x3e4] ss:$8 sps:$4 sm:$0xff]   ;;  %v5681_v62 = vld [vmem:[%s6924_s24 + $0x3e0] ss:$8 sps:$4 sm:$0xff]   ;;  %v5682_v63 = vld [vmem:[%s6924_s24 + $0xf4] ss:$8 sps:$4 sm:$0xff]  }
  0xc7   : > { %v5684_v0 = vld [vmem:[%s6924_s24 + $0x3f4] ss:$8 sps:$4 sm:$0xff]   ;;  %v5686_v1 = vld [vmem:[%s6924_s24 + $0xf0] ss:$8 sps:$4 sm:$0xff]   ;;  %v5696_v3 = vld [vmem:[%s6924_s24 + $0x104] ss:$8 sps:$4 sm:$0xff]  }
  0xc8   : > { %3036 = vmatpush1.bf16.msra.mxu1 %v5626_v23  ;;  %v5687_v2 = vld [vmem:[%s6924_s24 + $0x3f0] ss:$8 sps:$4 sm:$0xff]   ;;  %v5699_v5 = vld [vmem:[%s6924_s24 + $0x404] ss:$8 sps:$4 sm:$0xff]   ;;  %v5694_v7 = vld [vmem:[%s6924_s24 + $0x100] ss:$8 sps:$4 sm:$0xff]  }
  0xc9   : > { %3615 = vmatpush1.bf16.msra.mxu0 %v5627_v24  ;;  %3037 = vmatprep.subr.bf16.mxu1 %v5628_v25  ;;  %v5688_v4 = vld [vmem:[%s6926_s26] ss:$48 sps:$4 sm:$0xff]   ;;  %v5691_v6 = vld [vmem:[%s6926_s26 + $0x18] ss:$48 sps:$4 sm:$0xff]   ;;  %v5700_v9 = vld [vmem:[%s6926_s26 + $0x64] ss:$48 sps:$4 sm:$0xff]  }
  0xca   : > { %3616 = vmatprep.subr.bf16.mxu0 %v5630_v26  ;;  %v5697_v8 = vld [vmem:[%s6924_s24 + $0x400] ss:$8 sps:$4 sm:$0xff]   ;;  %v5702_v10 = vld [vmem:[%s6926_s26 + $0x7c] ss:$48 sps:$4 sm:$0xff]   ;;  %v5705_v13 = vld [vmem:[%s6924_s24 + $0x110] ss:$8 sps:$4 sm:$0xff]  }
  0xcb   : > { %v5707_v11 = vld [vmem:[%s6924_s24 + $0x114] ss:$8 sps:$4 sm:$0xff]   ;;  %v5709_v14 = vld [vmem:[%s6924_s24 + $0x410] ss:$8 sps:$4 sm:$0xff]   ;;  %v5719_v15 = vld [vmem:[%s6924_s24 + $0x124] ss:$8 sps:$4 sm:$0xff]  }
  0xcc   : > { %3038 = vmatpush1.bf16.msra.mxu1 %v5632_v27  ;;  %v5711_v12 = vld [vmem:[%s6924_s24 + $0x414] ss:$8 sps:$4 sm:$0xff]   ;;  %v5723_v16 = vld [vmem:[%s6924_s24 + $0x424] ss:$8 sps:$4 sm:$0xff]   ;;  %v5704_v17 = vld [vmem:[%s6926_s26 + $0x60] ss:$48 sps:$4 sm:$0xff]  }
  0xcd   : > { %3617 = vmatpush1.bf16.msra.mxu0 %v5633_v28  ;;  %3039 = vmatprep.subr.bf16.mxu1 %v5634_v29  ;;  %v5708_v18 = vld [vmem:[%s6926_s26 + $0x78] ss:$48 sps:$4 sm:$0xff]   ;;  %v5712_v19 = vld [vmem:[%s6926_s26 + $0xc4] ss:$48 sps:$4 sm:$0xff]   ;;  %v5714_v20 = vld [vmem:[%s6926_s26 + $0xdc] ss:$48 sps:$4 sm:$0xff]  }
  0xce   : > { %3618 = vmatprep.subr.bf16.mxu0 %v5636_v30  ;;  %v5717_v21 = vld [vmem:[%s6924_s24 + $0x120] ss:$8 sps:$4 sm:$0xff]   ;;  %v5731_v23 = vld [vmem:[%s6924_s24 + $0x134] ss:$8 sps:$4 sm:$0xff]   ;;  %v5729_v25 = vld [vmem:[%s6924_s24 + $0x130] ss:$8 sps:$4 sm:$0xff]  }
  0xcf   : > { %v5721_v22 = vld [vmem:[%s6924_s24 + $0x420] ss:$8 sps:$4 sm:$0xff]   ;;  %v5735_v24 = vld [vmem:[%s6924_s24 + $0x434] ss:$8 sps:$4 sm:$0xff]   ;;  %v5733_v28 = vld [vmem:[%s6924_s24 + $0x430] ss:$8 sps:$4 sm:$0xff]  }
  0xd0   : > { %3040 = vmatpush1.bf16.msra.mxu1 %v5638_v31  ;;  %v5716_v26 = vld [vmem:[%s6926_s26 + $0xc0] ss:$48 sps:$4 sm:$0xff]   ;;  %v5720_v27 = vld [vmem:[%s6926_s26 + $0xd8] ss:$48 sps:$4 sm:$0xff]   ;;  %v5724_v29 = vld [vmem:[%s6926_s26 + $0x124] ss:$48 sps:$4 sm:$0xff]  }
  0xd1   : > { %3619 = vmatpush1.bf16.msra.mxu0 %v5639_v32  ;;  %3041 = vmatprep.subr.bf16.mxu1 %v5640_v33  ;;  %v5743_v30 = vld [vmem:[%s6924_s24 + $0x144] ss:$8 sps:$4 sm:$0xff]   ;;  %v5741_v33 = vld [vmem:[%s6924_s24 + $0x140] ss:$8 sps:$4 sm:$0xff]   ;;  %v5781_v52 = vld [vmem:[%s6924_s24 + $0x470] ss:$8 sps:$4 sm:$0xff]  }
  0xd2   : > { %3620 = vmatprep.subr.bf16.mxu0 %v5642_v34  ;;  %v5747_v31 = vld [vmem:[%s6924_s24 + $0x444] ss:$8 sps:$4 sm:$0xff]   ;;  %v5745_v34 = vld [vmem:[%s6924_s24 + $0x440] ss:$8 sps:$4 sm:$0xff]   ;;  %p5139_p5 = scmp.ne.s32.totalorder %s6390_s14, 2 }
  0xd3   : > { %v5726_v32 = vld [vmem:[%s6926_s26 + $0x13c] ss:$48 sps:$4 sm:$0xff]   ;;  %v5740_v50 = vld [vmem:[%s6926_s26 + $0x180] ss:$48 sps:$4 sm:$0xff]  }
  0xd4   : > { %3042 = vmatpush1.bf16.msra.mxu1 %v5644_v35  ;;  %v5755_v35 = vld [vmem:[%s6924_s24 + $0x154] ss:$8 sps:$4 sm:$0xff]  }
  0xd5   : > { %3621 = vmatpush1.bf16.msra.mxu0 %v5645_v36  ;;  %3043 = vmatprep.subr.bf16.mxu1 %v5646_v37  ;;  %v5759_v36 = vld [vmem:[%s6924_s24 + $0x454] ss:$8 sps:$4 sm:$0xff]   ;;  %v5753_v37 = vld [vmem:[%s6924_s24 + $0x150] ss:$8 sps:$4 sm:$0xff]  }
  0xd6   : > { %3622 = vmatprep.subr.bf16.mxu0 %v5648_v38  ;;  %v5757_v38 = vld [vmem:[%s6924_s24 + $0x450] ss:$8 sps:$4 sm:$0xff]  }
  0xd8   : > { %3044 = vmatpush1.bf16.msra.mxu1 %v5650_v39  ;;  %v5728_v39 = vld [vmem:[%s6926_s26 + $0x120] ss:$48 sps:$4 sm:$0xff]  }
  0xd9   : > { %3623 = vmatpush1.bf16.msra.mxu0 %v5651_v40  ;;  %3045 = vmatprep.subr.bf16.mxu1 %v5652_v41  ;;  %v5767_v40 = vld [vmem:[%s6924_s24 + $0x164] ss:$8 sps:$4 sm:$0xff]  }
  0xda   : > { %3624 = vmatprep.subr.bf16.mxu0 %v5654_v42  ;;  %v5771_v41 = vld [vmem:[%s6924_s24 + $0x464] ss:$8 sps:$4 sm:$0xff]   ;;  %v5732_v42 = vld [vmem:[%s6926_s26 + $0x138] ss:$48 sps:$4 sm:$0xff]  }
  0xdc   : > { %3046 = vmatpush1.bf16.msra.mxu1 %v5656_v43  ;;  %v5736_v43 = vld [vmem:[%s6926_s26 + $0x184] ss:$48 sps:$4 sm:$0xff]  }
  0xdd   : > { %3625 = vmatpush1.bf16.msra.mxu0 %v5657_v44  ;;  %3047 = vmatprep.subr.bf16.mxu1 %v5658_v45  ;;  %v5738_v44 = vld [vmem:[%s6926_s26 + $0x19c] ss:$48 sps:$4 sm:$0xff]   ;;  %v5765_v45 = vld [vmem:[%s6924_s24 + $0x160] ss:$8 sps:$4 sm:$0xff]  }
  0xde   : > { %3626 = vmatprep.subr.bf16.mxu0 %v5660_v46  ;;  %v5769_v46 = vld [vmem:[%s6924_s24 + $0x460] ss:$8 sps:$4 sm:$0xff]  }
  0xe0   : > { %3048 = vmatpush1.bf16.msra.mxu1 %v5662_v47  ;;  %v5779_v47 = vld [vmem:[%s6924_s24 + $0x174] ss:$8 sps:$4 sm:$0xff]  }
  0xe1   : > { %3627 = vmatpush1.bf16.msra.mxu0 %v5663_v48  ;;  %3049 = vmatprep.subr.bf16.mxu1 %v5664_v49  ;;  %v5783_v48 = vld [vmem:[%s6924_s24 + $0x474] ss:$8 sps:$4 sm:$0xff]   ;;  %v5777_v49 = vld [vmem:[%s6924_s24 + $0x170] ss:$8 sps:$4 sm:$0xff]  }
  0xe2   : > { %3628 = vmatprep.subr.bf16.mxu0 %v5666_v51  ;;  %v5744_v51 = vld [vmem:[%s6926_s26 + $0x198] ss:$48 sps:$4 sm:$0xff]  }
  0xe4   : > { %3050 = vmatpush1.bf16.msra.mxu1 %v5668_v53  ;;  %v5748_v53 = vld [vmem:[%s6926_s26 + $0x1e4] ss:$48 sps:$4 sm:$0xff]  }
  0xe5   : > { %3629 = vmatpush1.bf16.msra.mxu0 %v5669_v54  ;;  %3051 = vmatprep.subr.bf16.mxu1 %v5670_v55  ;;  %v5791_v54 = vld [vmem:[%s6924_s24 + $0x184] ss:$8 sps:$4 sm:$0xff]  }
  0xe6   : > { %3630 = vmatprep.subr.bf16.mxu0 %v5672_v56  ;;  %v5795_v55 = vld [vmem:[%s6924_s24 + $0x484] ss:$8 sps:$4 sm:$0xff]  }
  0xe7   : > { %v5750_v56 = vld [vmem:[%s6926_s26 + $0x1fc] ss:$48 sps:$4 sm:$0xff]  }
  0xe8   : > { %3052 = vmatpush1.bf16.msra.mxu1 %v5674_v57  ;;  %v5789_v57 = vld [vmem:[%s6924_s24 + $0x180] ss:$8 sps:$4 sm:$0xff]  }
  0xe9   : > { %3631 = vmatpush1.bf16.msra.mxu0 %v5675_v58  ;;  %3053 = vmatprep.subr.bf16.mxu1 %v5676_v59  ;;  %v5793_v58 = vld [vmem:[%s6924_s24 + $0x480] ss:$8 sps:$4 sm:$0xff]   ;;  %v5803_v59 = vld [vmem:[%s6924_s24 + $0x194] ss:$8 sps:$4 sm:$0xff]  }
  0xea   : > { %3632 = vmatprep.subr.bf16.mxu0 %v5678_v60  ;;  %v5807_v60 = vld [vmem:[%s6924_s24 + $0x494] ss:$8 sps:$4 sm:$0xff]  }
  0xec   : > { %3054 = vmatpush1.bf16.msra.mxu1 %v5680_v61  ;;  %v5801_v61 = vld [vmem:[%s6924_s24 + $0x190] ss:$8 sps:$4 sm:$0xff]  }
  0xed   : > { %3633 = vmatpush1.bf16.msra.mxu0 %v5681_v62  ;;  %3055 = vmatprep.subr.bf16.mxu1 %v5682_v63  ;;  %v5805_v62 = vld [vmem:[%s6924_s24 + $0x490] ss:$8 sps:$4 sm:$0xff]  }
  0xee   : > { %3634 = vmatprep.subr.bf16.mxu0 %v5684_v0  ;;  %v5752_v63 = vld [vmem:[%s6926_s26 + $0x1e0] ss:$48 sps:$4 sm:$0xff]   ;;  %v5815_v0 = vld [vmem:[%s6924_s24 + $0x1a4] ss:$8 sps:$4 sm:$0xff]  }
  0xf0   : > { %3056 = vmatpush1.bf16.msra.mxu1 %v5686_v1  ;;  %v5819_v1 = vld [vmem:[%s6924_s24 + $0x4a4] ss:$8 sps:$4 sm:$0xff]  }
  0xf1   : > { %3635 = vmatpush1.bf16.msra.mxu0 %v5687_v2  ;;  %3218 = vmatprep.subr.bf16.mxu1 %v5696_v3  ;;  %v5756_v2 = vld [vmem:[%s6926_s26 + $0x1f8] ss:$48 sps:$4 sm:$0xff]   ;;  %v5760_v3 = vld [vmem:[%s6926_s26 + $0x244] ss:$48 sps:$4 sm:$0xff]  }
  0xf2   : > { %3797 = vmatprep.subr.bf16.mxu0 %v5699_v5  ;;  %v5813_v5 = vld [vmem:[%s6924_s24 + $0x1a0] ss:$8 sps:$4 sm:$0xff]  }
  0xf3   : > { %3058 = vmatmul.mubr.bf16.vlgmr.msra.gmra.mrb[0].mxu1 %v5688_v4  ;;  %v5762_v4 = vld [vmem:[%s6926_s26 + $0x25c] ss:$48 sps:$4 sm:$0xff]  }
  0xf4   : > { %3637 = vmatmul.mubr.bf16.vlgmr.msra.gmra.mrb[0].mxu0 %v5691_v6  ;;  %3219 = vmatpush1.bf16.msra.mxu1 %v5694_v7  ;;  %v5817_v6 = vld [vmem:[%s6924_s24 + $0x4a0] ss:$8 sps:$4 sm:$0xff]   ;;  %v5827_v7 = vld [vmem:[%s6924_s24 + $0x1b4] ss:$8 sps:$4 sm:$0xff]  }
  0xf5   : > { %3798 = vmatpush1.bf16.msra.mxu0 %v5697_v8  ;;  %3067 = vmatprep.mubr.bf16.mxu1 %v5700_v9  ;;  %v5831_v8 = vld [vmem:[%s6924_s24 + $0x4b4] ss:$8 sps:$4 sm:$0xff]   ;;  %v5825_v9 = vld [vmem:[%s6924_s24 + $0x1b0] ss:$8 sps:$4 sm:$0xff]  }
  0xf6   : > { %3646 = vmatprep.mubr.bf16.mxu0 %v5702_v10  ;;  %3220 = vmatprep.subr.bf16.mxu1 %v5707_v11  ;;  %v5764_v10 = vld [vmem:[%s6926_s26 + $0x240] ss:$48 sps:$4 sm:$0xff]   ;;  %v5768_v11 = vld [vmem:[%s6926_s26 + $0x258] ss:$48 sps:$4 sm:$0xff]  }
  0xf7   : > { %3799 = vmatprep.subr.bf16.mxu0 %v5711_v12  ;;  %v5829_v12 = vld [vmem:[%s6924_s24 + $0x4b0] ss:$8 sps:$4 sm:$0xff]  }
  0xf8   : > { %3221 = vmatpush1.bf16.msra.mxu1 %v5705_v13  ;;  %v5772_v13 = vld [vmem:[%s6926_s26 + $0x2a4] ss:$48 sps:$4 sm:$0xff]  }
  0xf9   : > { %3800 = vmatpush1.bf16.msra.mxu0 %v5709_v14  ;;  %3222 = vmatprep.subr.bf16.mxu1 %v5719_v15  ;;  %v5839_v14 = vld [vmem:[%s6924_s24 + $0x1c4] ss:$8 sps:$4 sm:$0xff]  }
  0xfa   : > { %3801 = vmatprep.subr.bf16.mxu0 %v5723_v16  ;;  %v5774_v15 = vld [vmem:[%s6926_s26 + $0x2bc] ss:$48 sps:$4 sm:$0xff]  }
  0xfb   : > { %3068 = vmatmul.mubr.bf16.gmra.mrb[4].mxu1 %v5704_v17  ;;  %v5843_v16 = vld [vmem:[%s6924_s24 + $0x4c4] ss:$8 sps:$4 sm:$0xff]   ;;  %v5837_v17 = vld [vmem:[%s6924_s24 + $0x1c0] ss:$8 sps:$4 sm:$0xff]  }
  0xfc   : > { %3647 = vmatmul.mubr.bf16.gmra.mrb[4].mxu0 %v5708_v18  ;;  %3077 = vmatprep.mubr.bf16.mxu1 %v5712_v19  ;;  %v5841_v18 = vld [vmem:[%s6924_s24 + $0x4c0] ss:$8 sps:$4 sm:$0xff]   ;;  %v5849_v19 = vld [vmem:[%s6924_s24 + $0x1d0] ss:$8 sps:$4 sm:$0xff]  }
  0xfd   : > { %3656 = vmatprep.mubr.bf16.mxu0 %v5714_v20  ;;  %3223 = vmatpush1.bf16.msra.mxu1 %v5717_v21  ;;  %v5851_v20 = vld [vmem:[%s6924_s24 + $0x1d4] ss:$8 sps:$4 sm:$0xff]   ;;  %v5853_v21 = vld [vmem:[%s6924_s24 + $0x4d0] ss:$8 sps:$4 sm:$0xff]  }
  0xfe   : > { %3802 = vmatpush1.bf16.msra.mxu0 %v5721_v22  ;;  %3224 = vmatprep.subr.bf16.mxu1 %v5731_v23  ;;  %v5855_v22 = vld [vmem:[%s6924_s24 + $0x4d4] ss:$8 sps:$4 sm:$0xff]   ;;  %v5776_v23 = vld [vmem:[%s6926_s26 + $0x2a0] ss:$48 sps:$4 sm:$0xff]  }
  0xff   : > { %3803 = vmatprep.subr.bf16.mxu0 %v5735_v24  ;;  %v5780_v24 = vld [vmem:[%s6926_s26 + $0x2b8] ss:$48 sps:$4 sm:$0xff]  }
 0x101   : > { %3225 = vmatpush1.bf16.msra.mxu1 %v5729_v25  ;;  %v5784_v25 = vld [vmem:[%s6926_s26 + $0x304] ss:$48 sps:$4 sm:$0xff]  }
 0x102   : > { %3804 = vmatpush1.bf16.msra.mxu0 %v5733_v28  ;;  %3226 = vmatprep.subr.bf16.mxu1 %v5743_v30  ;;  %v5861_v28 = vld [vmem:[%s6924_s24 + $0x1e0] ss:$8 sps:$4 sm:$0xff]   ;;  %v5867_v30 = vld [vmem:[%s6924_s24 + $0x4e4] ss:$8 sps:$4 sm:$0xff]  }
 0x103   : > { %3805 = vmatprep.subr.bf16.mxu0 %v5747_v31  ;;  %3078 = vmatmul.mubr.bf16.gmra.mrb[8].mxu1 %v5716_v26  ;;  %v5786_v26 = vld [vmem:[%s6926_s26 + $0x31c] ss:$48 sps:$4 sm:$0xff]   ;;  %v5788_v31 = vld [vmem:[%s6926_s26 + $0x300] ss:$48 sps:$4 sm:$0xff]  }
 0x104   : > { %3657 = vmatmul.mubr.bf16.gmra.mrb[8].mxu0 %v5720_v27  ;;  %3087 = vmatprep.mubr.bf16.mxu1 %v5724_v29  ;;  %v5863_v27 = vld [vmem:[%s6924_s24 + $0x1e4] ss:$8 sps:$4 sm:$0xff]   ;;  %v5865_v29 = vld [vmem:[%s6924_s24 + $0x4e0] ss:$8 sps:$4 sm:$0xff]  }
 0x105   : > { %3666 = vmatprep.mubr.bf16.mxu0 %v5726_v32  ;;  %3227 = vmatpush1.bf16.msra.mxu1 %v5741_v33  ;;  %v5792_v32 = vld [vmem:[%s6926_s26 + $0x318] ss:$48 sps:$4 sm:$0xff]  }
 0x106   : > { %3806 = vmatpush1.bf16.msra.mxu0 %v5745_v34  ;;  %3228 = vmatprep.subr.bf16.mxu1 %v5755_v35  ;;  %v5873_v33 = vld [vmem:[%s6924_s24 + $0x1f0] ss:$8 sps:$4 sm:$0xff]   ;;  %v5796_v34 = vld [vmem:[%s6926_s26 + $0x364] ss:$48 sps:$4 sm:$0xff]  }
 0x107   : > { %3807 = vmatprep.subr.bf16.mxu0 %v5759_v36  ;;  %v5875_v35 = vld [vmem:[%s6924_s24 + $0x1f4] ss:$8 sps:$4 sm:$0xff]   ;;  %v5877_v36 = vld [vmem:[%s6924_s24 + $0x4f0] ss:$8 sps:$4 sm:$0xff]  }
 0x109   : > { %3229 = vmatpush1.bf16.msra.mxu1 %v5753_v37  ;;  %v5879_v37 = vld [vmem:[%s6924_s24 + $0x4f4] ss:$8 sps:$4 sm:$0xff]  }
 0x10a   : > { %3808 = vmatpush1.bf16.msra.mxu0 %v5757_v38  ;;  %3230 = vmatprep.subr.bf16.mxu1 %v5767_v40  ;;  %v5798_v38 = vld [vmem:[%s6926_s26 + $0x37c] ss:$48 sps:$4 sm:$0xff]  }
 0x10b   : > { %3809 = vmatprep.subr.bf16.mxu0 %v5771_v41  ;;  %3088 = vmatmul.mubr.bf16.gmra.mrb[12].mxu1 %v5728_v39  ;;  %v5888_v39 = vld [vmem:[%s6924_s24 + $0x204] ss:$8 sps:$4 sm:$0xff]   ;;  %v5800_v41 = vld [vmem:[%s6926_s26 + $0x360] ss:$48 sps:$4 sm:$0xff]  }
 0x10c   : > { %3667 = vmatmul.mubr.bf16.gmra.mrb[12].mxu0 %v5732_v42  ;;  %3097 = vmatprep.mubr.bf16.mxu1 %v5736_v43  ;;  %v5891_v40 = vld [vmem:[%s6924_s24 + $0x504] ss:$8 sps:$4 sm:$0xff]   ;;  %v5804_v42 = vld [vmem:[%s6926_s26 + $0x378] ss:$48 sps:$4 sm:$0xff]  }
 0x10d   : > { %3676 = vmatprep.mubr.bf16.mxu0 %v5738_v44  ;;  %3231 = vmatpush1.bf16.msra.mxu1 %v5765_v45  ;;  %v5808_v43 = vld [vmem:[%s6926_s26 + $0x3c4] ss:$48 sps:$4 sm:$0xff]   ;;  %v5810_v44 = vld [vmem:[%s6926_s26 + $0x3dc] ss:$48 sps:$4 sm:$0xff]   ;;  %v5812_v45 = vld [vmem:[%s6926_s26 + $0x3c0] ss:$48 sps:$4 sm:$0xff]  }
 0x10e   : > { %3810 = vmatpush1.bf16.msra.mxu0 %v5769_v46  ;;  %3232 = vmatprep.subr.bf16.mxu1 %v5779_v47  ;;  %v5816_v46 = vld [vmem:[%s6926_s26 + $0x3d8] ss:$48 sps:$4 sm:$0xff]   ;;  %v5820_v47 = vld [vmem:[%s6926_s26 + $0x424] ss:$48 sps:$4 sm:$0xff]  }
 0x10f   : > { %3811 = vmatprep.subr.bf16.mxu0 %v5783_v48  ;;  %v5822_v48 = vld [vmem:[%s6926_s26 + $0x43c] ss:$48 sps:$4 sm:$0xff]  }
 0x111   : > { %3233 = vmatpush1.bf16.msra.mxu1 %v5777_v49  ;;  %v5824_v49 = vld [vmem:[%s6926_s26 + $0x420] ss:$48 sps:$4 sm:$0xff]  }
 0x112   : > { %3812 = vmatpush1.bf16.msra.mxu0 %v5781_v52  ;;  %3234 = vmatprep.subr.bf16.mxu1 %v5791_v54  ;;  %v5834_v52 = vld [vmem:[%s6926_s26 + $0x49c] ss:$48 sps:$4 sm:$0xff]   ;;  %v5840_v54 = vld [vmem:[%s6926_s26 + $0x498] ss:$48 sps:$4 sm:$0xff]  }
 0x113   : > { %3813 = vmatprep.subr.bf16.mxu0 %v5795_v55  ;;  %3098 = vmatmul.mubr.bf16.gmra.mrb[16].mxu1 %v5740_v50  ;;  %v5828_v50 = vld [vmem:[%s6926_s26 + $0x438] ss:$48 sps:$4 sm:$0xff]   ;;  %v5844_v55 = vld [vmem:[%s6926_s26 + $0x4e4] ss:$48 sps:$4 sm:$0xff]  }
 0x114   : > { %3677 = vmatmul.mubr.bf16.gmra.mrb[16].mxu0 %v5744_v51  ;;  %3107 = vmatprep.mubr.bf16.mxu1 %v5748_v53  ;;  %v5832_v51 = vld [vmem:[%s6926_s26 + $0x484] ss:$48 sps:$4 sm:$0xff]   ;;  %v5836_v53 = vld [vmem:[%s6926_s26 + $0x480] ss:$48 sps:$4 sm:$0xff]  }
 0x115   : > { %3686 = vmatprep.mubr.bf16.mxu0 %v5750_v56  ;;  %3235 = vmatpush1.bf16.msra.mxu1 %v5789_v57  ;;  %v5846_v56 = vld [vmem:[%s6926_s26 + $0x4fc] ss:$48 sps:$4 sm:$0xff]   ;;  %v5848_v57 = vld [vmem:[%s6926_s26 + $0x4e0] ss:$48 sps:$4 sm:$0xff]  }
 0x116   : > { %3814 = vmatpush1.bf16.msra.mxu0 %v5793_v58  ;;  %3236 = vmatprep.subr.bf16.mxu1 %v5803_v59  ;;  %v5852_v58 = vld [vmem:[%s6926_s26 + $0x4f8] ss:$48 sps:$4 sm:$0xff]   ;;  %v5856_v59 = vld [vmem:[%s6926_s26 + $0x544] ss:$48 sps:$4 sm:$0xff]  }
 0x117   : > { %3815 = vmatprep.subr.bf16.mxu0 %v5807_v60  ;;  %v5858_v60 = vld [vmem:[%s6926_s26 + $0x55c] ss:$48 sps:$4 sm:$0xff]  }
 0x119   : > { %3237 = vmatpush1.bf16.msra.mxu1 %v5801_v61  ;;  %v5860_v61 = vld [vmem:[%s6926_s26 + $0x540] ss:$48 sps:$4 sm:$0xff]  }
 0x11a   : > { %3816 = vmatpush1.bf16.msra.mxu0 %v5805_v62  ;;  %3238 = vmatprep.subr.bf16.mxu1 %v5815_v0  ;;  %v5864_v62 = vld [vmem:[%s6926_s26 + $0x558] ss:$48 sps:$4 sm:$0xff]   ;;  %v5870_v0 = vld [vmem:[%s6926_s26 + $0x5bc] ss:$48 sps:$4 sm:$0xff]  }
 0x11b   : > { %3817 = vmatprep.subr.bf16.mxu0 %v5819_v1  ;;  %3108 = vmatmul.mubr.bf16.gmra.mrb[20].mxu1 %v5752_v63  ;;  %v5868_v63 = vld [vmem:[%s6926_s26 + $0x5a4] ss:$48 sps:$4 sm:$0xff]   ;;  %v5872_v1 = vld [vmem:[%s6926_s26 + $0x5a0] ss:$48 sps:$4 sm:$0xff]  }
 0x11c   : > { %3687 = vmatmul.mubr.bf16.gmra.mrb[20].mxu0 %v5756_v2  ;;  %3117 = vmatprep.mubr.bf16.mxu1 %v5760_v3  ;;  %v5876_v2 = vld [vmem:[%s6926_s26 + $0x5b8] ss:$48 sps:$4 sm:$0xff]   ;;  %v5882_v3 = vld [vmem:[%s6926_s26 + $0xc] ss:$48 sps:$4 sm:$0xff]  }
 0x11d   : > { %3696 = vmatprep.mubr.bf16.mxu0 %v5762_v4  ;;  %3239 = vmatpush1.bf16.msra.mxu1 %v5813_v5  ;;  %v5885_v4 = vld [vmem:[%s6926_s26 + $0x24] ss:$48 sps:$4 sm:$0xff]   ;;  %v5880_v5 = vld [vmem:[%s6926_s26 + $0x8] ss:$48 sps:$4 sm:$0xff]  }
 0x11e   : > { %3818 = vmatpush1.bf16.msra.mxu0 %v5817_v6  ;;  %3240 = vmatprep.subr.bf16.mxu1 %v5827_v7  ;;  %v5883_v6 = vld [vmem:[%s6926_s26 + $0x20] ss:$48 sps:$4 sm:$0xff]  }
 0x11f   : > { %3819 = vmatprep.subr.bf16.mxu0 %v5831_v8  ;;  %v5886_v7 = vld [vmem:[%s6924_s24 + $0x200] ss:$8 sps:$4 sm:$0xff]  }
 0x120   : > { %v5889_v8 = vld [vmem:[%s6924_s24 + $0x500] ss:$8 sps:$4 sm:$0xff]  }
 0x121   : > { %3241 = vmatpush1.bf16.msra.mxu1 %v5825_v9  ;;  %v5892_v9 = vld [vmem:[%s6926_s26 + $0x6c] ss:$48 sps:$4 sm:$0xff]  }
 0x122   : > { %3820 = vmatpush1.bf16.msra.mxu0 %v5829_v12  ;;  %3242 = vmatprep.subr.bf16.mxu1 %v5839_v14  ;;  %v5903_v12 = vld [vmem:[%s6924_s24 + $0x514] ss:$8 sps:$4 sm:$0xff]   ;;  %v5901_v14 = vld [vmem:[%s6924_s24 + $0x510] ss:$8 sps:$4 sm:$0xff]  }
 0x123   : > { %3821 = vmatprep.subr.bf16.mxu0 %v5843_v16  ;;  %3118 = vmatmul.mubr.bf16.gmra.mrb[24].mxu1 %v5764_v10  ;;  %v5894_v10 = vld [vmem:[%s6926_s26 + $0x84] ss:$48 sps:$4 sm:$0xff]  }
 0x124   : > { %3697 = vmatmul.mubr.bf16.gmra.mrb[24].mxu0 %v5768_v11  ;;  %3127 = vmatprep.mubr.bf16.mxu1 %v5772_v13  ;;  %v5899_v11 = vld [vmem:[%s6924_s24 + $0x214] ss:$8 sps:$4 sm:$0xff]   ;;  %v5897_v13 = vld [vmem:[%s6924_s24 + $0x210] ss:$8 sps:$4 sm:$0xff]   ;;  %v5915_v16 = vld [vmem:[%s6924_s24 + $0x524] ss:$8 sps:$4 sm:$0xff]  }
 0x125   : > { %3706 = vmatprep.mubr.bf16.mxu0 %v5774_v15  ;;  %3243 = vmatpush1.bf16.msra.mxu1 %v5837_v17  ;;  %v5911_v15 = vld [vmem:[%s6924_s24 + $0x224] ss:$8 sps:$4 sm:$0xff]   ;;  %v5896_v17 = vld [vmem:[%s6926_s26 + $0x68] ss:$48 sps:$4 sm:$0xff]  }
 0x126   : > { %3822 = vmatpush1.bf16.msra.mxu0 %v5841_v18  ;;  %3244 = vmatprep.subr.bf16.mxu1 %v5851_v20  ;;  %v5900_v18 = vld [vmem:[%s6926_s26 + $0x80] ss:$48 sps:$4 sm:$0xff]   ;;  %v5906_v20 = vld [vmem:[%s6926_s26 + $0xe4] ss:$48 sps:$4 sm:$0xff]  }
 0x127   : > { %3823 = vmatprep.subr.bf16.mxu0 %v5855_v22  ;;  %v5913_v22 = vld [vmem:[%s6924_s24 + $0x520] ss:$8 sps:$4 sm:$0xff]  }
 0x129   : > { %3245 = vmatpush1.bf16.msra.mxu1 %v5849_v19  ;;  %v5904_v19 = vld [vmem:[%s6926_s26 + $0xcc] ss:$48 sps:$4 sm:$0xff]  }
 0x12a   : > { %3824 = vmatpush1.bf16.msra.mxu0 %v5853_v21  ;;  %3246 = vmatprep.subr.bf16.mxu1 %v5863_v27  ;;  %v5909_v21 = vld [vmem:[%s6924_s24 + $0x220] ss:$8 sps:$4 sm:$0xff]  }
 0x12b   : > { %3128 = vmatmul.mubr.bf16.gmra.mrb[28].mxu1 %v5776_v23  ;;  %3825 = vmatprep.subr.bf16.mxu0 %v5867_v30  ;;  %v5923_v23 = vld [vmem:[%s6924_s24 + $0x234] ss:$8 sps:$4 sm:$0xff]   ;;  %v5912_v27 = vld [vmem:[%s6926_s26 + $0xe0] ss:$48 sps:$4 sm:$0xff]   ;;  %v5935_v30 = vld [vmem:[%s6924_s24 + $0x244] ss:$8 sps:$4 sm:$0xff]  }
 0x12c   : > { %3707 = vmatmul.mubr.bf16.gmra.mrb[28].mxu0 %v5780_v24  ;;  %3137 = vmatprep.mubr.bf16.mxu1 %v5784_v25  ;;  %v5927_v24 = vld [vmem:[%s6924_s24 + $0x534] ss:$8 sps:$4 sm:$0xff]   ;;  %v5921_v25 = vld [vmem:[%s6924_s24 + $0x230] ss:$8 sps:$4 sm:$0xff]  }
 0x12d   : > { %3716 = vmatprep.mubr.bf16.mxu0 %v5786_v26  ;;  %3247 = vmatpush1.bf16.msra.mxu1 %v5861_v28  ;;  %v5908_v26 = vld [vmem:[%s6926_s26 + $0xc8] ss:$48 sps:$4 sm:$0xff]  }
 0x12e   : > { %3826 = vmatpush1.bf16.msra.mxu0 %v5865_v29  ;;  %3248 = vmatprep.subr.bf16.mxu1 %v5875_v35  ;;  %v5925_v28 = vld [vmem:[%s6924_s24 + $0x530] ss:$8 sps:$4 sm:$0xff]   ;;  %v5916_v29 = vld [vmem:[%s6926_s26 + $0x12c] ss:$48 sps:$4 sm:$0xff]  }
 0x12f   : > { %3827 = vmatprep.subr.bf16.mxu0 %v5879_v37  ;;  %v5947_v35 = vld [vmem:[%s6924_s24 + $0x254] ss:$8 sps:$4 sm:$0xff]   ;;  %v5945_v37 = vld [vmem:[%s6924_s24 + $0x250] ss:$8 sps:$4 sm:$0xff]  }
 0x131   : > { %3249 = vmatpush1.bf16.msra.mxu1 %v5873_v33  ;;  %v5933_v33 = vld [vmem:[%s6924_s24 + $0x240] ss:$8 sps:$4 sm:$0xff]  }
 0x132   : > { %3828 = vmatpush1.bf16.msra.mxu0 %v5877_v36  ;;  %3411 = vmatprep.subr.bf16.mxu1 %v5888_v39  ;;  %v5951_v36 = vld [vmem:[%s6924_s24 + $0x554] ss:$8 sps:$4 sm:$0xff]   ;;  %v5924_v39 = vld [vmem:[%s6926_s26 + $0x140] ss:$48 sps:$4 sm:$0xff]  }
 0x133   : > { %3138 = vmatmul.mubr.bf16.gmra.mrb[32].mxu1 %v5788_v31  ;;  %3990 = vmatprep.subr.bf16.mxu0 %v5891_v40  ;;  %v5939_v31 = vld [vmem:[%s6924_s24 + $0x544] ss:$8 sps:$4 sm:$0xff]   ;;  %v5949_v40 = vld [vmem:[%s6924_s24 + $0x550] ss:$8 sps:$4 sm:$0xff]  }
 0x134   : > { %3717 = vmatmul.mubr.bf16.gmra.mrb[32].mxu0 %v5792_v32  ;;  %3147 = vmatprep.mubr.bf16.mxu1 %v5796_v34  ;;  %v5918_v32 = vld [vmem:[%s6926_s26 + $0x144] ss:$48 sps:$4 sm:$0xff]   ;;  %v5937_v34 = vld [vmem:[%s6924_s24 + $0x540] ss:$8 sps:$4 sm:$0xff]  }
 0x135   : > { %3726 = vmatprep.mubr.bf16.mxu0 %v5798_v38  ;;  %v5920_v38 = vld [vmem:[%s6926_s26 + $0x128] ss:$48 sps:$4 sm:$0xff]  }
 0x13b   : > { %3148 = vmatmul.mubr.bf16.gmra.mrb[36].mxu1 %v5800_v41  ;;  %v5959_v41 = vld [vmem:[%s6924_s24 + $0x264] ss:$8 sps:$4 sm:$0xff]  }
 0x13c   : > { %3727 = vmatmul.mubr.bf16.gmra.mrb[36].mxu0 %v5804_v42  ;;  %3157 = vmatprep.mubr.bf16.mxu1 %v5808_v43  ;;  %v5963_v42 = vld [vmem:[%s6924_s24 + $0x564] ss:$8 sps:$4 sm:$0xff]  }
 0x13d   : > { %3736 = vmatprep.mubr.bf16.mxu0 %v5810_v44  ;;  %v5928_v43 = vld [vmem:[%s6926_s26 + $0x18c] ss:$48 sps:$4 sm:$0xff]   ;;  %v5930_v44 = vld [vmem:[%s6926_s26 + $0x1a4] ss:$48 sps:$4 sm:$0xff]  }
 0x143   : > { %3158 = vmatmul.mubr.bf16.gmra.mrb[40].mxu1 %v5812_v45  ;;  %v5957_v45 = vld [vmem:[%s6924_s24 + $0x260] ss:$8 sps:$4 sm:$0xff]  }
 0x144   : > { %3737 = vmatmul.mubr.bf16.gmra.mrb[40].mxu0 %v5816_v46  ;;  %3167 = vmatprep.mubr.bf16.mxu1 %v5820_v47  ;;  %v5961_v46 = vld [vmem:[%s6924_s24 + $0x560] ss:$8 sps:$4 sm:$0xff]   ;;  %v5971_v47 = vld [vmem:[%s6924_s24 + $0x274] ss:$8 sps:$4 sm:$0xff]  }
 0x145   : > { %3746 = vmatprep.mubr.bf16.mxu0 %v5822_v48  ;;  %v5975_v48 = vld [vmem:[%s6924_s24 + $0x574] ss:$8 sps:$4 sm:$0xff]  }
 0x14b   : > { %3168 = vmatmul.mubr.bf16.gmra.mrb[44].mxu1 %v5824_v49  ;;  %v5969_v49 = vld [vmem:[%s6924_s24 + $0x270] ss:$8 sps:$4 sm:$0xff]  }
 0x14c   : > { %3747 = vmatmul.mubr.bf16.gmra.mrb[44].mxu0 %v5828_v50  ;;  %3177 = vmatprep.mubr.bf16.mxu1 %v5832_v51  ;;  %v5973_v50 = vld [vmem:[%s6924_s24 + $0x570] ss:$8 sps:$4 sm:$0xff]  }
 0x14d   : > { %3756 = vmatprep.mubr.bf16.mxu0 %v5834_v52  ;;  %v5932_v51 = vld [vmem:[%s6926_s26 + $0x188] ss:$48 sps:$4 sm:$0xff]   ;;  %v5983_v52 = vld [vmem:[%s6924_s24 + $0x284] ss:$8 sps:$4 sm:$0xff]  }
 0x153   : > { %3178 = vmatmul.mubr.bf16.gmra.mrb[48].mxu1 %v5836_v53  ;;  %v5987_v53 = vld [vmem:[%s6924_s24 + $0x584] ss:$8 sps:$4 sm:$0xff]  }
 0x154   : > { %3757 = vmatmul.mubr.bf16.gmra.mrb[48].mxu0 %v5840_v54  ;;  %3187 = vmatprep.mubr.bf16.mxu1 %v5844_v55  ;;  %v5936_v54 = vld [vmem:[%s6926_s26 + $0x1a0] ss:$48 sps:$4 sm:$0xff]   ;;  %v5940_v55 = vld [vmem:[%s6926_s26 + $0x1ec] ss:$48 sps:$4 sm:$0xff]  }
 0x155   : > { %3766 = vmatprep.mubr.bf16.mxu0 %v5846_v56  ;;  %v5942_v56 = vld [vmem:[%s6926_s26 + $0x204] ss:$48 sps:$4 sm:$0xff]  }
 0x15b   : > { %3188 = vmatmul.mubr.bf16.gmra.mrb[52].mxu1 %v5848_v57  ;;  %v5981_v57 = vld [vmem:[%s6924_s24 + $0x280] ss:$8 sps:$4 sm:$0xff]  }
 0x15c   : > { %3767 = vmatmul.mubr.bf16.gmra.mrb[52].mxu0 %v5852_v58  ;;  %3197 = vmatprep.mubr.bf16.mxu1 %v5856_v59  ;;  %v5985_v58 = vld [vmem:[%s6924_s24 + $0x580] ss:$8 sps:$4 sm:$0xff]   ;;  %v5995_v59 = vld [vmem:[%s6924_s24 + $0x294] ss:$8 sps:$4 sm:$0xff]  }
 0x15d   : > { %3776 = vmatprep.mubr.bf16.mxu0 %v5858_v60  ;;  %v5999_v60 = vld [vmem:[%s6924_s24 + $0x594] ss:$8 sps:$4 sm:$0xff]  }
 0x163   : > { %3198 = vmatmul.mubr.bf16.gmra.mrb[56].mxu1 %v5860_v61  ;;  %v5993_v61 = vld [vmem:[%s6924_s24 + $0x290] ss:$8 sps:$4 sm:$0xff]  }
 0x164   : > { %3777 = vmatmul.mubr.bf16.gmra.mrb[56].mxu0 %v5864_v62  ;;  %3207 = vmatprep.mubr.bf16.mxu1 %v5868_v63  ;;  %v5997_v62 = vld [vmem:[%s6924_s24 + $0x590] ss:$8 sps:$4 sm:$0xff]   ;;  %v6007_v63 = vld [vmem:[%s6924_s24 + $0x2a4] ss:$8 sps:$4 sm:$0xff]  }
 0x165   : > { %3786 = vmatprep.mubr.bf16.mxu0 %v5870_v0  ;;  %v6011_v0 = vld [vmem:[%s6924_s24 + $0x5a4] ss:$8 sps:$4 sm:$0xff]  }
 0x16b   : > { %3208 = vmatmul.mubr.bf16.gmra.mrb[60].mxu1 %v5872_v1  ;;  %v5944_v1 = vld [vmem:[%s6926_s26 + $0x1e8] ss:$48 sps:$4 sm:$0xff]  }
 0x16c   : > { %3787 = vmatmul.mubr.bf16.gmra.mrb[60].mxu0 %v5876_v2  ;;  %3250 = vmatprep.mubr.bf16.mxu1 %v5882_v3  ;;  %v5948_v2 = vld [vmem:[%s6926_s26 + $0x200] ss:$48 sps:$4 sm:$0xff]   ;;  %v5952_v3 = vld [vmem:[%s6926_s26 + $0x24c] ss:$48 sps:$4 sm:$0xff]  }
 0x16d   : > { %3829 = vmatprep.mubr.bf16.mxu0 %v5885_v4  ;;  %v5954_v4 = vld [vmem:[%s6926_s26 + $0x264] ss:$48 sps:$4 sm:$0xff]  }
 0x173   : > { %3251 = vmatmul.mubr.bf16.vlgmr.msra.gmra.mrb[0].mxu1 %v5880_v5  ;;  %v6005_v5 = vld [vmem:[%s6924_s24 + $0x2a0] ss:$8 sps:$4 sm:$0xff]  }
 0x174   : > { %3830 = vmatmul.mubr.bf16.vlgmr.msra.gmra.mrb[0].mxu0 %v5883_v6  ;;  %3412 = vmatpush1.bf16.msra.mxu1 %v5886_v7  ;;  %v6009_v6 = vld [vmem:[%s6924_s24 + $0x5a0] ss:$8 sps:$4 sm:$0xff]   ;;  %v6019_v7 = vld [vmem:[%s6924_s24 + $0x2b4] ss:$8 sps:$4 sm:$0xff]  }
 0x175   : > { %3991 = vmatpush1.bf16.msra.mxu0 %v5889_v8  ;;  %3260 = vmatprep.mubr.bf16.mxu1 %v5892_v9  ;;  %v6023_v8 = vld [vmem:[%s6924_s24 + $0x5b4] ss:$8 sps:$4 sm:$0xff]   ;;  %v6017_v9 = vld [vmem:[%s6924_s24 + $0x2b0] ss:$8 sps:$4 sm:$0xff]  }
 0x176   : > { %3839 = vmatprep.mubr.bf16.mxu0 %v5894_v10  ;;  %3413 = vmatprep.subr.bf16.mxu1 %v5899_v11  ;;  %v6021_v10 = vld [vmem:[%s6924_s24 + $0x5b0] ss:$8 sps:$4 sm:$0xff]   ;;  %v6031_v11 = vld [vmem:[%s6924_s24 + $0x2c4] ss:$8 sps:$4 sm:$0xff]  }
 0x177   : > { %3992 = vmatprep.subr.bf16.mxu0 %v5903_v12  ;;  %v6035_v12 = vld [vmem:[%s6924_s24 + $0x5c4] ss:$8 sps:$4 sm:$0xff]  }
 0x178   : > { %3414 = vmatpush1.bf16.msra.mxu1 %v5897_v13  ;;  %v5956_v13 = vld [vmem:[%s6926_s26 + $0x248] ss:$48 sps:$4 sm:$0xff]  }
 0x179   : > { %3993 = vmatpush1.bf16.msra.mxu0 %v5901_v14  ;;  %3415 = vmatprep.subr.bf16.mxu1 %v5911_v15  ;;  %v5960_v14 = vld [vmem:[%s6926_s26 + $0x260] ss:$48 sps:$4 sm:$0xff]   ;;  %v5964_v15 = vld [vmem:[%s6926_s26 + $0x2ac] ss:$48 sps:$4 sm:$0xff]  }
 0x17a   : > { %3994 = vmatprep.subr.bf16.mxu0 %v5915_v16  ;;  %v5966_v16 = vld [vmem:[%s6926_s26 + $0x2c4] ss:$48 sps:$4 sm:$0xff]  }
 0x17b   : > { %3261 = vmatmul.mubr.bf16.gmra.mrb[4].mxu1 %v5896_v17  ;;  %v6029_v17 = vld [vmem:[%s6924_s24 + $0x2c0] ss:$8 sps:$4 sm:$0xff]  }
 0x17c   : > { %3840 = vmatmul.mubr.bf16.gmra.mrb[4].mxu0 %v5900_v18  ;;  %3270 = vmatprep.mubr.bf16.mxu1 %v5904_v19  ;;  %v6033_v18 = vld [vmem:[%s6924_s24 + $0x5c0] ss:$8 sps:$4 sm:$0xff]   ;;  %v6043_v19 = vld [vmem:[%s6924_s24 + $0x2d4] ss:$8 sps:$4 sm:$0xff]  }
 0x17d   : > { %3849 = vmatprep.mubr.bf16.mxu0 %v5906_v20  ;;  %3416 = vmatpush1.bf16.msra.mxu1 %v5909_v21  ;;  %v6047_v20 = vld [vmem:[%s6924_s24 + $0x5d4] ss:$8 sps:$4 sm:$0xff]   ;;  %v6041_v21 = vld [vmem:[%s6924_s24 + $0x2d0] ss:$8 sps:$4 sm:$0xff]  }
 0x17e   : > { %3995 = vmatpush1.bf16.msra.mxu0 %v5913_v22  ;;  %3417 = vmatprep.subr.bf16.mxu1 %v5923_v23  ;;  %v6045_v22 = vld [vmem:[%s6924_s24 + $0x5d0] ss:$8 sps:$4 sm:$0xff]   ;;  %v6055_v23 = vld [vmem:[%s6924_s24 + $0x2e4] ss:$8 sps:$4 sm:$0xff]  }
 0x17f   : > { %3996 = vmatprep.subr.bf16.mxu0 %v5927_v24  ;;  %v6059_v24 = vld [vmem:[%s6924_s24 + $0x5e4] ss:$8 sps:$4 sm:$0xff]  }
 0x181   : > { %3418 = vmatpush1.bf16.msra.mxu1 %v5921_v25  ;;  %v5968_v25 = vld [vmem:[%s6926_s26 + $0x2a8] ss:$48 sps:$4 sm:$0xff]  }
 0x182   : > { %3997 = vmatpush1.bf16.msra.mxu0 %v5925_v28  ;;  %3419 = vmatprep.subr.bf16.mxu1 %v5935_v30  ;;  %v5978_v28 = vld [vmem:[%s6926_s26 + $0x324] ss:$48 sps:$4 sm:$0xff]   ;;  %v6057_v30 = vld [vmem:[%s6924_s24 + $0x5e0] ss:$8 sps:$4 sm:$0xff]  }
 0x183   : > { %3998 = vmatprep.subr.bf16.mxu0 %v5939_v31  ;;  %3271 = vmatmul.mubr.bf16.gmra.mrb[8].mxu1 %v5908_v26  ;;  %v5972_v26 = vld [vmem:[%s6926_s26 + $0x2c0] ss:$48 sps:$4 sm:$0xff]   ;;  %v6067_v31 = vld [vmem:[%s6924_s24 + $0x2f4] ss:$8 sps:$4 sm:$0xff]  }
 0x184   : > { %3850 = vmatmul.mubr.bf16.gmra.mrb[8].mxu0 %v5912_v27  ;;  %3280 = vmatprep.mubr.bf16.mxu1 %v5916_v29  ;;  %v5976_v27 = vld [vmem:[%s6926_s26 + $0x30c] ss:$48 sps:$4 sm:$0xff]   ;;  %v6053_v29 = vld [vmem:[%s6924_s24 + $0x2e0] ss:$8 sps:$4 sm:$0xff]  }
 0x185   : > { %3859 = vmatprep.mubr.bf16.mxu0 %v5918_v32  ;;  %3420 = vmatpush1.bf16.msra.mxu1 %v5933_v33  ;;  %v6071_v32 = vld [vmem:[%s6924_s24 + $0x5f4] ss:$8 sps:$4 sm:$0xff]   ;;  %v6065_v33 = vld [vmem:[%s6924_s24 + $0x2f0] ss:$8 sps:$4 sm:$0xff]  }
 0x186   : > { %3999 = vmatpush1.bf16.msra.mxu0 %v5937_v34  ;;  %3421 = vmatprep.subr.bf16.mxu1 %v5947_v35  ;;  %v6069_v34 = vld [vmem:[%s6924_s24 + $0x5f0] ss:$8 sps:$4 sm:$0xff]  }
 0x187   : > { %4000 = vmatprep.subr.bf16.mxu0 %v5951_v36  ;;  %v5980_v35 = vld [vmem:[%s6926_s26 + $0x308] ss:$48 sps:$4 sm:$0xff]   ;;  %v5984_v36 = vld [vmem:[%s6926_s26 + $0x320] ss:$48 sps:$4 sm:$0xff]  }
 0x189   : > { %3422 = vmatpush1.bf16.msra.mxu1 %v5945_v37  ;;  %v5988_v37 = vld [vmem:[%s6926_s26 + $0x36c] ss:$48 sps:$4 sm:$0xff]  }
 0x18a   : > { %4001 = vmatpush1.bf16.msra.mxu0 %v5949_v40  ;;  %3423 = vmatprep.subr.bf16.mxu1 %v5959_v41  ;;  %v5996_v40 = vld [vmem:[%s6926_s26 + $0x380] ss:$48 sps:$4 sm:$0xff]   ;;  %v6000_v41 = vld [vmem:[%s6926_s26 + $0x3cc] ss:$48 sps:$4 sm:$0xff]  }
 0x18b   : > { %4002 = vmatprep.subr.bf16.mxu0 %v5963_v42  ;;  %3281 = vmatmul.mubr.bf16.gmra.mrb[12].mxu1 %v5920_v38  ;;  %v5990_v38 = vld [vmem:[%s6926_s26 + $0x384] ss:$48 sps:$4 sm:$0xff]  }
 0x18c   : > { %3860 = vmatmul.mubr.bf16.gmra.mrb[12].mxu0 %v5924_v39  ;;  %3290 = vmatprep.mubr.bf16.mxu1 %v5928_v43  ;;  %v5992_v39 = vld [vmem:[%s6926_s26 + $0x368] ss:$48 sps:$4 sm:$0xff]   ;;  %v6002_v42 = vld [vmem:[%s6926_s26 + $0x3e4] ss:$48 sps:$4 sm:$0xff]  }
 0x18d   : > { %3869 = vmatprep.mubr.bf16.mxu0 %v5930_v44  ;;  %3424 = vmatpush1.bf16.msra.mxu1 %v5957_v45  ;;  %v6004_v43 = vld [vmem:[%s6926_s26 + $0x3c8] ss:$48 sps:$4 sm:$0xff]   ;;  %v6008_v44 = vld [vmem:[%s6926_s26 + $0x3e0] ss:$48 sps:$4 sm:$0xff]   ;;  %v6012_v45 = vld [vmem:[%s6926_s26 + $0x42c] ss:$48 sps:$4 sm:$0xff]  }
 0x18e   : > { %4003 = vmatpush1.bf16.msra.mxu0 %v5961_v46  ;;  %3425 = vmatprep.subr.bf16.mxu1 %v5971_v47  ;;  %v6014_v46 = vld [vmem:[%s6926_s26 + $0x444] ss:$48 sps:$4 sm:$0xff]   ;;  %v6016_v47 = vld [vmem:[%s6926_s26 + $0x428] ss:$48 sps:$4 sm:$0xff]  }
 0x18f   : > { %4004 = vmatprep.subr.bf16.mxu0 %v5975_v48  ;;  %v6020_v48 = vld [vmem:[%s6926_s26 + $0x440] ss:$48 sps:$4 sm:$0xff]  }
 0x191   : > { %3426 = vmatpush1.bf16.msra.mxu1 %v5969_v49  ;;  %v6024_v49 = vld [vmem:[%s6926_s26 + $0x48c] ss:$48 sps:$4 sm:$0xff]  }
 0x192   : > { %4005 = vmatpush1.bf16.msra.mxu0 %v5973_v50  ;;  %3427 = vmatprep.subr.bf16.mxu1 %v5983_v52  ;;  %v6026_v50 = vld [vmem:[%s6926_s26 + $0x4a4] ss:$48 sps:$4 sm:$0xff]   ;;  %v6032_v52 = vld [vmem:[%s6926_s26 + $0x4a0] ss:$48 sps:$4 sm:$0xff]  }
 0x193   : > { %4006 = vmatprep.subr.bf16.mxu0 %v5987_v53  ;;  %3291 = vmatmul.mubr.bf16.gmra.mrb[16].mxu1 %v5932_v51  ;;  %v6028_v51 = vld [vmem:[%s6926_s26 + $0x488] ss:$48 sps:$4 sm:$0xff]   ;;  %v6036_v53 = vld [vmem:[%s6926_s26 + $0x4ec] ss:$48 sps:$4 sm:$0xff]  }
 0x194   : > { %3870 = vmatmul.mubr.bf16.gmra.mrb[16].mxu0 %v5936_v54  ;;  %3300 = vmatprep.mubr.bf16.mxu1 %v5940_v55  ;;  %v6038_v54 = vld [vmem:[%s6926_s26 + $0x504] ss:$48 sps:$4 sm:$0xff]   ;;  %v6040_v55 = vld [vmem:[%s6926_s26 + $0x4e8] ss:$48 sps:$4 sm:$0xff]  }
 0x195   : > { %3879 = vmatprep.mubr.bf16.mxu0 %v5942_v56  ;;  %3428 = vmatpush1.bf16.msra.mxu1 %v5981_v57  ;;  %v6044_v56 = vld [vmem:[%s6926_s26 + $0x500] ss:$48 sps:$4 sm:$0xff]   ;;  %v6048_v57 = vld [vmem:[%s6926_s26 + $0x54c] ss:$48 sps:$4 sm:$0xff]  }
 0x196   : > { %4007 = vmatpush1.bf16.msra.mxu0 %v5985_v58  ;;  %3429 = vmatprep.subr.bf16.mxu1 %v5995_v59  ;;  %v6050_v58 = vld [vmem:[%s6926_s26 + $0x564] ss:$48 sps:$4 sm:$0xff]   ;;  %v6052_v59 = vld [vmem:[%s6926_s26 + $0x548] ss:$48 sps:$4 sm:$0xff]  }
 0x197   : > { %4008 = vmatprep.subr.bf16.mxu0 %v5999_v60  ;;  %v6056_v60 = vld [vmem:[%s6926_s26 + $0x560] ss:$48 sps:$4 sm:$0xff]  }
 0x199   : > { %3430 = vmatpush1.bf16.msra.mxu1 %v5993_v61  ;;  %v6060_v61 = vld [vmem:[%s6926_s26 + $0x5ac] ss:$48 sps:$4 sm:$0xff]  }
 0x19a   : > { %4009 = vmatpush1.bf16.msra.mxu0 %v5997_v62  ;;  %3431 = vmatprep.subr.bf16.mxu1 %v6007_v63  ;;  %v6062_v62 = vld [vmem:[%s6926_s26 + $0x5c4] ss:$48 sps:$4 sm:$0xff]   ;;  %v6064_v63 = vld [vmem:[%s6926_s26 + $0x5a8] ss:$48 sps:$4 sm:$0xff]  }
 0x19b   : > { %4010 = vmatprep.subr.bf16.mxu0 %v6011_v0  ;;  %3301 = vmatmul.mubr.bf16.gmra.mrb[20].mxu1 %v5944_v1  ;;  %v6068_v0 = vld [vmem:[%s6926_s26 + $0x5c0] ss:$48 sps:$4 sm:$0xff]   ;;  %v6074_v1 = vld [vmem:[%s6926_s26 + $0x14] ss:$48 sps:$4 sm:$0xff]  }
 0x19c   : > { %3880 = vmatmul.mubr.bf16.gmra.mrb[20].mxu0 %v5948_v2  ;;  %3310 = vmatprep.mubr.bf16.mxu1 %v5952_v3  ;;  %v6077_v2 = vld [vmem:[%s6926_s26 + $0x2c] ss:$48 sps:$4 sm:$0xff]   ;;  %v6072_v3 = vld [vmem:[%s6926_s26 + $0x10] ss:$48 sps:$4 sm:$0xff]  }
 0x19d   : > { %3889 = vmatprep.mubr.bf16.mxu0 %v5954_v4  ;;  %3432 = vmatpush1.bf16.msra.mxu1 %v6005_v5  ;;  %v6075_v4 = vld [vmem:[%s6926_s26 + $0x28] ss:$48 sps:$4 sm:$0xff]   ;;  %v6078_v5 = vld [vmem:[%s6926_s26 + $0x74] ss:$48 sps:$4 sm:$0xff]  }
 0x19e   : > { %4011 = vmatpush1.bf16.msra.mxu0 %v6009_v6  ;;  %3433 = vmatprep.subr.bf16.mxu1 %v6019_v7  ;;  %v6080_v6 = vld [vmem:[%s6926_s26 + $0x8c] ss:$48 sps:$4 sm:$0xff]   ;;  %v6082_v7 = vld [vmem:[%s6926_s26 + $0x70] ss:$48 sps:$4 sm:$0xff]  }
 0x19f   : > { %4012 = vmatprep.subr.bf16.mxu0 %v6023_v8  ;;  %v6083_v8 = vld [vmem:[%s6926_s26 + $0x88] ss:$48 sps:$4 sm:$0xff]  }
 0x1a1   : > { %3434 = vmatpush1.bf16.msra.mxu1 %v6017_v9  ;;  %v6084_v9 = vld [vmem:[%s6926_s26 + $0xd4] ss:$48 sps:$4 sm:$0xff]  }
 0x1a2   : > { %4013 = vmatpush1.bf16.msra.mxu0 %v6021_v10  ;;  %3435 = vmatprep.subr.bf16.mxu1 %v6031_v11  ;;  %v6086_v10 = vld [vmem:[%s6926_s26 + $0xec] ss:$48 sps:$4 sm:$0xff]   ;;  %v6088_v11 = vld [vmem:[%s6926_s26 + $0xd0] ss:$48 sps:$4 sm:$0xff]  }
 0x1a3   : > { %4014 = vmatprep.subr.bf16.mxu0 %v6035_v12  ;;  %3311 = vmatmul.mubr.bf16.gmra.mrb[24].mxu1 %v5956_v13  ;;  %v6089_v12 = vld [vmem:[%s6926_s26 + $0xe8] ss:$48 sps:$4 sm:$0xff]   ;;  %v6090_v13 = vld [vmem:[%s6926_s26 + $0x134] ss:$48 sps:$4 sm:$0xff]  }
 0x1a4   : > { %3890 = vmatmul.mubr.bf16.gmra.mrb[24].mxu0 %v5960_v14  ;;  %3320 = vmatprep.mubr.bf16.mxu1 %v5964_v15  ;;  %v6092_v14 = vld [vmem:[%s6926_s26 + $0x14c] ss:$48 sps:$4 sm:$0xff]   ;;  %v6094_v15 = vld [vmem:[%s6926_s26 + $0x130] ss:$48 sps:$4 sm:$0xff]  }
 0x1a5   : > { %3899 = vmatprep.mubr.bf16.mxu0 %v5966_v16  ;;  %3436 = vmatpush1.bf16.msra.mxu1 %v6029_v17  ;;  %v6095_v16 = vld [vmem:[%s6926_s26 + $0x148] ss:$48 sps:$4 sm:$0xff]   ;;  %v6096_v17 = vld [vmem:[%s6926_s26 + $0x194] ss:$48 sps:$4 sm:$0xff]  }
 0x1a6   : > { %4015 = vmatpush1.bf16.msra.mxu0 %v6033_v18  ;;  %3437 = vmatprep.subr.bf16.mxu1 %v6043_v19  ;;  %v6098_v18 = vld [vmem:[%s6926_s26 + $0x1ac] ss:$48 sps:$4 sm:$0xff]   ;;  %v6100_v19 = vld [vmem:[%s6926_s26 + $0x190] ss:$48 sps:$4 sm:$0xff]  }
 0x1a7   : > { %4016 = vmatprep.subr.bf16.mxu0 %v6047_v20  ;;  %v6101_v20 = vld [vmem:[%s6926_s26 + $0x1a8] ss:$48 sps:$4 sm:$0xff]  }
 0x1a9   : > { %3438 = vmatpush1.bf16.msra.mxu1 %v6041_v21  ;;  %v6102_v21 = vld [vmem:[%s6926_s26 + $0x1f4] ss:$48 sps:$4 sm:$0xff]  }
 0x1aa   : > { %4017 = vmatpush1.bf16.msra.mxu0 %v6045_v22  ;;  %3439 = vmatprep.subr.bf16.mxu1 %v6055_v23  ;;  %v6104_v22 = vld [vmem:[%s6926_s26 + $0x20c] ss:$48 sps:$4 sm:$0xff]   ;;  %v6106_v23 = vld [vmem:[%s6926_s26 + $0x1f0] ss:$48 sps:$4 sm:$0xff]  }
 0x1ab   : > { %4018 = vmatprep.subr.bf16.mxu0 %v6059_v24  ;;  %3321 = vmatmul.mubr.bf16.gmra.mrb[28].mxu1 %v5968_v25  ;;  %v6107_v24 = vld [vmem:[%s6926_s26 + $0x208] ss:$48 sps:$4 sm:$0xff]   ;;  %v6108_v25 = vld [vmem:[%s6926_s26 + $0x254] ss:$48 sps:$4 sm:$0xff]  }
 0x1ac   : > { %3900 = vmatmul.mubr.bf16.gmra.mrb[28].mxu0 %v5972_v26  ;;  %3330 = vmatprep.mubr.bf16.mxu1 %v5976_v27  ;;  %v6110_v26 = vld [vmem:[%s6926_s26 + $0x26c] ss:$48 sps:$4 sm:$0xff]   ;;  %v6112_v27 = vld [vmem:[%s6926_s26 + $0x250] ss:$48 sps:$4 sm:$0xff]  }
 0x1ad   : > { %3909 = vmatprep.mubr.bf16.mxu0 %v5978_v28  ;;  %3440 = vmatpush1.bf16.msra.mxu1 %v6053_v29  ;;  %v6113_v28 = vld [vmem:[%s6926_s26 + $0x268] ss:$48 sps:$4 sm:$0xff]   ;;  %v6114_v29 = vld [vmem:[%s6926_s26 + $0x2b4] ss:$48 sps:$4 sm:$0xff]  }
 0x1ae   : > { %4019 = vmatpush1.bf16.msra.mxu0 %v6057_v30  ;;  %3441 = vmatprep.subr.bf16.mxu1 %v6067_v31  ;;  %v6116_v30 = vld [vmem:[%s6926_s26 + $0x2cc] ss:$48 sps:$4 sm:$0xff]   ;;  %v6118_v31 = vld [vmem:[%s6926_s26 + $0x2b0] ss:$48 sps:$4 sm:$0xff]  }
 0x1af   : > { %4020 = vmatprep.subr.bf16.mxu0 %v6071_v32  ;;  %v6119_v32 = vld [vmem:[%s6926_s26 + $0x2c8] ss:$48 sps:$4 sm:$0xff]  }
 0x1b1   : > { %3442 = vmatpush1.bf16.msra.mxu1 %v6065_v33  ;;  %v6120_v33 = vld [vmem:[%s6926_s26 + $0x314] ss:$48 sps:$4 sm:$0xff]  }
 0x1b2   : > { %4021 = vmatpush1.bf16.msra.mxu0 %v6069_v34  ;;  %v6122_v34 = vld [vmem:[%s6926_s26 + $0x32c] ss:$48 sps:$4 sm:$0xff]  }
 0x1b3   : > { %3331 = vmatmul.mubr.bf16.gmra.mrb[32].mxu1 %v5980_v35  ;;  %v6124_v35 = vld [vmem:[%s6926_s26 + $0x310] ss:$48 sps:$4 sm:$0xff]  }
 0x1b4   : > { %3910 = vmatmul.mubr.bf16.gmra.mrb[32].mxu0 %v5984_v36  ;;  %3340 = vmatprep.mubr.bf16.mxu1 %v5988_v37  ;;  %v6125_v36 = vld [vmem:[%s6926_s26 + $0x328] ss:$48 sps:$4 sm:$0xff]   ;;  %v6126_v37 = vld [vmem:[%s6926_s26 + $0x374] ss:$48 sps:$4 sm:$0xff]  }
 0x1b5   : > { %3919 = vmatprep.mubr.bf16.mxu0 %v5990_v38  ;;  %v6128_v38 = vld [vmem:[%s6926_s26 + $0x38c] ss:$48 sps:$4 sm:$0xff]  }
 0x1bb   : > { %3341 = vmatmul.mubr.bf16.gmra.mrb[36].mxu1 %v5992_v39  ;;  %v6130_v39 = vld [vmem:[%s6926_s26 + $0x370] ss:$48 sps:$4 sm:$0xff]  }
 0x1bc   : > { %3920 = vmatmul.mubr.bf16.gmra.mrb[36].mxu0 %v5996_v40  ;;  %3350 = vmatprep.mubr.bf16.mxu1 %v6000_v41  ;;  %v6131_v40 = vld [vmem:[%s6926_s26 + $0x388] ss:$48 sps:$4 sm:$0xff]   ;;  %v6132_v41 = vld [vmem:[%s6926_s26 + $0x3d4] ss:$48 sps:$4 sm:$0xff]  }
 0x1bd   : > { %3929 = vmatprep.mubr.bf16.mxu0 %v6002_v42  ;;  %v6134_v42 = vld [vmem:[%s6926_s26 + $0x3ec] ss:$48 sps:$4 sm:$0xff]  }
 0x1c3   : > { %3351 = vmatmul.mubr.bf16.gmra.mrb[40].mxu1 %v6004_v43  ;;  %v6136_v43 = vld [vmem:[%s6926_s26 + $0x3d0] ss:$48 sps:$4 sm:$0xff]  }
 0x1c4   : > { %3930 = vmatmul.mubr.bf16.gmra.mrb[40].mxu0 %v6008_v44  ;;  %3360 = vmatprep.mubr.bf16.mxu1 %v6012_v45  ;;  %v6137_v44 = vld [vmem:[%s6926_s26 + $0x3e8] ss:$48 sps:$4 sm:$0xff]   ;;  %v6138_v45 = vld [vmem:[%s6926_s26 + $0x434] ss:$48 sps:$4 sm:$0xff]  }
 0x1c5   : > { %3939 = vmatprep.mubr.bf16.mxu0 %v6014_v46  ;;  %v6140_v46 = vld [vmem:[%s6926_s26 + $0x44c] ss:$48 sps:$4 sm:$0xff]  }
 0x1cb   : > { %3361 = vmatmul.mubr.bf16.gmra.mrb[44].mxu1 %v6016_v47  ;;  %v6142_v47 = vld [vmem:[%s6926_s26 + $0x430] ss:$48 sps:$4 sm:$0xff]  }
 0x1cc   : > { %3940 = vmatmul.mubr.bf16.gmra.mrb[44].mxu0 %v6020_v48  ;;  %3370 = vmatprep.mubr.bf16.mxu1 %v6024_v49  ;;  %v6143_v48 = vld [vmem:[%s6926_s26 + $0x448] ss:$48 sps:$4 sm:$0xff]   ;;  %v6144_v49 = vld [vmem:[%s6926_s26 + $0x494] ss:$48 sps:$4 sm:$0xff]  }
 0x1cd   : > { %3949 = vmatprep.mubr.bf16.mxu0 %v6026_v50  ;;  %v6146_v50 = vld [vmem:[%s6926_s26 + $0x4ac] ss:$48 sps:$4 sm:$0xff]  }
 0x1d3   : > { %3371 = vmatmul.mubr.bf16.gmra.mrb[48].mxu1 %v6028_v51  ;;  %v6148_v51 = vld [vmem:[%s6926_s26 + $0x490] ss:$48 sps:$4 sm:$0xff]  }
 0x1d4   : > { %3950 = vmatmul.mubr.bf16.gmra.mrb[48].mxu0 %v6032_v52  ;;  %3380 = vmatprep.mubr.bf16.mxu1 %v6036_v53  ;;  %v6149_v52 = vld [vmem:[%s6926_s26 + $0x4a8] ss:$48 sps:$4 sm:$0xff]   ;;  %v6150_v53 = vld [vmem:[%s6926_s26 + $0x4f4] ss:$48 sps:$4 sm:$0xff]  }
 0x1d5   : > { %3959 = vmatprep.mubr.bf16.mxu0 %v6038_v54  ;;  %v6152_v54 = vld [vmem:[%s6926_s26 + $0x50c] ss:$48 sps:$4 sm:$0xff]  }
 0x1db   : > { %3381 = vmatmul.mubr.bf16.gmra.mrb[52].mxu1 %v6040_v55  ;;  %v6154_v55 = vld [vmem:[%s6926_s26 + $0x4f0] ss:$48 sps:$4 sm:$0xff]  }
 0x1dc   : > { %3960 = vmatmul.mubr.bf16.gmra.mrb[52].mxu0 %v6044_v56  ;;  %3390 = vmatprep.mubr.bf16.mxu1 %v6048_v57  ;;  %v6155_v56 = vld [vmem:[%s6926_s26 + $0x508] ss:$48 sps:$4 sm:$0xff]   ;;  %v6156_v57 = vld [vmem:[%s6926_s26 + $0x554] ss:$48 sps:$4 sm:$0xff]  }
 0x1dd   : > { %3969 = vmatprep.mubr.bf16.mxu0 %v6050_v58  ;;  %v6158_v58 = vld [vmem:[%s6926_s26 + $0x56c] ss:$48 sps:$4 sm:$0xff]  }
 0x1e3   : > { %3391 = vmatmul.mubr.bf16.gmra.mrb[56].mxu1 %v6052_v59  ;;  %v6160_v59 = vld [vmem:[%s6926_s26 + $0x550] ss:$48 sps:$4 sm:$0xff]  }
 0x1e4   : > { %3970 = vmatmul.mubr.bf16.gmra.mrb[56].mxu0 %v6056_v60  ;;  %3400 = vmatprep.mubr.bf16.mxu1 %v6060_v61  ;;  %v6161_v60 = vld [vmem:[%s6926_s26 + $0x568] ss:$48 sps:$4 sm:$0xff]   ;;  %v6162_v61 = vld [vmem:[%s6926_s26 + $0x5b4] ss:$48 sps:$4 sm:$0xff]  }
 0x1e5   : > { %3979 = vmatprep.mubr.bf16.mxu0 %v6062_v62  ;;  %v6164_v62 = vld [vmem:[%s6926_s26 + $0x5cc] ss:$48 sps:$4 sm:$0xff]  }
 0x1eb   : > { %3401 = vmatmul.mubr.bf16.gmra.mrb[60].mxu1 %v6064_v63  ;;  %v6166_v63 = vld [vmem:[%s6926_s26 + $0x5b0] ss:$48 sps:$4 sm:$0xff]  }
 0x1ec   : > { %3980 = vmatmul.mubr.bf16.gmra.mrb[60].mxu0 %v6068_v0  ;;  %3443 = vmatprep.mubr.bf16.mxu1 %v6074_v1  ;;  %v6167_v0 = vld [vmem:[%s6926_s26 + $0x5c8] ss:$48 sps:$4 sm:$0xff]  }
 0x1ed   : > { %4022 = vmatprep.mubr.bf16.mxu0 %v6077_v2  ;;  %v657_v2 = vld [vmem:[#allocation2] sm:$0xff] }
 0x1f3   : > { %3444 = vmatmul.mubr.bf16.vlgmr.msra.gmra.mrb[0].mxu1 %v6072_v3 }
 0x1f4   : > { %4023 = vmatmul.mubr.bf16.vlgmr.msra.gmra.mrb[0].mxu0 %v6075_v4  ;;  %3453 = vmatprep.mubr.bf16.mxu1 %v6078_v5 }
 0x1f5   : > { %4032 = vmatprep.mubr.bf16.mxu0 %v6080_v6  ;;  %v658_v6 = vld [vmem:[#allocation2 + $0x8] sm:$0xff] }
 0x1fb   : > { %3454 = vmatmul.mubr.bf16.gmra.mrb[4].mxu1 %v6082_v7 }
 0x1fc   : > { %4033 = vmatmul.mubr.bf16.gmra.mrb[4].mxu0 %v6083_v8  ;;  %3463 = vmatprep.mubr.bf16.mxu1 %v6084_v9 }
 0x1fd   : > { %4042 = vmatprep.mubr.bf16.mxu0 %v6086_v10  ;;  %v659_v10 = vld [vmem:[#allocation2 + $0x10] sm:$0xff] }
 0x203   : > { %3464 = vmatmul.mubr.bf16.gmra.mrb[8].mxu1 %v6088_v11 }
 0x204   : > { %4043 = vmatmul.mubr.bf16.gmra.mrb[8].mxu0 %v6089_v12  ;;  %3473 = vmatprep.mubr.bf16.mxu1 %v6090_v13 }
 0x205   : > { %4052 = vmatprep.mubr.bf16.mxu0 %v6092_v14 }
 0x20b   : > { %3474 = vmatmul.mubr.bf16.gmra.mrb[12].mxu1 %v6094_v15  ;;  %v660_v15 = vld [vmem:[#allocation2 + $0x18] sm:$0xff] }
 0x20c   : > { %4053 = vmatmul.mubr.bf16.gmra.mrb[12].mxu0 %v6095_v16  ;;  %3483 = vmatprep.mubr.bf16.mxu1 %v6096_v17 }
 0x20d   : > { %4062 = vmatprep.mubr.bf16.mxu0 %v6098_v18 }
 0x213   : > { %3484 = vmatmul.mubr.bf16.gmra.mrb[16].mxu1 %v6100_v19 }
 0x214   : > { %4063 = vmatmul.mubr.bf16.gmra.mrb[16].mxu0 %v6101_v20  ;;  %3493 = vmatprep.mubr.bf16.mxu1 %v6102_v21 }
 0x215   : > { %4072 = vmatprep.mubr.bf16.mxu0 %v6104_v22  ;;  %v661_v22 = vld [vmem:[#allocation2 + $0x20] sm:$0xff] }
 0x21b   : > { %3494 = vmatmul.mubr.bf16.gmra.mrb[20].mxu1 %v6106_v23 }
 0x21c   : > { %4073 = vmatmul.mubr.bf16.gmra.mrb[20].mxu0 %v6107_v24  ;;  %3503 = vmatprep.mubr.bf16.mxu1 %v6108_v25 }
 0x21d   : > { %4082 = vmatprep.mubr.bf16.mxu0 %v6110_v26  ;;  %v662_v26 = vld [vmem:[#allocation2 + $0x28] sm:$0xff] }
 0x223   : > { %3504 = vmatmul.mubr.bf16.gmra.mrb[24].mxu1 %v6112_v27 }
 0x224   : > { %4083 = vmatmul.mubr.bf16.gmra.mrb[24].mxu0 %v6113_v28  ;;  %3513 = vmatprep.mubr.bf16.mxu1 %v6114_v29 }
 0x225   : > { %4092 = vmatprep.mubr.bf16.mxu0 %v6116_v30  ;;  %v663_v30 = vld [vmem:[#allocation2 + $0x30] sm:$0xff] }
 0x22b   : > { %3514 = vmatmul.mubr.bf16.gmra.mrb[28].mxu1 %v6118_v31 }
 0x22c   : > { %4093 = vmatmul.mubr.bf16.gmra.mrb[28].mxu0 %v6119_v32  ;;  %3523 = vmatprep.mubr.bf16.mxu1 %v6120_v33 }
 0x22d   : > { %4102 = vmatprep.mubr.bf16.mxu0 %v6122_v34 }
 0x233   : > { %3524 = vmatmul.mubr.bf16.gmra.mrb[32].mxu1 %v6124_v35  ;;  %v664_v35 = vld [vmem:[#allocation2 + $0x38] sm:$0xff] }
 0x234   : > { %4103 = vmatmul.mubr.bf16.gmra.mrb[32].mxu0 %v6125_v36  ;;  %3533 = vmatprep.mubr.bf16.mxu1 %v6126_v37 }
 0x235   : > { %4112 = vmatprep.mubr.bf16.mxu0 %v6128_v38 }
 0x23b   : > { %3534 = vmatmul.mubr.bf16.gmra.mrb[36].mxu1 %v6130_v39 }
 0x23c   : > { %4113 = vmatmul.mubr.bf16.gmra.mrb[36].mxu0 %v6131_v40  ;;  %3543 = vmatprep.mubr.bf16.mxu1 %v6132_v41 }
 0x23d   : > { %4122 = vmatprep.mubr.bf16.mxu0 %v6134_v42  ;;  %v665_v42 = vld [vmem:[#allocation2 + $0x40] sm:$0xff] }
 0x243   : > { %3544 = vmatmul.mubr.bf16.gmra.mrb[40].mxu1 %v6136_v43 }
 0x244   : > { %4123 = vmatmul.mubr.bf16.gmra.mrb[40].mxu0 %v6137_v44  ;;  %3553 = vmatprep.mubr.bf16.mxu1 %v6138_v45 }
 0x245   : > { %4132 = vmatprep.mubr.bf16.mxu0 %v6140_v46  ;;  %v666_v46 = vld [vmem:[#allocation2 + $0x48] sm:$0xff] }
 0x24b   : > { %3554 = vmatmul.mubr.bf16.gmra.mrb[44].mxu1 %v6142_v47 }
 0x24c   : > { %4133 = vmatmul.mubr.bf16.gmra.mrb[44].mxu0 %v6143_v48  ;;  %3563 = vmatprep.mubr.bf16.mxu1 %v6144_v49 }
 0x24d   : > { %4142 = vmatprep.mubr.bf16.mxu0 %v6146_v50  ;;  %v667_v50 = vld [vmem:[#allocation2 + $0x50] sm:$0xff] }
 0x253   : > { %3564 = vmatmul.mubr.bf16.gmra.mrb[48].mxu1 %v6148_v51 }
 0x254   : > { %4143 = vmatmul.mubr.bf16.gmra.mrb[48].mxu0 %v6149_v52  ;;  %3573 = vmatprep.mubr.bf16.mxu1 %v6150_v53 }
 0x255   : > { %4152 = vmatprep.mubr.bf16.mxu0 %v6152_v54 }
 0x25b   : > { %3574 = vmatmul.mubr.bf16.gmra.mrb[52].mxu1 %v6154_v55  ;;  %v668_v55 = vld [vmem:[#allocation2 + $0x58] sm:$0xff] }
 0x25c   : > { %4153 = vmatmul.mubr.bf16.gmra.mrb[52].mxu0 %v6155_v56  ;;  %3583 = vmatprep.mubr.bf16.mxu1 %v6156_v57 }
 0x25d   : > { %4162 = vmatprep.mubr.bf16.mxu0 %v6158_v58 }
 0x263   : > { %3584 = vmatmul.mubr.bf16.gmra.mrb[56].mxu1 %v6160_v59 }
 0x264   : > { %4163 = vmatmul.mubr.bf16.gmra.mrb[56].mxu0 %v6161_v60  ;;  %3593 = vmatprep.mubr.bf16.mxu1 %v6162_v61 }
 0x265   : > { %4172 = vmatprep.mubr.bf16.mxu0 %v6164_v62  ;;  %v669_v62 = vld [vmem:[#allocation2 + $0x60] sm:$0xff] }
 0x26b   : > { %3594 = vmatmul.mubr.bf16.gmra.mrb[60].mxu1 %v6166_v63 }
 0x26c   : > { %4173 = vmatmul.mubr.bf16.gmra.mrb[60].mxu0 %v6167_v0 }
 0x2c6   : > { %v3445_v1 = vpop.f32.mrb[0].mxu1 }
 0x2c7   : > { %v4024_v3 = vpop.f32.mrb[0].mxu0  ;;  %v3447_v5 = vpop.f32.mrb[1].mxu1 }
 0x2c8   : > { %v5179_v4 = vadd.f32 %v4024_v3, %v3445_v1  ;;  %v4026_v7 = vpop.f32.mrb[1].mxu0  ;;  %v3449_v9 = vpop.f32.mrb[2].mxu1 }
 0x2c9   : > { %v5180_v8 = vadd.f32 %v4026_v7, %v3447_v5  ;;  %v4028_v11 = vpop.f32.mrb[2].mxu0  ;;  %v3451_v14 = vpop.f32.mrb[3].mxu1 }
 0x2ca   : > { %v4183_v12 = vadd.f32 %v5179_v4, %v657_v2  ;;  %v5181_v13 = vadd.f32 %v4028_v11, %v3449_v9  ;;  %v4030_v16 = vpop.f32.mrb[3].mxu0  ;;  %v670_v2 = vld [vmem:[#allocation2 + $0x68] sm:$0xff]  ;;  %v672_v11 = vld [vmem:[#allocation2 + $0x78] sm:$0xff] }
 0x2cb   : > { %v4184_v17 = vadd.f32 %v5180_v8, %v658_v6  ;;  %v5182_v18 = vadd.f32 %v4030_v16, %v3451_v14  ;;  %v671_v6 = vld [vmem:[#allocation2 + $0x70] sm:$0xff] }
 0x2cc   : > { %4247 = vst [vmem:[#allocation2] sm:$0xff] %v4183_v12  ;;  %v4185_v19 = vadd.f32 %v5181_v13, %v659_v10 }
 0x2cd   : > { %4248 = vst [vmem:[#allocation2 + $0x8] sm:$0xff] %v4184_v17  ;;  %v4186_v20 = vadd.f32 %v5182_v18, %v660_v15  ;;  %v673_v18 = vld [vmem:[#allocation2 + $0x80] sm:$0xff] }
 0x2ce   : > { %4249 = vst [vmem:[#allocation2 + $0x10] sm:$0xff] %v4185_v19  ;;  %v3455_v21 = vpop.f32.mrb[4].mxu1 }
 0x2cf   : > { %4250 = vst [vmem:[#allocation2 + $0x18] sm:$0xff] %v4186_v20  ;;  %v4034_v23 = vpop.f32.mrb[4].mxu0  ;;  %v3457_v25 = vpop.f32.mrb[5].mxu1 }
 0x2d0   : > { %v5183_v24 = vadd.f32 %v4034_v23, %v3455_v21  ;;  %v4036_v27 = vpop.f32.mrb[5].mxu0  ;;  %v3459_v29 = vpop.f32.mrb[6].mxu1 }
 0x2d1   : > { %v5184_v28 = vadd.f32 %v4036_v27, %v3457_v25  ;;  %v4038_v31 = vpop.f32.mrb[6].mxu0  ;;  %v3461_v34 = vpop.f32.mrb[7].mxu1 }
 0x2d2   : > { %v4187_v32 = vadd.f32 %v5183_v24, %v661_v22  ;;  %v5185_v33 = vadd.f32 %v4038_v31, %v3459_v29  ;;  %v4040_v36 = vpop.f32.mrb[7].mxu0  ;;  %v674_v22 = vld [vmem:[#allocation2 + $0x88] sm:$0xff]  ;;  %v676_v31 = vld [vmem:[#allocation2 + $0x98] sm:$0xff] }
 0x2d3   : > { %v4188_v37 = vadd.f32 %v5184_v28, %v662_v26  ;;  %v5186_v38 = vadd.f32 %v4040_v36, %v3461_v34  ;;  %v675_v26 = vld [vmem:[#allocation2 + $0x90] sm:$0xff] }
 0x2d4   : > { %4251 = vst [vmem:[#allocation2 + $0x20] sm:$0xff] %v4187_v32  ;;  %v4189_v39 = vadd.f32 %v5185_v33, %v663_v30 }
 0x2d5   : > { %4252 = vst [vmem:[#allocation2 + $0x28] sm:$0xff] %v4188_v37  ;;  %v4190_v40 = vadd.f32 %v5186_v38, %v664_v35  ;;  %v677_v38 = vld [vmem:[#allocation2 + $0xa0] sm:$0xff] }
 0x2d6   : > { %4253 = vst [vmem:[#allocation2 + $0x30] sm:$0xff] %v4189_v39  ;;  %v3465_v41 = vpop.f32.mrb[8].mxu1 }
 0x2d7   : > { %4254 = vst [vmem:[#allocation2 + $0x38] sm:$0xff] %v4190_v40  ;;  %v4044_v43 = vpop.f32.mrb[8].mxu0  ;;  %v3467_v45 = vpop.f32.mrb[9].mxu1 }
 0x2d8   : > { %v5187_v44 = vadd.f32 %v4044_v43, %v3465_v41  ;;  %v4046_v47 = vpop.f32.mrb[9].mxu0  ;;  %v3469_v49 = vpop.f32.mrb[10].mxu1 }
 0x2d9   : > { %v5188_v48 = vadd.f32 %v4046_v47, %v3467_v45  ;;  %v4048_v51 = vpop.f32.mrb[10].mxu0  ;;  %v3471_v54 = vpop.f32.mrb[11].mxu1 }
 0x2da   : > { %v4191_v52 = vadd.f32 %v5187_v44, %v665_v42  ;;  %v5189_v53 = vadd.f32 %v4048_v51, %v3469_v49  ;;  %v4050_v56 = vpop.f32.mrb[11].mxu0  ;;  %v678_v42 = vld [vmem:[#allocation2 + $0xa8] sm:$0xff]  ;;  %v680_v51 = vld [vmem:[#allocation2 + $0xb8] sm:$0xff] }
 0x2db   : > { %v4192_v57 = vadd.f32 %v5188_v48, %v666_v46  ;;  %v5190_v58 = vadd.f32 %v4050_v56, %v3471_v54  ;;  %v679_v46 = vld [vmem:[#allocation2 + $0xb0] sm:$0xff] }
 0x2dc   : > { %4255 = vst [vmem:[#allocation2 + $0x40] sm:$0xff] %v4191_v52  ;;  %v4193_v59 = vadd.f32 %v5189_v53, %v667_v50 }
 0x2dd   : > { %4256 = vst [vmem:[#allocation2 + $0x48] sm:$0xff] %v4192_v57  ;;  %v4194_v60 = vadd.f32 %v5190_v58, %v668_v55  ;;  %v681_v58 = vld [vmem:[#allocation2 + $0xc0] sm:$0xff] }
 0x2de   : > { %4257 = vst [vmem:[#allocation2 + $0x50] sm:$0xff] %v4193_v59  ;;  %v3475_v61 = vpop.f32.mrb[12].mxu1 }
 0x2df   : > { %4258 = vst [vmem:[#allocation2 + $0x58] sm:$0xff] %v4194_v60  ;;  %v4054_v63 = vpop.f32.mrb[12].mxu0  ;;  %v3477_v1 = vpop.f32.mrb[13].mxu1 }
 0x2e0   : > { %v5191_v0 = vadd.f32 %v4054_v63, %v3475_v61  ;;  %v4056_v3 = vpop.f32.mrb[13].mxu0  ;;  %v3479_v5 = vpop.f32.mrb[14].mxu1 }
 0x2e1   : > { %v5192_v4 = vadd.f32 %v4056_v3, %v3477_v1  ;;  %v4058_v7 = vpop.f32.mrb[14].mxu0  ;;  %v3481_v10 = vpop.f32.mrb[15].mxu1 }
 0x2e2   : > { %v4195_v8 = vadd.f32 %v5191_v0, %v669_v62  ;;  %v5193_v9 = vadd.f32 %v4058_v7, %v3479_v5  ;;  %v4060_v12 = vpop.f32.mrb[15].mxu0  ;;  %v682_v62 = vld [vmem:[#allocation2 + $0xc8] sm:$0xff]  ;;  %v684_v7 = vld [vmem:[#allocation2 + $0xd8] sm:$0xff] }
 0x2e3   : > { %v4196_v13 = vadd.f32 %v5192_v4, %v670_v2  ;;  %v5194_v14 = vadd.f32 %v4060_v12, %v3481_v10  ;;  %v683_v2 = vld [vmem:[#allocation2 + $0xd0] sm:$0xff] }
 0x2e4   : > { %4259 = vst [vmem:[#allocation2 + $0x60] sm:$0xff] %v4195_v8  ;;  %v4197_v15 = vadd.f32 %v5193_v9, %v671_v6 }
 0x2e5   : > { %4260 = vst [vmem:[#allocation2 + $0x68] sm:$0xff] %v4196_v13  ;;  %v4198_v16 = vadd.f32 %v5194_v14, %v672_v11  ;;  %v685_v14 = vld [vmem:[#allocation2 + $0xe0] sm:$0xff] }
 0x2e6   : > { %4261 = vst [vmem:[#allocation2 + $0x70] sm:$0xff] %v4197_v15  ;;  %v3485_v17 = vpop.f32.mrb[16].mxu1 }
 0x2e7   : > { %4262 = vst [vmem:[#allocation2 + $0x78] sm:$0xff] %v4198_v16  ;;  %v4064_v19 = vpop.f32.mrb[16].mxu0  ;;  %v3487_v21 = vpop.f32.mrb[17].mxu1 }
 0x2e8   : > { %v5195_v20 = vadd.f32 %v4064_v19, %v3485_v17  ;;  %v4066_v23 = vpop.f32.mrb[17].mxu0  ;;  %v3489_v25 = vpop.f32.mrb[18].mxu1 }
 0x2e9   : > { %v5196_v24 = vadd.f32 %v4066_v23, %v3487_v21  ;;  %v4068_v27 = vpop.f32.mrb[18].mxu0  ;;  %v3491_v30 = vpop.f32.mrb[19].mxu1 }
 0x2ea   : > { %v4199_v28 = vadd.f32 %v5195_v20, %v673_v18  ;;  %v5197_v29 = vadd.f32 %v4068_v27, %v3489_v25  ;;  %v4070_v32 = vpop.f32.mrb[19].mxu0  ;;  %v686_v18 = vld [vmem:[#allocation2 + $0xe8] sm:$0xff]  ;;  %v688_v27 = vld [vmem:[#allocation2 + $0xf8] sm:$0xff] }
 0x2eb   : > { %v4200_v33 = vadd.f32 %v5196_v24, %v674_v22  ;;  %v5198_v34 = vadd.f32 %v4070_v32, %v3491_v30  ;;  %v687_v22 = vld [vmem:[#allocation2 + $0xf0] sm:$0xff] }
 0x2ec   : > { %4263 = vst [vmem:[#allocation2 + $0x80] sm:$0xff] %v4199_v28  ;;  %v4201_v35 = vadd.f32 %v5197_v29, %v675_v26 }
 0x2ed   : > { %4264 = vst [vmem:[#allocation2 + $0x88] sm:$0xff] %v4200_v33  ;;  %v4202_v36 = vadd.f32 %v5198_v34, %v676_v31  ;;  %v689_v34 = vld [vmem:[#allocation2 + $0x100] sm:$0xff] }
 0x2ee   : > { %4265 = vst [vmem:[#allocation2 + $0x90] sm:$0xff] %v4201_v35  ;;  %v3495_v37 = vpop.f32.mrb[20].mxu1 }
 0x2ef   : > { %4266 = vst [vmem:[#allocation2 + $0x98] sm:$0xff] %v4202_v36  ;;  %v4074_v39 = vpop.f32.mrb[20].mxu0  ;;  %v3497_v41 = vpop.f32.mrb[21].mxu1 }
 0x2f0   : > { %v5199_v40 = vadd.f32 %v4074_v39, %v3495_v37  ;;  %v4076_v43 = vpop.f32.mrb[21].mxu0  ;;  %v3499_v45 = vpop.f32.mrb[22].mxu1 }
 0x2f1   : > { %v5200_v44 = vadd.f32 %v4076_v43, %v3497_v41  ;;  %v4078_v47 = vpop.f32.mrb[22].mxu0  ;;  %v3501_v50 = vpop.f32.mrb[23].mxu1 }
 0x2f2   : > { %v4203_v48 = vadd.f32 %v5199_v40, %v677_v38  ;;  %v5201_v49 = vadd.f32 %v4078_v47, %v3499_v45  ;;  %v4080_v52 = vpop.f32.mrb[23].mxu0  ;;  %v690_v38 = vld [vmem:[#allocation2 + $0x108] sm:$0xff]  ;;  %v692_v47 = vld [vmem:[#allocation2 + $0x118] sm:$0xff] }
 0x2f3   : > { %v4204_v53 = vadd.f32 %v5200_v44, %v678_v42  ;;  %v5202_v54 = vadd.f32 %v4080_v52, %v3501_v50  ;;  %v691_v42 = vld [vmem:[#allocation2 + $0x110] sm:$0xff] }
 0x2f4   : > { %4267 = vst [vmem:[#allocation2 + $0xa0] sm:$0xff] %v4203_v48  ;;  %v4205_v55 = vadd.f32 %v5201_v49, %v679_v46 }
 0x2f5   : > { %4268 = vst [vmem:[#allocation2 + $0xa8] sm:$0xff] %v4204_v53  ;;  %v4206_v56 = vadd.f32 %v5202_v54, %v680_v51  ;;  %v693_v54 = vld [vmem:[#allocation2 + $0x120] sm:$0xff] }
 0x2f6   : > { %4269 = vst [vmem:[#allocation2 + $0xb0] sm:$0xff] %v4205_v55  ;;  %v3505_v57 = vpop.f32.mrb[24].mxu1 }
 0x2f7   : > { %4270 = vst [vmem:[#allocation2 + $0xb8] sm:$0xff] %v4206_v56  ;;  %v4084_v59 = vpop.f32.mrb[24].mxu0  ;;  %v3507_v61 = vpop.f32.mrb[25].mxu1 }
 0x2f8   : > { %v5203_v60 = vadd.f32 %v4084_v59, %v3505_v57  ;;  %v4086_v63 = vpop.f32.mrb[25].mxu0  ;;  %v3509_v1 = vpop.f32.mrb[26].mxu1 }
 0x2f9   : > { %v5204_v0 = vadd.f32 %v4086_v63, %v3507_v61  ;;  %v4088_v3 = vpop.f32.mrb[26].mxu0  ;;  %v3511_v6 = vpop.f32.mrb[27].mxu1 }
 0x2fa   : > { %v4207_v4 = vadd.f32 %v5203_v60, %v681_v58  ;;  %v5205_v5 = vadd.f32 %v4088_v3, %v3509_v1  ;;  %v4090_v8 = vpop.f32.mrb[27].mxu0  ;;  %v694_v58 = vld [vmem:[#allocation2 + $0x128] sm:$0xff]  ;;  %v696_v3 = vld [vmem:[#allocation2 + $0x138] sm:$0xff] }
 0x2fb   : > { %v4208_v9 = vadd.f32 %v5204_v0, %v682_v62  ;;  %v5206_v10 = vadd.f32 %v4090_v8, %v3511_v6  ;;  %v695_v62 = vld [vmem:[#allocation2 + $0x130] sm:$0xff] }
 0x2fc   : > { %4271 = vst [vmem:[#allocation2 + $0xc0] sm:$0xff] %v4207_v4  ;;  %v4209_v11 = vadd.f32 %v5205_v5, %v683_v2 }
 0x2fd   : > { %4272 = vst [vmem:[#allocation2 + $0xc8] sm:$0xff] %v4208_v9  ;;  %v4210_v12 = vadd.f32 %v5206_v10, %v684_v7  ;;  %v697_v10 = vld [vmem:[#allocation2 + $0x140] sm:$0xff] }
 0x2fe   : > { %4273 = vst [vmem:[#allocation2 + $0xd0] sm:$0xff] %v4209_v11  ;;  %v3515_v13 = vpop.f32.mrb[28].mxu1 }
 0x2ff   : > { %4274 = vst [vmem:[#allocation2 + $0xd8] sm:$0xff] %v4210_v12  ;;  %v4094_v15 = vpop.f32.mrb[28].mxu0  ;;  %v3517_v17 = vpop.f32.mrb[29].mxu1 }
 0x300   : > { %v5207_v16 = vadd.f32 %v4094_v15, %v3515_v13  ;;  %v4096_v19 = vpop.f32.mrb[29].mxu0  ;;  %v3519_v21 = vpop.f32.mrb[30].mxu1 }
 0x301   : > { %v5208_v20 = vadd.f32 %v4096_v19, %v3517_v17  ;;  %v4098_v23 = vpop.f32.mrb[30].mxu0  ;;  %v3521_v26 = vpop.f32.mrb[31].mxu1 }
 0x302   : > { %v4211_v24 = vadd.f32 %v5207_v16, %v685_v14  ;;  %v5209_v25 = vadd.f32 %v4098_v23, %v3519_v21  ;;  %v4100_v28 = vpop.f32.mrb[31].mxu0  ;;  %v698_v14 = vld [vmem:[#allocation2 + $0x148] sm:$0xff]  ;;  %v700_v23 = vld [vmem:[#allocation2 + $0x158] sm:$0xff] }
 0x303   : > { %v4212_v29 = vadd.f32 %v5208_v20, %v686_v18  ;;  %v5210_v30 = vadd.f32 %v4100_v28, %v3521_v26  ;;  %v699_v18 = vld [vmem:[#allocation2 + $0x150] sm:$0xff] }
 0x304   : > { %4275 = vst [vmem:[#allocation2 + $0xe0] sm:$0xff] %v4211_v24  ;;  %v4213_v31 = vadd.f32 %v5209_v25, %v687_v22 }
 0x305   : > { %4276 = vst [vmem:[#allocation2 + $0xe8] sm:$0xff] %v4212_v29  ;;  %v4214_v32 = vadd.f32 %v5210_v30, %v688_v27  ;;  %v701_v30 = vld [vmem:[#allocation2 + $0x160] sm:$0xff] }
 0x306   : > { %4277 = vst [vmem:[#allocation2 + $0xf0] sm:$0xff] %v4213_v31  ;;  %v3525_v33 = vpop.f32.mrb[32].mxu1 }
 0x307   : > { %4278 = vst [vmem:[#allocation2 + $0xf8] sm:$0xff] %v4214_v32  ;;  %v4104_v35 = vpop.f32.mrb[32].mxu0  ;;  %v3527_v37 = vpop.f32.mrb[33].mxu1 }
 0x308   : > { %v5211_v36 = vadd.f32 %v4104_v35, %v3525_v33  ;;  %v4106_v39 = vpop.f32.mrb[33].mxu0  ;;  %v3529_v41 = vpop.f32.mrb[34].mxu1 }
 0x309   : > { %v5212_v40 = vadd.f32 %v4106_v39, %v3527_v37  ;;  %v4108_v43 = vpop.f32.mrb[34].mxu0  ;;  %v3531_v46 = vpop.f32.mrb[35].mxu1 }
 0x30a   : > { %v4215_v44 = vadd.f32 %v5211_v36, %v689_v34  ;;  %v5213_v45 = vadd.f32 %v4108_v43, %v3529_v41  ;;  %v4110_v48 = vpop.f32.mrb[35].mxu0  ;;  %v702_v34 = vld [vmem:[#allocation2 + $0x168] sm:$0xff]  ;;  %v704_v43 = vld [vmem:[#allocation2 + $0x178] sm:$0xff] }
 0x30b   : > { %v4216_v49 = vadd.f32 %v5212_v40, %v690_v38  ;;  %v5214_v50 = vadd.f32 %v4110_v48, %v3531_v46  ;;  %v703_v38 = vld [vmem:[#allocation2 + $0x170] sm:$0xff] }
 0x30c   : > { %4279 = vst [vmem:[#allocation2 + $0x100] sm:$0xff] %v4215_v44  ;;  %v4217_v51 = vadd.f32 %v5213_v45, %v691_v42 }
 0x30d   : > { %4280 = vst [vmem:[#allocation2 + $0x108] sm:$0xff] %v4216_v49  ;;  %v4218_v52 = vadd.f32 %v5214_v50, %v692_v47  ;;  %v705_v50 = vld [vmem:[#allocation2 + $0x180] sm:$0xff] }
 0x30e   : > { %4281 = vst [vmem:[#allocation2 + $0x110] sm:$0xff] %v4217_v51  ;;  %v3535_v53 = vpop.f32.mrb[36].mxu1 }
 0x30f   : > { %4282 = vst [vmem:[#allocation2 + $0x118] sm:$0xff] %v4218_v52  ;;  %v4114_v55 = vpop.f32.mrb[36].mxu0  ;;  %v3537_v57 = vpop.f32.mrb[37].mxu1 }
 0x310   : > { %v5215_v56 = vadd.f32 %v4114_v55, %v3535_v53  ;;  %v4116_v59 = vpop.f32.mrb[37].mxu0  ;;  %v3539_v61 = vpop.f32.mrb[38].mxu1 }
 0x311   : > { %v5216_v60 = vadd.f32 %v4116_v59, %v3537_v57  ;;  %v4118_v63 = vpop.f32.mrb[38].mxu0  ;;  %v3541_v2 = vpop.f32.mrb[39].mxu1 }
 0x312   : > { %v4219_v0 = vadd.f32 %v5215_v56, %v693_v54  ;;  %v5217_v1 = vadd.f32 %v4118_v63, %v3539_v61  ;;  %v4120_v4 = vpop.f32.mrb[39].mxu0  ;;  %v706_v54 = vld [vmem:[#allocation2 + $0x188] sm:$0xff]  ;;  %v708_v63 = vld [vmem:[#allocation2 + $0x198] sm:$0xff] }
 0x313   : > { %v4220_v5 = vadd.f32 %v5216_v60, %v694_v58  ;;  %v5218_v6 = vadd.f32 %v4120_v4, %v3541_v2  ;;  %v707_v58 = vld [vmem:[#allocation2 + $0x190] sm:$0xff] }
 0x314   : > { %4283 = vst [vmem:[#allocation2 + $0x120] sm:$0xff] %v4219_v0  ;;  %v4221_v7 = vadd.f32 %v5217_v1, %v695_v62 }
 0x315   : > { %4284 = vst [vmem:[#allocation2 + $0x128] sm:$0xff] %v4220_v5  ;;  %v4222_v8 = vadd.f32 %v5218_v6, %v696_v3  ;;  %v709_v6 = vld [vmem:[#allocation2 + $0x1a0] sm:$0xff] }
 0x316   : > { %4285 = vst [vmem:[#allocation2 + $0x130] sm:$0xff] %v4221_v7  ;;  %v3545_v9 = vpop.f32.mrb[40].mxu1 }
 0x317   : > { %4286 = vst [vmem:[#allocation2 + $0x138] sm:$0xff] %v4222_v8  ;;  %v4124_v11 = vpop.f32.mrb[40].mxu0  ;;  %v3547_v13 = vpop.f32.mrb[41].mxu1 }
 0x318   : > { %v5219_v12 = vadd.f32 %v4124_v11, %v3545_v9  ;;  %v4126_v15 = vpop.f32.mrb[41].mxu0  ;;  %v3549_v17 = vpop.f32.mrb[42].mxu1 }
 0x319   : > { %v5220_v16 = vadd.f32 %v4126_v15, %v3547_v13  ;;  %v4128_v19 = vpop.f32.mrb[42].mxu0  ;;  %v3551_v22 = vpop.f32.mrb[43].mxu1 }
 0x31a   : > { %v4223_v20 = vadd.f32 %v5219_v12, %v697_v10  ;;  %v5221_v21 = vadd.f32 %v4128_v19, %v3549_v17  ;;  %v4130_v24 = vpop.f32.mrb[43].mxu0  ;;  %v710_v10 = vld [vmem:[#allocation2 + $0x1a8] sm:$0xff]  ;;  %v712_v19 = vld [vmem:[#allocation2 + $0x1b8] sm:$0xff] }
 0x31b   : > { %v4224_v25 = vadd.f32 %v5220_v16, %v698_v14  ;;  %v5222_v26 = vadd.f32 %v4130_v24, %v3551_v22  ;;  %v711_v14 = vld [vmem:[#allocation2 + $0x1b0] sm:$0xff] }
 0x31c   : > { %4287 = vst [vmem:[#allocation2 + $0x140] sm:$0xff] %v4223_v20  ;;  %v4225_v27 = vadd.f32 %v5221_v21, %v699_v18 }
 0x31d   : > { %4288 = vst [vmem:[#allocation2 + $0x148] sm:$0xff] %v4224_v25  ;;  %v4226_v28 = vadd.f32 %v5222_v26, %v700_v23  ;;  %v713_v26 = vld [vmem:[#allocation2 + $0x1c0] sm:$0xff] }
 0x31e   : > { %4289 = vst [vmem:[#allocation2 + $0x150] sm:$0xff] %v4225_v27  ;;  %v3555_v29 = vpop.f32.mrb[44].mxu1 }
 0x31f   : > { %4290 = vst [vmem:[#allocation2 + $0x158] sm:$0xff] %v4226_v28  ;;  %v4134_v31 = vpop.f32.mrb[44].mxu0  ;;  %v3557_v33 = vpop.f32.mrb[45].mxu1 }
 0x320   : > { %v5223_v32 = vadd.f32 %v4134_v31, %v3555_v29  ;;  %v4136_v35 = vpop.f32.mrb[45].mxu0  ;;  %v3559_v37 = vpop.f32.mrb[46].mxu1 }
 0x321   : > { %v5224_v36 = vadd.f32 %v4136_v35, %v3557_v33  ;;  %v4138_v39 = vpop.f32.mrb[46].mxu0  ;;  %v3561_v42 = vpop.f32.mrb[47].mxu1 }
 0x322   : > { %v4227_v40 = vadd.f32 %v5223_v32, %v701_v30  ;;  %v5225_v41 = vadd.f32 %v4138_v39, %v3559_v37  ;;  %v4140_v44 = vpop.f32.mrb[47].mxu0  ;;  %v714_v30 = vld [vmem:[#allocation2 + $0x1c8] sm:$0xff]  ;;  %v716_v39 = vld [vmem:[#allocation2 + $0x1d8] sm:$0xff] }
 0x323   : > { %v4228_v45 = vadd.f32 %v5224_v36, %v702_v34  ;;  %v5226_v46 = vadd.f32 %v4140_v44, %v3561_v42  ;;  %v715_v34 = vld [vmem:[#allocation2 + $0x1d0] sm:$0xff] }
 0x324   : > { %4291 = vst [vmem:[#allocation2 + $0x160] sm:$0xff] %v4227_v40  ;;  %v4229_v47 = vadd.f32 %v5225_v41, %v703_v38 }
 0x325   : > { %4292 = vst [vmem:[#allocation2 + $0x168] sm:$0xff] %v4228_v45  ;;  %v4230_v48 = vadd.f32 %v5226_v46, %v704_v43  ;;  %v717_v46 = vld [vmem:[#allocation2 + $0x1e0] sm:$0xff] }
 0x326   : > { %4293 = vst [vmem:[#allocation2 + $0x170] sm:$0xff] %v4229_v47  ;;  %v3565_v49 = vpop.f32.mrb[48].mxu1 }
 0x327   : > { %4294 = vst [vmem:[#allocation2 + $0x178] sm:$0xff] %v4230_v48  ;;  %v4144_v51 = vpop.f32.mrb[48].mxu0  ;;  %v3567_v53 = vpop.f32.mrb[49].mxu1 }
 0x328   : > { %v5227_v52 = vadd.f32 %v4144_v51, %v3565_v49  ;;  %v4146_v55 = vpop.f32.mrb[49].mxu0  ;;  %v3569_v57 = vpop.f32.mrb[50].mxu1 }
 0x329   : > { %v5228_v56 = vadd.f32 %v4146_v55, %v3567_v53  ;;  %v4148_v59 = vpop.f32.mrb[50].mxu0  ;;  %v3571_v62 = vpop.f32.mrb[51].mxu1 }
 0x32a   : > { %v4231_v60 = vadd.f32 %v5227_v52, %v705_v50  ;;  %v5229_v61 = vadd.f32 %v4148_v59, %v3569_v57  ;;  %v4150_v0 = vpop.f32.mrb[51].mxu0  ;;  %v718_v50 = vld [vmem:[#allocation2 + $0x1e8] sm:$0xff]  ;;  %v720_v59 = vld [vmem:[#allocation2 + $0x1f8] sm:$0xff] }
 0x32b   : > { %v4232_v1 = vadd.f32 %v5228_v56, %v706_v54  ;;  %v5230_v2 = vadd.f32 %v4150_v0, %v3571_v62  ;;  %v719_v54 = vld [vmem:[#allocation2 + $0x1f0] sm:$0xff] }
 0x32c   : > { %4295 = vst [vmem:[#allocation2 + $0x180] sm:$0xff] %v4231_v60  ;;  %v4233_v3 = vadd.f32 %v5229_v61, %v707_v58 }
 0x32d   : > { %4296 = vst [vmem:[#allocation2 + $0x188] sm:$0xff] %v4232_v1  ;;  %v4234_v4 = vadd.f32 %v5230_v2, %v708_v63  ;;  %v4316_v1 = vld [vmem:[#allocation2 + $0x8] sm:$0xff] (!%p5139_p5) }
 0x32e   : > { %4297 = vst [vmem:[#allocation2 + $0x190] sm:$0xff] %v4233_v3  ;;  %v3575_v5 = vpop.f32.mrb[52].mxu1  ;;  %v5140_v2 = vmul.f32 (!%p5139_p5), -1.442695, %v4316_v1  ;;  %v4318_v3 = vld [vmem:[#allocation2 + $0x18] sm:$0xff] (!%p5139_p5) }
 0x32f   : > { %4298 = vst [vmem:[#allocation2 + $0x198] sm:$0xff] %v4234_v4  ;;  %v4154_v7 = vpop.f32.mrb[52].mxu0  ;;  %v3577_v9 = vpop.f32.mrb[53].mxu1  ;;  %v4320_v4 = vld [vmem:[#allocation2 + $0x28] sm:$0xff] (!%p5139_p5) }
 0x330   : > { %v5231_v8 = vadd.f32 %v4154_v7, %v3575_v5  ;;  %v4156_v11 = vpop.f32.mrb[53].mxu0  ;;  %v3579_v13 = vpop.f32.mrb[54].mxu1  ;;  %v5141_v5 = vmul.f32 (!%p5139_p5), -1.442695, %v4318_v3  ;;  %v4322_v7 = vld [vmem:[#allocation2 + $0x38] sm:$0xff] (!%p5139_p5)  ;;  %6168 = vpow2.f32 (!%p5139_p5), %v5140_v2  ;;  %v4321_v2 = vld [vmem:[#allocation2 + $0x30] sm:$0xff] (!%p5139_p5) }
 0x331   : > { %v5232_v12 = vadd.f32 %v4156_v11, %v3577_v9  ;;  %v4158_v15 = vpop.f32.mrb[54].mxu0  ;;  %v3581_v18 = vpop.f32.mrb[55].mxu1  ;;  %v4324_v9 = vld [vmem:[#allocation2 + $0x48] sm:$0xff] (!%p5139_p5)  ;;  %v4326_v11 = vld [vmem:[#allocation2 + $0x58] sm:$0xff] (!%p5139_p5) }
 0x332   : > { %v4235_v16 = vadd.f32 %v5231_v8, %v709_v6  ;;  %v5233_v17 = vadd.f32 %v4158_v15, %v3579_v13  ;;  %v4160_v20 = vpop.f32.mrb[55].mxu0  ;;  %v5142_v6 = vmul.f32 (!%p5139_p5), -1.442695, %v4320_v4  ;;  %v5143_v8 = vmul.f32 (!%p5139_p5), -1.442695, %v4322_v7  ;;  %v4330_v15 = vld [vmem:[#allocation2 + $0x78] sm:$0xff] (!%p5139_p5) }
 0x333   : > { %v4236_v21 = vadd.f32 %v5232_v12, %v710_v10  ;;  %v5234_v22 = vadd.f32 %v4160_v20, %v3581_v18  ;;  %6170 = vpow2.f32 (!%p5139_p5), %v5141_v5  ;;  %v5144_v10 = vmul.f32 (!%p5139_p5), -1.442695, %v4324_v9  ;;  %v4328_v12 = vld [vmem:[#allocation2 + $0x68] sm:$0xff] (!%p5139_p5)  ;;  %v4323_v7 = vld [vmem:[#allocation2 + $0x40] sm:$0xff] (!%p5139_p5)  ;;  %v4354_v9 = vld [vmem:[#allocation2 + $0x138] sm:$0xff] (!%p5139_p5) }
 0x334   : > { %4299 = vst [vmem:[#allocation2 + $0x1a0] sm:$0xff] %v4235_v16  ;;  %v4237_v23 = vadd.f32 %v5233_v17, %v711_v14  ;;  %6172 = vpow2.f32 (!%p5139_p5), %v5142_v6  ;;  %v5145_v13 = vmul.f32 (!%p5139_p5), -1.442695, %v4326_v11  ;;  %v5146_v14 = vmul.f32 (!%p5139_p5), -1.442695, %v4328_v12  ;;  %v4332_v17 = vld [vmem:[#allocation2 + $0x88] sm:$0xff] (!%p5139_p5) }
 0x335   : > { %4300 = vst [vmem:[#allocation2 + $0x1a8] sm:$0xff] %v4236_v21  ;;  %v4238_v24 = vadd.f32 %v5234_v22, %v712_v19  ;;  %6174 = vpow2.f32 (!%p5139_p5), %v5143_v8  ;;  %v5147_v16 = vmul.f32 (!%p5139_p5), -1.442695, %v4330_v15  ;;  %v5148_v18 = vmul.f32 (!%p5139_p5), -1.442695, %v4332_v17  ;;  %v4334_v19 = vld [vmem:[#allocation2 + $0x98] sm:$0xff] (!%p5139_p5) }
 0x336   : > { %4301 = vst [vmem:[#allocation2 + $0x1b0] sm:$0xff] %v4237_v23  ;;  %v3585_v25 = vpop.f32.mrb[56].mxu1  ;;  %6176 = vpow2.f32 (!%p5139_p5), %v5144_v10  ;;  %v4336_v20 = vld [vmem:[#allocation2 + $0xa8] sm:$0xff] (!%p5139_p5)  ;;  %v5149_v21 = vmul.f32 (!%p5139_p5), -1.442695, %v4334_v19  ;;  %v4338_v22 = vld [vmem:[#allocation2 + $0xb8] sm:$0xff] (!%p5139_p5) }
 0x337   : > { %4302 = vst [vmem:[#allocation2 + $0x1b8] sm:$0xff] %v4238_v24  ;;  %v4164_v27 = vpop.f32.mrb[56].mxu0  ;;  %v3587_v29 = vpop.f32.mrb[57].mxu1  ;;  %6178 = vpow2.f32 (!%p5139_p5), %v5145_v13  ;;  %v5150_v23 = vmul.f32 (!%p5139_p5), -1.442695, %v4336_v20  ;;  %v4340_v24 = vld [vmem:[#allocation2 + $0xc8] sm:$0xff] (!%p5139_p5) }
 0x338   : > { %v5235_v28 = vadd.f32 %v4164_v27, %v3585_v25  ;;  %v4166_v31 = vpop.f32.mrb[57].mxu0  ;;  %v3589_v33 = vpop.f32.mrb[58].mxu1  ;;  %6180 = vpow2.f32 (!%p5139_p5), %v5146_v14  ;;  %v5151_v25 = vmul.f32 (!%p5139_p5), -1.442695, %v4338_v22  ;;  %v4352_v4 = vld [vmem:[#allocation2 + $0x128] sm:$0xff] (!%p5139_p5)  ;;  %v4325_v12 = vld [vmem:[#allocation2 + $0x50] sm:$0xff] (!%p5139_p5) }
 0x339   : > { %v5236_v32 = vadd.f32 %v4166_v31, %v3587_v29  ;;  %v4168_v35 = vpop.f32.mrb[58].mxu0  ;;  %v3591_v38 = vpop.f32.mrb[59].mxu1  ;;  %6182 = vpow2.f32 (!%p5139_p5), %v5147_v16  ;;  %v4356_v14 = vld [vmem:[#allocation2 + $0x148] sm:$0xff] (!%p5139_p5)  ;;  %v4327_v17 = vld [vmem:[#allocation2 + $0x60] sm:$0xff] (!%p5139_p5)  ;;  %v4358_v19 = vld [vmem:[#allocation2 + $0x158] sm:$0xff] (!%p5139_p5) }
 0x33a   : > { %v4239_v36 = vadd.f32 %v5235_v28, %v713_v26  ;;  %v5237_v37 = vadd.f32 %v4168_v35, %v3589_v33  ;;  %v4170_v40 = vpop.f32.mrb[59].mxu0  ;;  %6184 = vpow2.f32 (!%p5139_p5), %v5148_v18  ;;  %v5152_v26 = vmul.f32 (!%p5139_p5), -1.442695, %v4340_v24  ;;  %v6169_v27 = vpop.eup (!%p5139_p5), %6168  ;;  %v4329_v22 = vld [vmem:[#allocation2 + $0x70] sm:$0xff] (!%p5139_p5)  ;;  %v4360_v24 = vld [vmem:[#allocation2 + $0x168] sm:$0xff] (!%p5139_p5) }
 0x33b   : > { %v4240_v41 = vadd.f32 %v5236_v32, %v714_v30  ;;  %v5238_v42 = vadd.f32 %v4170_v40, %v3591_v38  ;;  %6186 = vpow2.f32 (!%p5139_p5), %v5149_v21  ;;  %v4475_v29 = vadd.f32 (!%p5139_p5), 1.0, %v6169_v27  ;;  %v4331_v27 = vld [vmem:[#allocation2 + $0x80] sm:$0xff] (!%p5139_p5) }
 0x33c   : > { %4303 = vst [vmem:[#allocation2 + $0x1c0] sm:$0xff] %v4239_v36  ;;  %v4241_v43 = vadd.f32 %v5237_v37, %v715_v34  ;;  %6188 = vpow2.f32 (!%p5139_p5), %v5150_v23  ;;  %v5158_v18 = vmul.f32 (!%p5139_p5), -1.442695, %v4352_v4  ;;  %v5159_v23 = vmul.f32 (!%p5139_p5), -1.442695, %v4354_v9  ;;  %v4368_v9 = vld [vmem:[#allocation2 + $0x1a8] sm:$0xff] (!%p5139_p5) }
 0x33d   : > { %4304 = vst [vmem:[#allocation2 + $0x1c8] sm:$0xff] %v4240_v41  ;;  %v4242_v44 = vadd.f32 %v5238_v42, %v716_v39  ;;  %v6171_v28 = vpop.eup (!%p5139_p5), %6170  ;;  %6190 = vpow2.f32 (!%p5139_p5), %v5151_v25 }
 0x33e   : > { %4305 = vst [vmem:[#allocation2 + $0x1d0] sm:$0xff] %v4241_v43  ;;  %v3595_v45 = vpop.f32.mrb[60].mxu1  ;;  %v6173_v30 = vpop.eup (!%p5139_p5), %6172  ;;  %v4476_v31 = vadd.f32 (!%p5139_p5), 1.0, %v6171_v28  ;;  %6192 = vpow2.f32 (!%p5139_p5), %v5152_v26  ;;  %v5160_v28 = vmul.f32 (!%p5139_p5), -1.442695, %v4356_v14  ;;  %v4341_v14 = vld [vmem:[#allocation2 + $0xd0] sm:$0xff] (!%p5139_p5) }
 0x33f   : > { %4306 = vst [vmem:[#allocation2 + $0x1d8] sm:$0xff] %v4242_v44  ;;  %v4174_v47 = vpop.f32.mrb[60].mxu0  ;;  %v3597_v49 = vpop.f32.mrb[61].mxu1  ;;  %6194 = vrcp.f32 (!%p5139_p5), %v4475_v29  ;;  %v4477_v33 = vadd.f32 (!%p5139_p5), 1.0, %v6173_v30  ;;  %v4362_v29 = vld [vmem:[#allocation2 + $0x178] sm:$0xff] (!%p5139_p5) }
 0x340   : > { %v5239_v48 = vadd.f32 %v4174_v47, %v3595_v45  ;;  %v4176_v51 = vpop.f32.mrb[61].mxu0  ;;  %v3599_v53 = vpop.f32.mrb[62].mxu1  ;;  %6196 = vrcp.f32 (!%p5139_p5), %v4476_v31 }
 0x341   : > { %v5240_v52 = vadd.f32 %v4176_v51, %v3597_v49  ;;  %v4178_v55 = vpop.f32.mrb[62].mxu0  ;;  %v3601_v58 = vpop.f32.mrb[63].mxu1  ;;  %4314 = sbr.rel (%p5139_p5) target bundleno = 905 (0x389), region = 59  ;;  %6198 = vrcp.f32 (!%p5139_p5), %v4477_v33  ;;  %v4344_v49 = vld [vmem:[#allocation2 + $0xe8] sm:$0xff] (!%p5139_p5)  ;;  %v4315_v51 = vld [vmem:[#allocation2] sm:$0xff] (!%p5139_p5) }
 0x342   : > { %v4243_v56 = vadd.f32 %v5239_v48, %v717_v46  ;;  %v5241_v57 = vadd.f32 %v4178_v55, %v3599_v53  ;;  %v4180_v60 = vpop.f32.mrb[63].mxu0  ;;  %v6175_v32 = vpop.eup (!%p5139_p5), %6174  ;;  %v4342_v46 = vld [vmem:[#allocation2 + $0xd8] sm:$0xff] (!%p5139_p5)  ;;  %v4317_v55 = vld [vmem:[#allocation2 + $0x10] sm:$0xff] (!%p5139_p5)  ;;  %v5161_v33 = vmul.f32 (!%p5139_p5), -1.442695, %v4358_v19 }
 0x343   : > { %v4244_v61 = vadd.f32 %v5240_v52, %v718_v50  ;;  %v5242_v62 = vadd.f32 %v4180_v60, %v3601_v58  ;;  %v6177_v34 = vpop.eup (!%p5139_p5), %6176  ;;  %v4478_v35 = vadd.f32 (!%p5139_p5), 1.0, %v6175_v32  ;;  %v4346_v53 = vld [vmem:[#allocation2 + $0xf8] sm:$0xff] (!%p5139_p5)  ;;  %v4348_v58 = vld [vmem:[#allocation2 + $0x108] sm:$0xff] (!%p5139_p5)  ;;  %v4319_v60 = vld [vmem:[#allocation2 + $0x20] sm:$0xff] (!%p5139_p5) }
 0x344   : > { %4307 = vst [vmem:[#allocation2 + $0x1e0] sm:$0xff] %v4243_v56  ;;  %v4245_v63 = vadd.f32 %v5241_v57, %v719_v54  ;;  %v6179_v36 = vpop.eup (!%p5139_p5), %6178  ;;  %v4479_v37 = vadd.f32 (!%p5139_p5), 1.0, %v6177_v34  ;;  %v5153_v57 = vmul.f32 (!%p5139_p5), -1.442695, %v4342_v46  ;;  %v5155_v3 = vmul.f32 (!%p5139_p5), -1.442695, %v4346_v53 }
 0x345   : > { %4308 = vst [vmem:[#allocation2 + $0x1e8] sm:$0xff] %v4244_v61  ;;  %v4246_v0 = vadd.f32 %v5242_v62, %v720_v59  ;;  %v6181_v38 = vpop.eup (!%p5139_p5), %6180  ;;  %6200 = vrcp.f32 (!%p5139_p5), %v4478_v35  ;;  %v4480_v39 = vadd.f32 (!%p5139_p5), 1.0, %v6179_v36  ;;  %v5154_v62 = vmul.f32 (!%p5139_p5), -1.442695, %v4344_v49  ;;  %v4333_v32 = vld [vmem:[#allocation2 + $0x90] sm:$0xff] (!%p5139_p5)  ;;  %v4364_v34 = vld [vmem:[#allocation2 + $0x188] sm:$0xff] (!%p5139_p5) }
 0x346   : > { %4309 = vst [vmem:[#allocation2 + $0x1f0] sm:$0xff] %v4245_v63  ;;  %v6183_v40 = vpop.eup (!%p5139_p5), %6182  ;;  %6202 = vrcp.f32 (!%p5139_p5), %v4479_v37  ;;  %v4481_v41 = vadd.f32 (!%p5139_p5), 1.0, %v6181_v38  ;;  %v4350_v63 = vld [vmem:[#allocation2 + $0x118] sm:$0xff] (!%p5139_p5)  ;;  %v5156_v8 = vmul.f32 (!%p5139_p5), -1.442695, %v4348_v58  ;;  %v4335_v37 = vld [vmem:[#allocation2 + $0xa0] sm:$0xff] (!%p5139_p5) }
 0x347   : > { %4310 = vst [vmem:[#allocation2 + $0x1f8] sm:$0xff] %v4246_v0  ;;  %v6185_v42 = vpop.eup (!%p5139_p5), %6184  ;;  %6204 = vrcp.f32 (!%p5139_p5), %v4480_v39  ;;  %v4482_v43 = vadd.f32 (!%p5139_p5), 1.0, %v6183_v40  ;;  %v5157_v13 = vmul.f32 (!%p5139_p5), -1.442695, %v4350_v63  ;;  %v5162_v38 = vmul.f32 (!%p5139_p5), -1.442695, %v4360_v24 }
 0x348   : > { %v6187_v44 = vpop.eup %6186  ;;  %6206 = vrcp.f32 %v4481_v41  ;;  %v4483_v45 = vadd.f32 1.0, %v6185_v42  ;;  %v4366_v39 = vld [vmem:[#allocation2 + $0x198] sm:$0xff]  ;;  %v4337_v42 = vld [vmem:[#allocation2 + $0xb0] sm:$0xff]  ;;  %v4339_v46 = vld [vmem:[#allocation2 + $0xc0] sm:$0xff] }
 0x349   : > { %v6189_v47 = vpop.eup %6188  ;;  %6208 = vrcp.f32 %v4482_v43  ;;  %v4484_v48 = vadd.f32 1.0, %v6187_v44  ;;  %v5163_v43 = vmul.f32 -1.442695, %v4362_v29  ;;  %v4347_v29 = vld [vmem:[#allocation2 + $0x100] sm:$0xff] }
 0x34a   : > { %v6191_v50 = vpop.eup %6190  ;;  %6210 = vrcp.f32 %v4483_v45  ;;  %v4485_v52 = vadd.f32 1.0, %v6189_v47  ;;  %v5164_v47 = vmul.f32 -1.442695, %v4364_v34  ;;  %v4349_v34 = vld [vmem:[#allocation2 + $0x110] sm:$0xff] }
 0x34b   : > { %v6193_v54 = vpop.eup %6192  ;;  %6212 = vrcp.f32 %v4484_v48  ;;  %v4486_v56 = vadd.f32 1.0, %v6191_v50  ;;  %v5165_v50 = vmul.f32 -1.442695, %v4366_v39 }
 0x34c   : > { %v6195_v59 = vpop.eup %6194  ;;  %6214 = vrcp.f32 %v4485_v52  ;;  %v4487_v61 = vadd.f32 1.0, %v6193_v54 }
 0x34d   : > { %v6197_v0 = vpop.eup %6196  ;;  %v4571_v1 = vmul.f32 %v6195_v59, %v4315_v51  ;;  %6216 = vrcp.f32 %v4486_v56 }
 0x34e   : > { %v6199_v5 = vpop.eup %6198  ;;  %v4572_v6 = vmul.f32 %v6197_v0, %v4317_v55  ;;  %6218 = vrcp.f32 %v4487_v61 }
 0x34f   : > { %v6201_v10 = vpop.eup %6200  ;;  %4603 = vst [vmem:[%s6928_s23] sm:$0xff] %v4571_v1  ;;  %v4573_v11 = vmul.f32 %v6199_v5, %v4319_v60  ;;  %6220 = vpow2.f32 %v5153_v57 }
 0x350   : > { %v6203_v15 = vpop.eup %6202  ;;  %4604 = vst [vmem:[%s6928_s23 + $0x8] sm:$0xff] %v4572_v6  ;;  %v4574_v16 = vmul.f32 %v6201_v10, %v4321_v2  ;;  %6222 = vpow2.f32 %v5154_v62 }
 0x351   : > { %v6205_v20 = vpop.eup %6204  ;;  %4605 = vst [vmem:[%s6928_s23 + $0x10] sm:$0xff] %v4573_v11  ;;  %v4575_v21 = vmul.f32 %v6203_v15, %v4323_v7  ;;  %6224 = vpow2.f32 %v5155_v3 }
 0x352   : > { %v6207_v25 = vpop.eup %6206  ;;  %4606 = vst [vmem:[%s6928_s23 + $0x18] sm:$0xff] %v4574_v16  ;;  %v4576_v26 = vmul.f32 %v6205_v20, %v4325_v12  ;;  %6226 = vpow2.f32 %v5156_v8  ;;  %v4370_v12 = vld [vmem:[#allocation2 + $0x1b8] sm:$0xff]  ;;  %v4372_v16 = vld [vmem:[#allocation2 + $0x1c8] sm:$0xff]  ;;  %v5166_v20 = vmul.f32 -1.442695, %v4368_v9 }
 0x353   : > { %v6209_v30 = vpop.eup %6208  ;;  %4607 = vst [vmem:[%s6928_s23 + $0x20] sm:$0xff] %v4575_v21  ;;  %v4577_v31 = vmul.f32 %v6207_v25, %v4327_v17  ;;  %6228 = vpow2.f32 %v5157_v13  ;;  %v4374_v21 = vld [vmem:[#allocation2 + $0x1d8] sm:$0xff]  ;;  %v5167_v25 = vmul.f32 -1.442695, %v4370_v12 }
 0x354   : > { %v6211_v35 = vpop.eup %6210  ;;  %4608 = vst [vmem:[%s6928_s23 + $0x28] sm:$0xff] %v4576_v26  ;;  %v4578_v36 = vmul.f32 %v6209_v30, %v4329_v22  ;;  %6230 = vpow2.f32 %v5158_v18  ;;  %v4343_v18 = vld [vmem:[#allocation2 + $0xe0] sm:$0xff]  ;;  %v4376_v26 = vld [vmem:[#allocation2 + $0x1e8] sm:$0xff]  ;;  %v5168_v30 = vmul.f32 -1.442695, %v4372_v16  ;;  %v4369_v16 = vld [vmem:[#allocation2 + $0x1b0] sm:$0xff] }
 0x355   : > { %v6213_v40 = vpop.eup %6212  ;;  %4609 = vst [vmem:[%s6928_s23 + $0x30] sm:$0xff] %v4577_v31  ;;  %v4579_v41 = vmul.f32 %v6211_v35, %v4331_v27  ;;  %6232 = vpow2.f32 %v5159_v23  ;;  %v4345_v23 = vld [vmem:[#allocation2 + $0xf0] sm:$0xff]  ;;  %v4378_v31 = vld [vmem:[#allocation2 + $0x1f8] sm:$0xff]  ;;  %v5169_v35 = vmul.f32 -1.442695, %v4374_v21 }
 0x356   : > { %v6215_v44 = vpop.eup %6214  ;;  %4610 = vst [vmem:[%s6928_s23 + $0x38] sm:$0xff] %v4578_v36  ;;  %v4580_v45 = vmul.f32 %v6213_v40, %v4333_v32  ;;  %6234 = vpow2.f32 %v5160_v28  ;;  %v5170_v39 = vmul.f32 -1.442695, %v4376_v26  ;;  %v4373_v21 = vld [vmem:[#allocation2 + $0x1d0] sm:$0xff] }
 0x357   : > { %v6217_v48 = vpop.eup %6216  ;;  %4611 = vst [vmem:[%s6928_s23 + $0x40] sm:$0xff] %v4579_v41  ;;  %v4581_v49 = vmul.f32 %v6215_v44, %v4335_v37  ;;  %6236 = vpow2.f32 %v5161_v33 }
 0x358   : > { %v6219_v51 = vpop.eup %6218  ;;  %4612 = vst [vmem:[%s6928_s23 + $0x48] sm:$0xff] %v4580_v45  ;;  %v4582_v52 = vmul.f32 %v6217_v48, %v4337_v42  ;;  %6238 = vpow2.f32 %v5162_v38  ;;  %v4351_v38 = vld [vmem:[#allocation2 + $0x120] sm:$0xff]  ;;  %v4353_v42 = vld [vmem:[#allocation2 + $0x130] sm:$0xff] }
 0x359   : > { %v6221_v53 = vpop.eup %6220  ;;  %4613 = vst [vmem:[%s6928_s23 + $0x50] sm:$0xff] %v4581_v49  ;;  %v4583_v54 = vmul.f32 %v6219_v51, %v4339_v46  ;;  %6240 = vpow2.f32 %v5163_v43  ;;  %v5171_v43 = vmul.f32 -1.442695, %v4378_v31  ;;  %v4355_v46 = vld [vmem:[#allocation2 + $0x140] sm:$0xff]  ;;  %v4357_v49 = vld [vmem:[#allocation2 + $0x150] sm:$0xff] }
 0x35a   : > { %v6223_v55 = vpop.eup %6222  ;;  %4614 = vst [vmem:[%s6928_s23 + $0x58] sm:$0xff] %v4582_v52  ;;  %v4488_v56 = vadd.f32 1.0, %v6221_v53  ;;  %6242 = vpow2.f32 %v5164_v47  ;;  %v4359_v52 = vld [vmem:[#allocation2 + $0x160] sm:$0xff] }
 0x35b   : > { %v6225_v57 = vpop.eup %6224  ;;  %4615 = vst [vmem:[%s6928_s23 + $0x60] sm:$0xff] %v4583_v54  ;;  %v4489_v58 = vadd.f32 1.0, %v6223_v55  ;;  %6244 = vpow2.f32 %v5165_v50  ;;  %v4361_v55 = vld [vmem:[#allocation2 + $0x170] sm:$0xff] }
 0x35c   : > { %v6227_v59 = vpop.eup %6226  ;;  %6246 = vrcp.f32 %v4488_v56  ;;  %v4490_v60 = vadd.f32 1.0, %v6225_v57 }
 0x35d   : > { %v6229_v61 = vpop.eup %6228  ;;  %6248 = vrcp.f32 %v4489_v58  ;;  %v4491_v62 = vadd.f32 1.0, %v6227_v59  ;;  %v4363_v58 = vld [vmem:[#allocation2 + $0x180] sm:$0xff] }
 0x35e   : > { %v6231_v63 = vpop.eup %6230  ;;  %6250 = vrcp.f32 %v4490_v60  ;;  %v4492_v0 = vadd.f32 1.0, %v6229_v61  ;;  %v4365_v61 = vld [vmem:[#allocation2 + $0x190] sm:$0xff] }
 0x35f   : > { %v6233_v1 = vpop.eup %6232  ;;  %6252 = vrcp.f32 %v4491_v62  ;;  %v4493_v2 = vadd.f32 1.0, %v6231_v63 }
 0x360   : > { %v6235_v3 = vpop.eup %6234  ;;  %6254 = vrcp.f32 %v4492_v0  ;;  %v4494_v4 = vadd.f32 1.0, %v6233_v1 }
 0x361   : > { %v6237_v5 = vpop.eup %6236  ;;  %6256 = vrcp.f32 %v4493_v2  ;;  %v4495_v6 = vadd.f32 1.0, %v6235_v3 }
 0x362   : > { %v6239_v7 = vpop.eup %6238  ;;  %6258 = vrcp.f32 %v4494_v4  ;;  %v4496_v8 = vadd.f32 1.0, %v6237_v5 }
 0x363   : > { %v6241_v10 = vpop.eup %6240  ;;  %6260 = vrcp.f32 %v4495_v6  ;;  %v4497_v11 = vadd.f32 1.0, %v6239_v7 }
 0x364   : > { %v6243_v13 = vpop.eup %6242  ;;  %6262 = vrcp.f32 %v4496_v8  ;;  %v4498_v15 = vadd.f32 1.0, %v6241_v10 }
 0x365   : > { %v6245_v17 = vpop.eup %6244  ;;  %6264 = vrcp.f32 %v4497_v11  ;;  %v4499_v19 = vadd.f32 1.0, %v6243_v13 }
 0x366   : > { %v6247_v22 = vpop.eup %6246  ;;  %6266 = vrcp.f32 %v4498_v15  ;;  %v4500_v24 = vadd.f32 1.0, %v6245_v17  ;;  %v4367_v15 = vld [vmem:[#allocation2 + $0x1a0] sm:$0xff] }
 0x367   : > { %v6249_v27 = vpop.eup %6248  ;;  %v4584_v28 = vmul.f32 %v6247_v22, %v4341_v14  ;;  %6268 = vrcp.f32 %v4499_v19 }
 0x368   : > { %v6251_v32 = vpop.eup %6250  ;;  %v4585_v33 = vmul.f32 %v6249_v27, %v4343_v18  ;;  %6270 = vrcp.f32 %v4500_v24  ;;  %v4371_v18 = vld [vmem:[#allocation2 + $0x1c0] sm:$0xff]  ;;  %v4377_v27 = vld [vmem:[#allocation2 + $0x1f0] sm:$0xff] }
 0x369   : > { %v6253_v36 = vpop.eup %6252  ;;  %4616 = vst [vmem:[%s6928_s23 + $0x68] sm:$0xff] %v4584_v28  ;;  %v4586_v37 = vmul.f32 %v6251_v32, %v4345_v23  ;;  %6272 = vpow2.f32 %v5166_v20  ;;  %v4375_v24 = vld [vmem:[#allocation2 + $0x1e0] sm:$0xff] }
 0x36a   : > { %v6255_v40 = vpop.eup %6254  ;;  %4617 = vst [vmem:[%s6928_s23 + $0x70] sm:$0xff] %v4585_v33  ;;  %v4587_v41 = vmul.f32 %v6253_v36, %v4347_v29  ;;  %6274 = vpow2.f32 %v5167_v25 }
 0x36b   : > { %v6257_v44 = vpop.eup %6256  ;;  %4618 = vst [vmem:[%s6928_s23 + $0x78] sm:$0xff] %v4586_v37  ;;  %v4588_v45 = vmul.f32 %v6255_v40, %v4349_v34  ;;  %6276 = vpow2.f32 %v5168_v30 }
 0x36c   : > { %v6259_v47 = vpop.eup %6258  ;;  %4619 = vst [vmem:[%s6928_s23 + $0x80] sm:$0xff] %v4587_v41  ;;  %v4589_v48 = vmul.f32 %v6257_v44, %v4351_v38  ;;  %6278 = vpow2.f32 %v5169_v35 }
 0x36d   : > { %v6261_v50 = vpop.eup %6260  ;;  %4620 = vst [vmem:[%s6928_s23 + $0x88] sm:$0xff] %v4588_v45  ;;  %v4590_v51 = vmul.f32 %v6259_v47, %v4353_v42  ;;  %6280 = vpow2.f32 %v5170_v39 }
 0x36e   : > { %v6263_v53 = vpop.eup %6262  ;;  %4621 = vst [vmem:[%s6928_s23 + $0x90] sm:$0xff] %v4589_v48  ;;  %v4591_v54 = vmul.f32 %v6261_v50, %v4355_v46  ;;  %6282 = vpow2.f32 %v5171_v43 }
 0x36f   : > { %v6265_v56 = vpop.eup %6264  ;;  %4622 = vst [vmem:[%s6928_s23 + $0x98] sm:$0xff] %v4590_v51  ;;  %v4592_v57 = vmul.f32 %v6263_v53, %v4357_v49 }
 0x370   : > { %v6267_v59 = vpop.eup %6266  ;;  %4623 = vst [vmem:[%s6928_s23 + $0xa0] sm:$0xff] %v4591_v54  ;;  %v4593_v60 = vmul.f32 %v6265_v56, %v4359_v52 }
 0x371   : > { %v6269_v62 = vpop.eup %6268  ;;  %4624 = vst [vmem:[%s6928_s23 + $0xa8] sm:$0xff] %v4592_v57  ;;  %v4594_v63 = vmul.f32 %v6267_v59, %v4361_v55 }
 0x372   : > { %v6271_v0 = vpop.eup %6270  ;;  %4625 = vst [vmem:[%s6928_s23 + $0xb0] sm:$0xff] %v4593_v60  ;;  %v4595_v1 = vmul.f32 %v6269_v62, %v4363_v58 }
 0x373   : > { %v6273_v2 = vpop.eup %6272  ;;  %4626 = vst [vmem:[%s6928_s23 + $0xb8] sm:$0xff] %v4594_v63  ;;  %v4596_v3 = vmul.f32 %v6271_v0, %v4365_v61 }
 0x374   : > { %v6275_v4 = vpop.eup %6274  ;;  %4627 = vst [vmem:[%s6928_s23 + $0xc0] sm:$0xff] %v4595_v1  ;;  %v4501_v5 = vadd.f32 1.0, %v6273_v2 }
 0x375   : > { %v6277_v6 = vpop.eup %6276  ;;  %4628 = vst [vmem:[%s6928_s23 + $0xc8] sm:$0xff] %v4596_v3  ;;  %v4502_v7 = vadd.f32 1.0, %v6275_v4 }
 0x376   : > { %v6279_v8 = vpop.eup %6278  ;;  %6284 = vrcp.f32 %v4501_v5  ;;  %v4503_v9 = vadd.f32 1.0, %v6277_v6 }
 0x377   : > { %v6281_v10 = vpop.eup %6280  ;;  %6286 = vrcp.f32 %v4502_v7  ;;  %v4504_v11 = vadd.f32 1.0, %v6279_v8 }
 0x378   : > { %v6283_v12 = vpop.eup %6282  ;;  %6288 = vrcp.f32 %v4503_v9  ;;  %v4505_v13 = vadd.f32 1.0, %v6281_v10 }
 0x379   : > { %6290 = vrcp.f32 %v4504_v11  ;;  %v4506_v14 = vadd.f32 1.0, %v6283_v12 }
 0x37a   : > { %6292 = vrcp.f32 %v4505_v13 }
 0x37b   : > { %6294 = vrcp.f32 %v4506_v14 }
 0x380   : > { %v6285_v17 = vpop.eup %6284 }
 0x381   : > { %v6287_v19 = vpop.eup %6286  ;;  %v4597_v20 = vmul.f32 %v6285_v17, %v4367_v15 }
 0x382   : > { %v6289_v22 = vpop.eup %6288  ;;  %v4598_v23 = vmul.f32 %v6287_v19, %v4369_v16 }
 0x383   : > { %v6291_v25 = vpop.eup %6290  ;;  %4629 = vst [vmem:[%s6928_s23 + $0xd0] sm:$0xff] %v4597_v20  ;;  %v4599_v26 = vmul.f32 %v6289_v22, %v4371_v18 }
 0x384   : > { %v6293_v28 = vpop.eup %6292  ;;  %4630 = vst [vmem:[%s6928_s23 + $0xd8] sm:$0xff] %v4598_v23  ;;  %v4600_v29 = vmul.f32 %v6291_v25, %v4373_v21 }
 0x385   : > { %v6295_v30 = vpop.eup %6294  ;;  %4631 = vst [vmem:[%s6928_s23 + $0xe0] sm:$0xff] %v4599_v26  ;;  %v4601_v31 = vmul.f32 %v6293_v28, %v4375_v24 }
 0x386   : > { %4632 = vst [vmem:[%s6928_s23 + $0xe8] sm:$0xff] %v4600_v29  ;;  %v4602_v32 = vmul.f32 %v6295_v30, %v4377_v27 }
 0x387   : > { %4633 = vst [vmem:[%s6928_s23 + $0xf0] sm:$0xff] %v4601_v31 }
 0x388   : > { %4634 = vst [vmem:[%s6928_s23 + $0xf8] sm:$0xff] %v4602_v32 }
 0x389 PF: > { %s5178_s12 = sshll.u32 %s6394_s15, 12  ;;  %s4649_s5 = sshll.u32 %s6928_s23, 4  ;;  %s7419_s5 = int_to_ptr.vmem [resolvable:$true] %s4649_s5 }
 0x38a   : > { %s7416_s28 = scalar_lea.hbm %s7483_s2, %s5178_s12  ;;  %s7423_s6 = scalar_lea.sflag [#allocation5], %s576_s29 }
 0x38b   : > { %s6296_s7 = scalar_lea.vmem %s7419_s5, 4096  ;;  %s6409_s15 = smov [#allocation4]  }
 0x38c   : > { %p6297_p6 = scmp.ne.s32.totalorder %s7419_s5, %s6296_s7  ;;  %s6300_s8 = sshll.u32 %s6409_s15, 4  ;;  %s6301_s8 = int_to_ptr.vmem [resolvable:$false] %s6300_s8 }
 0x38d   : > { %s6302_s19 = scalar_lea.vmem %s6301_s8, 8192  ;;  %p6303_p10 = scmp.lt.s32.totalorder %s7419_s5, %s6301_s8 }
 0x38e   : > { %p6298_p8 = pnand %p6297_p6, %p6499_p7  ;;  %p6304_p11 = scmp.lt.s32.totalorder %s6302_s19, %s6296_s7 }
 0x390   : > { %p6299_p9 = pneg %p6298_p8  ;;  %p6305_p13 = por %p6304_p11, %p6303_p10 }
 0x392   : > { %p6306_p0 = pnand %p6305_p13, %p6299_p9 }
 0x394   : > { %6309 = shalt.err (!%p6306_p0)
}
 0x395   : > { %s6310_s29 = scalar_lea.hbm %s7416_s28, 4096  ;;  %s6314_s26 = scalar_lea.hbm %s7483_s2, 8192 }
 0x396   : > { %p6311_p1 = scmp.ne.s32.totalorder %s7416_s28, %s6310_s29  ;;  %p6315_p4 = scmp.lt.u32.totalorder %s7416_s28, %s7483_s2 }
 0x397   : > { %p6316_p5 = scmp.lt.u32.totalorder %s6314_s26, %s6310_s29  ;;  %p6318_p8 = scmp.lt.u32.totalorder %s6310_s29, %s7416_s28 }
 0x398   : > { %p6312_p2 = pnand %p6311_p1, %p6499_p7 }
 0x399   : > { %p6317_p6 = por %p6316_p5, %p6315_p4 }
 0x39a   : > { %p6313_p3 = pneg %p6312_p2 }
 0x39b   : > { %p6319_p9 = por %p6318_p8, %p6317_p6 }
 0x39d   : > { %p6320_p10 = pnand %p6319_p9, %p6313_p3 }
 0x39f   : > { %6323 = shalt.err (!%p6320_p10)
}
 0x3a0   : > { %s6410_s14 = smov 128   ;;  %s6411_s25 = smov 8  }
 0x3a1   : > { %5502 = dma.vmem_to_hbm [thread:$0]  (%p6499_p7), %s7419_s5, 4096, %s7416_s28, %s7423_s6, %s6410_s14, %s6410_s14, %s6411_s25  }
 0x3a2 PF: > { %p5508_p11 = scmp.ge.s32.totalorder %s6406_s18, 2  ;;  %s4664_s7 = sand.u32 1, %s6370_s9  }
 0x3a3   : > { %s4665_s15 = scalar_lea.sflag [#allocation5], %s4664_s7 }
 0x3a4   : > { %p5505_p13 = pnand %p5508_p11, %p6507_p12 }
 0x3a6   : > { %6365 = dma.done.wait (!%p5505_p13), %s4665_s15, 4096  }
 0x3a7   : > { %6367 = vsyncadd (!%p5505_p13), %s4665_s15, 4294963200  ;;  %s15_s18 = sadd.s32 1, %s6406_s18   ;;  %s7487_s9 = smov %s6374_s10 }
 0x3a8   : > { %p12_p0 = scmp.ge.s32.totalorder %s15_s18, 8   ;;  %s7488_s10 = smov %s6378_s11 }
 0x3a9   : > { %s7489_s11 = smov %s6512_s3  ;;  %s7490_s12 = smov %s6386_s13 }
 0x3aa   : > { %s7491_s13 = smov %s6515_s4  ;;  %s7492_s14 = smov %s6398_s16 }
 0x3ab   : > { %s7493_s15 = smov %s6402_s17  ;;  %s7494_s16 = smov %s7497_s21 }
 0x3ac   : > { %s7495_s17 = smov %s7501_s22  ;;  %14 = sbr.rel (!%p12_p0) target bundleno = 6 (0x6), region = 102 }
 0x3b3   :  { %4670 = vsyncpa [#allocation5], 1 }
 0x3b4   :  { %4672 = vsyncpa [#allocation5 + $0x1], 1 }

</bundles_post_ra>
